<compile_context>
chip_gen: v5e
topology: v5e:2x2
jax: 0.10.0
libtpu: 0.0.40
codegen_flags: <defaults>
</compile_context>

<pallas_src>
import functools

import jax
import jax.numpy as jnp
from jax.experimental import pallas as pl
from jax.experimental.pallas import tpu as pltpu

LANES = 128     # hidden feature dim padded to full lane width (lane-dense h)
TM = 1024       # batch rows per grid step: N=2048 -> 2 even steps (v7x megacore)


def mlp_kernel(x_ref, w1_ref, b1_ref, w2_ref, b2_ref, o_ref):
    # x: (TM, F) f32, w1: (F, HP) f32, b1: (1, HP) f32,
    # w2: (HP, HP) f32, b2: (1, n_out) f32, o: (TM, n_out) f32.
    x = x_ref[...]
    w1 = w1_ref[...]
    n_feature = x.shape[1]
    n_out = o_ref.shape[1]

    # ---- Layer 1 on the VPU: h = relu(x @ w1 + b1), statically unrolled (F == 2) ----
    h = x[:, 0:1] * w1[0:1, :]
    for f in range(1, n_feature):                 # static unroll over tiny K
        h = h + x[:, f:f + 1] * w1[f:f + 1, :]
    h = jnp.maximum(h + b1_ref[...], 0.0)         # bias + ReLU, all f32

    # ---- Layer 2 on the MXU: pure f32 operands, f32 accumulation (no bf16 casts) ----
    y = jnp.dot(h, w2_ref[...], preferred_element_type=jnp.float32)

    # Narrow, real-width store: only n_output columns go back to HBM.
    o_ref[...] = (y[:, :n_out] + b2_ref[...]).astype(o_ref.dtype)


def net_forward(x, w1p, b1p, w2p, b2, *, n_output, tm=TM):
    """Gridded Pallas forward. x: (N, F) with N % tm == 0; w1p/b1p/w2p lane-padded."""
    n, f = x.shape
    hp = w1p.shape[1]
    return pl.pallas_call(
        mlp_kernel,
        out_shape=jax.ShapeDtypeStruct((n, n_output), jnp.float32),
        grid_spec=pltpu.PrefetchScalarGridSpec(
            num_scalar_prefetch=0,
            grid=(n // tm,),
            in_specs=[
                pl.BlockSpec((tm, f), lambda i: (i, 0)),        # x tile, pipelined
                pl.BlockSpec((f, hp), lambda i: (0, 0)),        # w1 (VMEM-resident)
                pl.BlockSpec((1, hp), lambda i: (0, 0)),        # b1
                pl.BlockSpec((hp, hp), lambda i: (0, 0)),       # w2
                pl.BlockSpec((1, n_output), lambda i: (0, 0)),  # b2 (real width)
            ],
            out_specs=pl.BlockSpec((tm, n_output), lambda i: (i, 0)),  # narrow output
        ),
        compiler_params=pltpu.CompilerParams(
            dimension_semantics=("parallel",),   # shard batch tiles across TCs on v7x
        ),
    )(x, w1p, b1p, w2p, b2)


def net_apply(x, w1p, b1p, w2p, b2, *, n_output, tm=TM):
    """Pad the batch to a tile multiple if needed (no-op at the demo shape)."""
    # TODO(synk): for arbitrary N, replace the pad with grid=pl.cdiv(n, tm) plus a
    # pl.when-guarded masked tail store to avoid the extra HBM copy of x.
    n = x.shape[0]
    pad = -n % tm
    if pad:
        x = jnp.pad(x, ((0, pad), (0, 0)))
    out = net_forward(x, w1p, b1p, w2p, b2, n_output=n_output, tm=tm)
    if pad:
        out = out[:n]
    return out


def pad_lanes(a, rows=None, cols=LANES):
    r = a.shape[0] if rows is None else rows
    return jnp.pad(a, ((0, r - a.shape[0]), (0, cols - a.shape[1])))


def init_linear_params(key, fan_in, fan_out):
    """torch.nn.Linear default init: U(-1/sqrt(in), 1/sqrt(in)); stored as (in, out)."""
    kw, kb = jax.random.split(key)
    bound = 1.0 / jnp.sqrt(jnp.float32(fan_in))
    w = jax.random.uniform(kw, (fan_in, fan_out), jnp.float32, -bound, bound)
    b = jax.random.uniform(kb, (1, fan_out), jnp.float32, -bound, bound)
    return w, b


def reference_forward(x, w1, b1, w2, b2):
    h = jnp.maximum(
        jnp.dot(x, w1, precision=jax.lax.Precision.HIGHEST) + b1, 0.0)
    return jnp.dot(h, w2, precision=jax.lax.Precision.HIGHEST) + b2


if __name__ == "__main__":
    # Net(n_feature=2, n_hidden=10, n_output=2); whole two-blob dataset in one launch.
    n_feature, n_hidden, n_output = 2, 10, 2
    half = 1024                                   # 1024 samples per class -> N = 2048

    key = jax.random.PRNGKey(0)
    k_x0, k_x1, k_h, k_o = jax.random.split(key, 4)

    # Synthetic 2-class blobs like the original script: N(+2, 1) and N(-2, 1).
    x0 = 2.0 + jax.random.normal(k_x0, (half, n_feature), jnp.float32)
    x1 = -2.0 + jax.random.normal(k_x1, (half, n_feature), jnp.float32)
    x = jnp.concatenate([x0, x1], axis=0)         # (2048, 2)

    w1, b1 = init_linear_params(k_h, n_feature, n_hidden)   # (2, 10), (1, 10)
    w2, b2 = init_linear_params(k_o, n_hidden, n_output)    # (10, 2), (1, 2)

    # Zero-pad only the hidden dim to 128 lanes (zeros are inert through ReLU and
    # the second matmul); the output stays at its real width end to end.
    w1p = pad_lanes(w1)                           # (2, 128)
    b1p = pad_lanes(b1)                           # (1, 128)
    w2p = pad_lanes(w2, rows=LANES)               # (128, 128); real cols are [:, :2]
    # b2 stays (1, 2)

    fwd = jax.jit(functools.partial(net_apply, n_output=n_output, tm=TM))
    out = fwd(x, w1p, b1p, w2p, b2)
    jax.block_until_ready(out)

    ref = reference_forward(x, w1, b1, w2, b2)
    assert out.shape == (2 * half, n_output)
    # All-f32 kernel => tight tolerance vs. the f32 reference.
    assert jnp.allclose(out, ref, atol=1e-2, rtol=1e-3), (
        float(jnp.max(jnp.abs(out - ref))))

    print("KERNEL_OK")
</pallas_src>

<mosaic_0001>
module attributes {stable_mosaic.version = 11 : i64} {
  func.func @mlp_kernel(%arg0: i32, %arg1: memref<1024x2xf32, #tpu.memory_space<vmem>>, %arg2: memref<2x128xf32, #tpu.memory_space<vmem>>, %arg3: memref<1x128xf32, #tpu.memory_space<vmem>>, %arg4: memref<128x128xf32, #tpu.memory_space<vmem>>, %arg5: memref<1x2xf32, #tpu.memory_space<vmem>>, %arg6: memref<1024x2xf32, #tpu.memory_space<vmem>>) attributes {dimension_semantics = [#tpu.dimension_semantics<parallel>], iteration_bounds = array<i64: 2>, scalar_prefetch = 0 : i64, scratch_operands = 0 : i64, tpu.core_type = #tpu.core_type<tc>, window_params = [{transform_indices = @transform_0, window_bounds = array<i64: 1024, 2>}, {pipeline_mode = #tpu.pipeline_mode<synchronous>, transform_indices = @transform_1, window_bounds = array<i64: 2, 128>}, {pipeline_mode = #tpu.pipeline_mode<synchronous>, transform_indices = @transform_2, window_bounds = array<i64: 1, 128>}, {pipeline_mode = #tpu.pipeline_mode<synchronous>, transform_indices = @transform_3, window_bounds = array<i64: 128, 128>}, {pipeline_mode = #tpu.pipeline_mode<synchronous>, transform_indices = @transform_4, window_bounds = array<i64: 1, 2>}, {transform_indices = @transform_5, window_bounds = array<i64: 1024, 2>}]} {
    %c0 = arith.constant 0 : index
    %c0_0 = arith.constant 0 : index
    %0 = vector.load %arg1[%c0, %c0_0] : memref<1024x2xf32, #tpu.memory_space<vmem>>, vector<1024x2xf32>
    %c0_1 = arith.constant 0 : index
    %c0_2 = arith.constant 0 : index
    %1 = vector.load %arg2[%c0_1, %c0_2] : memref<2x128xf32, #tpu.memory_space<vmem>>, vector<2x128xf32>
    %2 = vector.extract_strided_slice %0 {offsets = [0, 0], sizes = [1024, 1], strides = [1, 1]} : vector<1024x2xf32> to vector<1024x1xf32>
    %3 = vector.extract_strided_slice %1 {offsets = [0, 0], sizes = [1, 128], strides = [1, 1]} : vector<2x128xf32> to vector<1x128xf32>
    %4 = vector.broadcast %2 : vector<1024x1xf32> to vector<1024x128xf32>
    %5 = vector.broadcast %3 : vector<1x128xf32> to vector<1024x128xf32>
    %6 = arith.mulf %4, %5 : vector<1024x128xf32>
    %7 = vector.extract_strided_slice %0 {offsets = [0, 1], sizes = [1024, 1], strides = [1, 1]} : vector<1024x2xf32> to vector<1024x1xf32>
    %8 = vector.extract_strided_slice %1 {offsets = [1, 0], sizes = [1, 128], strides = [1, 1]} : vector<2x128xf32> to vector<1x128xf32>
    %9 = vector.broadcast %7 : vector<1024x1xf32> to vector<1024x128xf32>
    %10 = vector.broadcast %8 : vector<1x128xf32> to vector<1024x128xf32>
    %11 = arith.mulf %9, %10 : vector<1024x128xf32>
    %12 = arith.addf %6, %11 : vector<1024x128xf32>
    %c0_3 = arith.constant 0 : index
    %c0_4 = arith.constant 0 : index
    %13 = vector.load %arg3[%c0_3, %c0_4] : memref<1x128xf32, #tpu.memory_space<vmem>>, vector<1x128xf32>
    %14 = vector.broadcast %13 : vector<1x128xf32> to vector<1024x128xf32>
    %15 = arith.addf %12, %14 : vector<1024x128xf32>
    %cst = arith.constant 0.000000e+00 : f32
    %16 = vector.broadcast %cst : f32 to vector<1024x128xf32>
    %17 = arith.maximumf %15, %16 : vector<1024x128xf32>
    %c0_5 = arith.constant 0 : index
    %c0_6 = arith.constant 0 : index
    %18 = vector.load %arg4[%c0_5, %c0_6] : memref<128x128xf32, #tpu.memory_space<vmem>>, vector<128x128xf32>
    %cst_7 = arith.constant dense<0.000000e+00> : vector<1024x128xf32>
    %19 = tpu.matmul %17, %18, %cst_7 {dimension_numbers = #tpu.dot_dimension_numbers<[1], [0], [0], [1], [0, 0, 1, 1], [], []>} : vector<1024x128xf32>, vector<128x128xf32>, vector<1024x128xf32> -> vector<1024x128xf32>
    %20 = vector.extract_strided_slice %19 {offsets = [0, 0], sizes = [1024, 2], strides = [1, 1]} : vector<1024x128xf32> to vector<1024x2xf32>
    %c0_8 = arith.constant 0 : index
    %c0_9 = arith.constant 0 : index
    %21 = vector.load %arg5[%c0_8, %c0_9] : memref<1x2xf32, #tpu.memory_space<vmem>>, vector<1x2xf32>
    %22 = vector.broadcast %21 : vector<1x2xf32> to vector<1024x2xf32>
    %23 = arith.addf %20, %22 : vector<1024x2xf32>
    %c0_10 = arith.constant 0 : index
    %c0_11 = arith.constant 0 : index
    %24 = vector.load %arg6[%c0_10, %c0_11] : memref<1024x2xf32, #tpu.memory_space<vmem>>, vector<1024x2xf32>
    tpu.vector_store %arg6[%c0_10, %c0_11], %23 {strides = array<i32>} : memref<1024x2xf32, #tpu.memory_space<vmem>>, vector<1024x2xf32>,
    return
  }
  func.func @transform_0(%arg0: i32) -> (i32, i32) {
    %c0_i32 = arith.constant 0 : i32
    %c0_i32_0 = arith.constant 0 : i32
    return %arg0, %c0_i32 : i32, i32
  }
  func.func @transform_1(%arg0: i32) -> (i32, i32) {
    %c0_i32 = arith.constant 0 : i32
    %c0_i32_0 = arith.constant 0 : i32
    %c0_i32_1 = arith.constant 0 : i32
    return %c0_i32, %c0_i32_0 : i32, i32
  }
  func.func @transform_2(%arg0: i32) -> (i32, i32) {
    %c0_i32 = arith.constant 0 : i32
    %c0_i32_0 = arith.constant 0 : i32
    %c0_i32_1 = arith.constant 0 : i32
    return %c0_i32, %c0_i32_0 : i32, i32
  }
  func.func @transform_3(%arg0: i32) -> (i32, i32) {
    %c0_i32 = arith.constant 0 : i32
    %c0_i32_0 = arith.constant 0 : i32
    %c0_i32_1 = arith.constant 0 : i32
    return %c0_i32, %c0_i32_0 : i32, i32
  }
  func.func @transform_4(%arg0: i32) -> (i32, i32) {
    %c0_i32 = arith.constant 0 : i32
    %c0_i32_0 = arith.constant 0 : i32
    %c0_i32_1 = arith.constant 0 : i32
    return %c0_i32, %c0_i32_0 : i32, i32
  }
  func.func @transform_5(%arg0: i32) -> (i32, i32) {
    %c0_i32 = arith.constant 0 : i32
    %c0_i32_0 = arith.constant 0 : i32
    return %arg0, %c0_i32 : i32, i32
  }
}

</mosaic_0001>

<bundles_post_ra>
// kernel: net_apply.1
= control target key start
LH: loop header
LB: loop body
LE: loop exit
PB: predicated region body
PF: predicated region fallthrough
CT: control target
= control target key end

     0   :  { %s3047_s18 = smov 0   ;;  %s5003_s0 = inlined_call_operand.vmem [shape: f32[2048,2], index: 0, kind: input, shape index: {}]   ;;  %s5004_s1 = inlined_call_operand.vmem [shape: f32[2,128], index: 1, kind: input, shape index: {}]   ;;  %s5005_s2 = inlined_call_operand.vmem [shape: f32[1,128], index: 2, kind: input, shape index: {}]   ;;  %s5006_s3 = inlined_call_operand.vmem [shape: f32[128,128], index: 3, kind: input, shape index: {}]   ;;  %s5007_s4 = inlined_call_operand.vmem [shape: f32[1,2], index: 4, kind: input, shape index: {}]   ;;  %s5008_s5 = inlined_call_operand.vmem [shape: f32[2048,2], index: 5, kind: output, shape index: {}]  }
   0x1 LB: > { %s2889_s19 = sadd.s32 4294967295, %s3013_s18   ;;  %p2893_p0 = scmp.ge.s32.totalorder %s3013_s18, 1  ;;  %s3013_s18 = sphi %s3047_s18, %s15_s18  }
   0x2   : > { %p188_p1 = scmp.lt.s32.totalorder %s3013_s18, 3 }
   0x4   : > { %p189_p2 = pnand %p2893_p0, %p188_p1 }
   0x6   : > { %192 = sbr.rel (%p189_p2) target bundleno = 1021 (0x3fd), region = 40 }
   0xb   : > { %s2894_s20 = sshll.u32 %s2889_s19, 7  ;;  %v3015_v0 = vmov 0   ;;  %vm2704_vm0 = vcmask 15360  }
   0xc   : > { %2960 = vset.pattern.permute.xlu2 %v3015_v0  ;;  %2959 = vset.pattern.permute.xlu1 %v3015_v0  ;;  %p217_p3 = scmp.lt.s32.totalorder %s2894_s20, 255 }
   0xd   : > { %2958 = vset.pattern.permute.xlu0 %v3015_v0 }
   0xe   : > { %s5360_s20 = smov (!%p217_p3, %s2894_s20), 255 }
   0xf   : > { %s2895_s21 = sshll.u32 %s5360_s20, 3 }
  0x10   : > { %s3063_s24 = scalar_lea.vmem %s5003_s0, %s2895_s21  ;;  %s4011_s22 = scalar_lea.vmem %s5008_s5, %s2895_s21 }
  0x11   : > { %v3066_v1 = vld [vmem:[%s3063_s24 + $0x20] sm:$0xff]  ;;  %v3069_v2 = vld [vmem:[%s3063_s24 + $0x10] sm:$0xff]  ;;  %v3078_v4 = vld [vmem:[%s3063_s24 + $0x28] sm:$0xff] }
  0x12   : > { %v3072_v3 = vld [vmem:[%s3063_s24] sm:$0xff]  ;;  %379 = vperm.xlu2 %2960, %v3066_v1   ;;  %369 = vperm.xlu1 %2959, %v3069_v2   ;;  %v3081_v5 = vld [vmem:[%s3063_s24 + $0x18] sm:$0xff]  ;;  %v3084_v6 = vld [vmem:[%s3063_s24 + $0x8] sm:$0xff] }
  0x13   : > { %359 = vperm.xlu0 %2958, %v3072_v3   ;;  %v3090_v7 = vld [vmem:[%s3063_s24 + $0x40] sm:$0xff]  ;;  %v3093_v8 = vld [vmem:[%s3063_s24 + $0x38] sm:$0xff]  ;;  %v3096_v9 = vld [vmem:[%s3063_s24 + $0x30] sm:$0xff] }
  0x14   : > { %v3102_v10 = vld [vmem:[%s3063_s24 + $0x58] sm:$0xff]  ;;  %v3105_v11 = vld [vmem:[%s3063_s24 + $0x50] sm:$0xff]  ;;  %v3108_v12 = vld [vmem:[%s3063_s24 + $0x48] sm:$0xff] }
  0x15   : > { %v3114_v13 = vld [vmem:[%s3063_s24 + $0x70] sm:$0xff]  ;;  %v3117_v14 = vld [vmem:[%s3063_s24 + $0x68] sm:$0xff]  ;;  %v3120_v15 = vld [vmem:[%s3063_s24 + $0x60] sm:$0xff] }
  0x16   : > { %v3126_v16 = vld [vmem:[%s3063_s24 + $0x88] sm:$0xff]  ;;  %v3129_v17 = vld [vmem:[%s3063_s24 + $0x80] sm:$0xff]  ;;  %v3132_v18 = vld [vmem:[%s3063_s24 + $0x78] sm:$0xff] }
  0x17   : > { %v3138_v19 = vld [vmem:[%s3063_s24 + $0xa0] sm:$0xff]  ;;  %v3141_v20 = vld [vmem:[%s3063_s24 + $0x98] sm:$0xff]  ;;  %v3144_v21 = vld [vmem:[%s3063_s24 + $0x90] sm:$0xff] }
  0x18   : > { %v3150_v22 = vld [vmem:[%s3063_s24 + $0xb8] sm:$0xff]  ;;  %v3153_v23 = vld [vmem:[%s3063_s24 + $0xb0] sm:$0xff]  ;;  %v3156_v24 = vld [vmem:[%s3063_s24 + $0xa8] sm:$0xff] }
  0x19   : > { %v3162_v25 = vld [vmem:[%s3063_s24 + $0xd0] sm:$0xff]  ;;  %v3165_v26 = vld [vmem:[%s3063_s24 + $0xc8] sm:$0xff]  ;;  %v3168_v27 = vld [vmem:[%s3063_s24 + $0xc0] sm:$0xff] }
  0x1a   : > { %384 = vperm.xlu2 %2960, %v3078_v4   ;;  %374 = vperm.xlu1 %2959, %v3081_v5   ;;  %v3174_v28 = vld [vmem:[%s3063_s24 + $0xe8] sm:$0xff]  ;;  %v3177_v29 = vld [vmem:[%s3063_s24 + $0xe0] sm:$0xff]  ;;  %v3180_v30 = vld [vmem:[%s3063_s24 + $0xd8] sm:$0xff] }
  0x1b   : > { %364 = vperm.xlu0 %2958, %v3084_v6   ;;  %v3186_v31 = vld [vmem:[%s3063_s24 + $0x100] sm:$0xff]  ;;  %v3189_v32 = vld [vmem:[%s3063_s24 + $0xf8] sm:$0xff]  ;;  %v3192_v33 = vld [vmem:[%s3063_s24 + $0xf0] sm:$0xff] }
  0x1c   : > { %v3198_v34 = vld [vmem:[%s3063_s24 + $0x118] sm:$0xff]  ;;  %v3201_v35 = vld [vmem:[%s3063_s24 + $0x110] sm:$0xff]  ;;  %v3204_v36 = vld [vmem:[%s3063_s24 + $0x108] sm:$0xff] }
  0x1d   : > { %v3212_v38 = vld [vmem:[%s3063_s24 + $0x130] sm:$0xff]  ;;  %v3215_v39 = vld [vmem:[%s3063_s24 + $0x128] sm:$0xff]  ;;  %v3218_v40 = vld [vmem:[%s3063_s24 + $0x120] sm:$0xff] }
  0x1e   : > { %v3226_v42 = vld [vmem:[%s3063_s24 + $0x148] sm:$0xff]  ;;  %v3229_v43 = vld [vmem:[%s3063_s24 + $0x140] sm:$0xff]  ;;  %v3232_v44 = vld [vmem:[%s3063_s24 + $0x138] sm:$0xff] }
  0x1f   : > { %v3240_v46 = vld [vmem:[%s3063_s24 + $0x160] sm:$0xff]  ;;  %v3243_v47 = vld [vmem:[%s3063_s24 + $0x158] sm:$0xff]  ;;  %v3246_v48 = vld [vmem:[%s3063_s24 + $0x150] sm:$0xff] }
  0x20   : > { %v3258_v52 = vld [vmem:[%s3063_s24 + $0x178] sm:$0xff]  ;;  %v3261_v53 = vld [vmem:[%s3063_s24 + $0x170] sm:$0xff]  ;;  %v3264_v54 = vld [vmem:[%s3063_s24 + $0x168] sm:$0xff] }
  0x21   : > { %v3276_v58 = vld [vmem:[%s3063_s24 + $0x190] sm:$0xff]  ;;  %v3279_v59 = vld [vmem:[%s3063_s24 + $0x188] sm:$0xff]  ;;  %v3282_v60 = vld [vmem:[%s3063_s24 + $0x180] sm:$0xff] }
  0x22   : > { %399 = vperm.xlu2 %2960, %v3090_v7   ;;  %394 = vperm.xlu1 %2959, %v3093_v8   ;;  %5057 = vst [vmem:[#allocation8_spill] sm:$0xff] %v3276_v58  ;;  %v3294_v0 = vld [vmem:[%s3063_s24 + $0x1a8] sm:$0xff] }
  0x23   : > { %389 = vperm.xlu0 %2958, %v3096_v9   ;;  %5058 = vst [vmem:[#allocation9_spill] sm:$0xff] %v3279_v59 }
  0x24   : > { %5062 = vst [vmem:[#allocation13_spill] sm:$0xff] %v3294_v0 }
  0x2a   : > { %414 = vperm.xlu2 %2960, %v3102_v10   ;;  %409 = vperm.xlu1 %2959, %v3105_v11  }
  0x2b   : > { %404 = vperm.xlu0 %2958, %v3108_v12  }
  0x32   : > { %429 = vperm.xlu2 %2960, %v3114_v13   ;;  %424 = vperm.xlu1 %2959, %v3117_v14  }
  0x33   : > { %419 = vperm.xlu0 %2958, %v3120_v15  }
  0x3a   : > { %444 = vperm.xlu2 %2960, %v3126_v16   ;;  %439 = vperm.xlu1 %2959, %v3129_v17  }
  0x3b   : > { %434 = vperm.xlu0 %2958, %v3132_v18  }
  0x42   : > { %459 = vperm.xlu2 %2960, %v3138_v19   ;;  %454 = vperm.xlu1 %2959, %v3141_v20  }
  0x43   : > { %449 = vperm.xlu0 %2958, %v3144_v21  }
  0x4a   : > { %474 = vperm.xlu2 %2960, %v3150_v22   ;;  %469 = vperm.xlu1 %2959, %v3153_v23  }
  0x4b   : > { %464 = vperm.xlu0 %2958, %v3156_v24  }
  0x52   : > { %489 = vperm.xlu2 %2960, %v3162_v25   ;;  %484 = vperm.xlu1 %2959, %v3165_v26  }
  0x53   : > { %479 = vperm.xlu0 %2958, %v3168_v27  }
  0x5a   : > { %504 = vperm.xlu2 %2960, %v3174_v28   ;;  %499 = vperm.xlu1 %2959, %v3177_v29  }
  0x5b   : > { %494 = vperm.xlu0 %2958, %v3180_v30  }
  0x62   : > { %519 = vperm.xlu2 %2960, %v3186_v31   ;;  %514 = vperm.xlu1 %2959, %v3189_v32  }
  0x63   : > { %509 = vperm.xlu0 %2958, %v3192_v33  }
  0x6a   : > { %534 = vperm.xlu2 %2960, %v3198_v34   ;;  %529 = vperm.xlu1 %2959, %v3201_v35  }
  0x6b   : > { %524 = vperm.xlu0 %2958, %v3204_v36  }
  0x6c   : > { %v3209_v37 = vpop.permute.xlu2 %379 }
  0x6d   : > { %5051 = vst [vmem:[#allocation2_spill] sm:$0xff] %v3209_v37  ;;  %v3318_v37 = vld [vmem:[%s3063_s24 + $0x1b0] sm:$0xff] }
  0x6e   : > { %5070 = vst [vmem:[#allocation21_spill] sm:$0xff] %v3318_v37 }
  0x72   : > { %549 = vperm.xlu2 %2960, %v3212_v38   ;;  %544 = vperm.xlu1 %2959, %v3215_v39  }
  0x73   : > { %539 = vperm.xlu0 %2958, %v3218_v40  }
  0x74   : > { %v3223_v41 = vpop.permute.xlu2 %384 }
  0x75   : > { %5052 = vst [vmem:[#allocation3_spill] sm:$0xff] %v3223_v41  ;;  %v3315_v41 = vld [vmem:[%s3063_s24 + $0x1b8] sm:$0xff] }
  0x76   : > { %5069 = vst [vmem:[#allocation20_spill] sm:$0xff] %v3315_v41 }
  0x7a   : > { %564 = vperm.xlu2 %2960, %v3226_v42   ;;  %559 = vperm.xlu1 %2959, %v3229_v43  }
  0x7b   : > { %554 = vperm.xlu0 %2958, %v3232_v44  }
  0x7c   : > { %v3237_v45 = vpop.permute.xlu2 %399 }
  0x7d   : > { %5053 = vst [vmem:[#allocation4_spill] sm:$0xff] %v3237_v45 }
  0x82   : > { %579 = vperm.xlu2 %2960, %v3240_v46   ;;  %574 = vperm.xlu1 %2959, %v3243_v47  }
  0x83   : > { %569 = vperm.xlu0 %2958, %v3246_v48  }
  0x84   : > { %v3251_v49 = vpop.permute.xlu2 %414  ;;  %v3253_v50 = vpop.permute.xlu1 %369 }
  0x85   : > { %5054 = vst [vmem:[#allocation5_spill] sm:$0xff] %v3251_v49  ;;  %v3255_v51 = vpop.permute.xlu0 %359  ;;  %v3300_v49 = vld [vmem:[%s3063_s24 + $0x198] sm:$0xff] }
  0x86   : > { %5064 = vst [vmem:[#allocation15_spill] sm:$0xff] %v3300_v49 }
  0x8a   : > { %594 = vperm.xlu2 %2960, %v3258_v52   ;;  %589 = vperm.xlu1 %2959, %v3261_v53  }
  0x8b   : > { %584 = vperm.xlu0 %2958, %v3264_v54  }
  0x8c   : > { %v3269_v55 = vpop.permute.xlu2 %429  ;;  %v3271_v56 = vpop.permute.xlu1 %374 }
  0x8d   : > { %5055 = vst [vmem:[#allocation6_spill] sm:$0xff] %v3269_v55  ;;  %v3273_v57 = vpop.permute.xlu0 %364  ;;  %v3297_v55 = vld [vmem:[%s3063_s24 + $0x1a0] sm:$0xff] }
  0x8e   : > { %5056 = vst [vmem:[#allocation7_spill] sm:$0xff] %v3271_v56  ;;  %v3016_v56 = vmov 1  }
  0x8f   : > { %5063 = vst [vmem:[#allocation14_spill] sm:$0xff] %v3297_v55 }
  0x92   : > { %609 = vperm.xlu2 %2960, %v3276_v58   ;;  %604 = vperm.xlu1 %2959, %v3279_v59   ;;  %v289_v58 = vld [vmem:[%s3063_s24 + $0x1e8] sm:$0xff]  ;;  %v351_v59 = vld [vmem:[%s3063_s24 + $0x3d8] sm:$0xff] }
  0x93   : > { %599 = vperm.xlu0 %2958, %v3282_v60  }
  0x94   : > { %v3287_v61 = vpop.permute.xlu2 %444  ;;  %v3289_v62 = vpop.permute.xlu1 %394 }
  0x95   : > { %5059 = vst [vmem:[#allocation10_spill] sm:$0xff] %v3287_v61  ;;  %v3291_v63 = vpop.permute.xlu0 %389 }
  0x96   : > { %5060 = vst [vmem:[#allocation11_spill] sm:$0xff] %v3289_v62 }
  0x97   : > { %5061 = vst [vmem:[#allocation12_spill] sm:$0xff] %v3291_v63  ;;  %v3312_v63 = vld [vmem:[%s3063_s24 + $0x1c0] sm:$0xff] }
  0x98   : > { %5068 = vst [vmem:[#allocation19_spill] sm:$0xff] %v3312_v63 }
  0x9a   : > { %624 = vperm.xlu2 %2960, %v3294_v0   ;;  %619 = vperm.xlu1 %2959, %v3297_v55   ;;  %v287_v0 = vld [vmem:[%s3063_s24 + $0x1d8] sm:$0xff]  ;;  %v286_v55 = vld [vmem:[%s3063_s24 + $0x1d0] sm:$0xff] }
  0x9b   : > { %614 = vperm.xlu0 %2958, %v3300_v49   ;;  %v285_v49 = vld [vmem:[%s3063_s24 + $0x1c8] sm:$0xff] }
  0x9c   : > { %v3305_v61 = vpop.permute.xlu2 %459  ;;  %v3307_v45 = vpop.permute.xlu1 %409 }
  0x9d   : > { %5065 = vst [vmem:[#allocation16_spill] sm:$0xff] %v3305_v61  ;;  %v3309_v62 = vpop.permute.xlu0 %404 }
  0x9e   : > { %5066 = vst [vmem:[#allocation17_spill] sm:$0xff] %v3307_v45 }
  0x9f   : > { %5067 = vst [vmem:[#allocation18_spill] sm:$0xff] %v3309_v62 }
  0xa2   : > { %639 = vperm.xlu2 %2960, %v3312_v63   ;;  %634 = vperm.xlu1 %2959, %v3315_v41  }
  0xa3   : > { %629 = vperm.xlu0 %2958, %v3318_v37  }
  0xa4   : > { %v3323_v61 = vpop.permute.xlu2 %474  ;;  %v3325_v45 = vpop.permute.xlu1 %424 }
  0xa5   : > { %5071 = vst [vmem:[#allocation22_spill] sm:$0xff] %v3323_v61  ;;  %v3327_v62 = vpop.permute.xlu0 %419  ;;  %v290_v61 = vld [vmem:[%s3063_s24 + $0x1f0] sm:$0xff] }
  0xa6   : > { %5072 = vst [vmem:[#allocation23_spill] sm:$0xff] %v3325_v45  ;;  %v288_v45 = vld [vmem:[%s3063_s24 + $0x1e0] sm:$0xff] }
  0xa7   : > { %5073 = vst [vmem:[#allocation24_spill] sm:$0xff] %v3327_v62  ;;  %v3381_v62 = vld [vmem:[%s3063_s24 + $0x238] sm:$0xff] }
  0xa8   : > { %5091 = vst [vmem:[#allocation42_spill] sm:$0xff] %v3381_v62 }
  0xaa   : > { %654 = vperm.xlu2 %2960, %v287_v0   ;;  %649 = vperm.xlu1 %2959, %v286_v55  }
  0xab   : > { %644 = vperm.xlu0 %2958, %v285_v49  }
  0xac   : > { %v3332_v63 = vpop.permute.xlu2 %489  ;;  %v3334_v41 = vpop.permute.xlu1 %439 }
  0xad   : > { %5074 = vst [vmem:[#allocation25_spill] sm:$0xff] %v3332_v63  ;;  %v3336_v37 = vpop.permute.xlu0 %434  ;;  %v3348_v63 = vld [vmem:[%s3063_s24 + $0x208] sm:$0xff] }
  0xae   : > { %5075 = vst [vmem:[#allocation26_spill] sm:$0xff] %v3334_v41  ;;  %v3351_v41 = vld [vmem:[%s3063_s24 + $0x200] sm:$0xff] }
  0xaf   : > { %5076 = vst [vmem:[#allocation27_spill] sm:$0xff] %v3336_v37  ;;  %v291_v37 = vld [vmem:[%s3063_s24 + $0x1f8] sm:$0xff] }
  0xb0   : > { %5080 = vst [vmem:[#allocation31_spill] sm:$0xff] %v3348_v63 }
  0xb1   : > { %5081 = vst [vmem:[#allocation32_spill] sm:$0xff] %v3351_v41 }
  0xb2   : > { %669 = vperm.xlu2 %2960, %v290_v61   ;;  %664 = vperm.xlu1 %2959, %v289_v58  }
  0xb3   : > { %659 = vperm.xlu0 %2958, %v288_v45  }
  0xb4   : > { %v3341_v0 = vpop.permute.xlu2 %504  ;;  %v3343_v55 = vpop.permute.xlu1 %454 }
  0xb5   : > { %5077 = vst [vmem:[#allocation28_spill] sm:$0xff] %v3341_v0  ;;  %v3345_v49 = vpop.permute.xlu0 %449  ;;  %v3363_v0 = vld [vmem:[%s3063_s24 + $0x220] sm:$0xff] }
  0xb6   : > { %5078 = vst [vmem:[#allocation29_spill] sm:$0xff] %v3343_v55  ;;  %v3366_v55 = vld [vmem:[%s3063_s24 + $0x218] sm:$0xff] }
  0xb7   : > { %5079 = vst [vmem:[#allocation30_spill] sm:$0xff] %v3345_v49  ;;  %v3369_v49 = vld [vmem:[%s3063_s24 + $0x210] sm:$0xff] }
  0xb8   : > { %5085 = vst [vmem:[#allocation36_spill] sm:$0xff] %v3363_v0 }
  0xb9   : > { %5086 = vst [vmem:[#allocation37_spill] sm:$0xff] %v3366_v55 }
  0xba   : > { %684 = vperm.xlu2 %2960, %v3348_v63   ;;  %679 = vperm.xlu1 %2959, %v3351_v41   ;;  %5087 = vst [vmem:[#allocation38_spill] sm:$0xff] %v3369_v49  ;;  %v3387_v63 = vld [vmem:[%s3063_s24 + $0x228] sm:$0xff]  ;;  %v310_v41 = vld [vmem:[%s3063_s24 + $0x290] sm:$0xff] }
  0xbb   : > { %674 = vperm.xlu0 %2958, %v291_v37   ;;  %5093 = vst [vmem:[#allocation44_spill] sm:$0xff] %v3387_v63 }
  0xbc   : > { %v3356_v45 = vpop.permute.xlu2 %519  ;;  %v3358_v58 = vpop.permute.xlu1 %469 }
  0xbd   : > { %5082 = vst [vmem:[#allocation33_spill] sm:$0xff] %v3356_v45  ;;  %v3360_v61 = vpop.permute.xlu0 %464  ;;  %v3384_v45 = vld [vmem:[%s3063_s24 + $0x230] sm:$0xff] }
  0xbe   : > { %5083 = vst [vmem:[#allocation34_spill] sm:$0xff] %v3358_v58 }
  0xbf   : > { %5084 = vst [vmem:[#allocation35_spill] sm:$0xff] %v3360_v61 }
  0xc0   : > { %5092 = vst [vmem:[#allocation43_spill] sm:$0xff] %v3384_v45 }
  0xc2   : > { %699 = vperm.xlu2 %2960, %v3363_v0   ;;  %694 = vperm.xlu1 %2959, %v3366_v55   ;;  %v3399_v0 = vld [vmem:[%s3063_s24 + $0x250] sm:$0xff]  ;;  %v3402_v55 = vld [vmem:[%s3063_s24 + $0x248] sm:$0xff] }
  0xc3   : > { %689 = vperm.xlu0 %2958, %v3369_v49   ;;  %5097 = vst [vmem:[#allocation48_spill] sm:$0xff] %v3399_v0  ;;  %v3405_v49 = vld [vmem:[%s3063_s24 + $0x240] sm:$0xff] }
  0xc4   : > { %v3374_v37 = vpop.permute.xlu2 %534  ;;  %v3376_v58 = vpop.permute.xlu1 %484  ;;  %5098 = vst [vmem:[#allocation49_spill] sm:$0xff] %v3402_v55 }
  0xc5   : > { %5088 = vst [vmem:[#allocation39_spill] sm:$0xff] %v3374_v37  ;;  %v3378_v61 = vpop.permute.xlu0 %479 }
  0xc6   : > { %5089 = vst [vmem:[#allocation40_spill] sm:$0xff] %v3376_v58 }
  0xc7   : > { %5090 = vst [vmem:[#allocation41_spill] sm:$0xff] %v3378_v61 }
  0xc8   : > { %5099 = vst [vmem:[#allocation50_spill] sm:$0xff] %v3405_v49 }
  0xca   : > { %714 = vperm.xlu2 %2960, %v3381_v62   ;;  %709 = vperm.xlu1 %2959, %v3384_v45   ;;  %v305_v62 = vld [vmem:[%s3063_s24 + $0x268] sm:$0xff]  ;;  %v3418_v45 = vld [vmem:[%s3063_s24 + $0x260] sm:$0xff] }
  0xcb   : > { %704 = vperm.xlu0 %2958, %v3387_v63   ;;  %5103 = vst [vmem:[#allocation54_spill] sm:$0xff] %v3418_v45  ;;  %v3421_v63 = vld [vmem:[%s3063_s24 + $0x258] sm:$0xff] }
  0xcc   : > { %v3392_v37 = vpop.permute.xlu2 %549  ;;  %v3394_v58 = vpop.permute.xlu1 %499  ;;  %5104 = vst [vmem:[#allocation55_spill] sm:$0xff] %v3421_v63 }
  0xcd   : > { %5094 = vst [vmem:[#allocation45_spill] sm:$0xff] %v3392_v37  ;;  %v3396_v61 = vpop.permute.xlu0 %494 }
  0xce   : > { %5095 = vst [vmem:[#allocation46_spill] sm:$0xff] %v3394_v58 }
  0xcf   : > { %5096 = vst [vmem:[#allocation47_spill] sm:$0xff] %v3396_v61 }
  0xd2   : > { %729 = vperm.xlu2 %2960, %v3399_v0   ;;  %724 = vperm.xlu1 %2959, %v3402_v55   ;;  %v307_v55 = vld [vmem:[%s3063_s24 + $0x278] sm:$0xff] }
  0xd3   : > { %719 = vperm.xlu0 %2958, %v3405_v49   ;;  %v306_v49 = vld [vmem:[%s3063_s24 + $0x270] sm:$0xff] }
  0xd4   : > { %v3410_v37 = vpop.permute.xlu2 %564  ;;  %v3412_v58 = vpop.permute.xlu1 %514 }
  0xd5   : > { %5100 = vst [vmem:[#allocation51_spill] sm:$0xff] %v3410_v37  ;;  %v3414_v61 = vpop.permute.xlu0 %509 }
  0xd6   : > { %5101 = vst [vmem:[#allocation52_spill] sm:$0xff] %v3412_v58 }
  0xd7   : > { %5102 = vst [vmem:[#allocation53_spill] sm:$0xff] %v3414_v61  ;;  %v308_v61 = vld [vmem:[%s3063_s24 + $0x280] sm:$0xff] }
  0xda   : > { %744 = vperm.xlu2 %2960, %v305_v62   ;;  %739 = vperm.xlu1 %2959, %v3418_v45  }
  0xdb   : > { %734 = vperm.xlu0 %2958, %v3421_v63  }
  0xdc   : > { %v3425_v0 = vpop.permute.xlu2 %579  ;;  %v3427_v37 = vpop.permute.xlu1 %529 }
  0xdd   : > { %5105 = vst [vmem:[#allocation56_spill] sm:$0xff] %v3425_v0  ;;  %v3429_v58 = vpop.permute.xlu0 %524  ;;  %v311_v0 = vld [vmem:[%s3063_s24 + $0x298] sm:$0xff] }
  0xde   : > { %5106 = vst [vmem:[#allocation57_spill] sm:$0xff] %v3427_v37  ;;  %v309_v37 = vld [vmem:[%s3063_s24 + $0x288] sm:$0xff] }
  0xdf   : > { %5107 = vst [vmem:[#allocation58_spill] sm:$0xff] %v3429_v58  ;;  %v313_v58 = vld [vmem:[%s3063_s24 + $0x2a8] sm:$0xff] }
  0xe2   : > { %759 = vperm.xlu2 %2960, %v308_v61   ;;  %754 = vperm.xlu1 %2959, %v307_v55  }
  0xe3   : > { %749 = vperm.xlu0 %2958, %v306_v49  }
  0xe4   : > { %v3434_v62 = vpop.permute.xlu2 %594  ;;  %v3436_v45 = vpop.permute.xlu1 %544 }
  0xe5   : > { %5108 = vst [vmem:[#allocation59_spill] sm:$0xff] %v3434_v62  ;;  %v3438_v63 = vpop.permute.xlu0 %539  ;;  %v314_v62 = vld [vmem:[%s3063_s24 + $0x2b0] sm:$0xff] }
  0xe6   : > { %5109 = vst [vmem:[#allocation60_spill] sm:$0xff] %v3436_v45  ;;  %v312_v45 = vld [vmem:[%s3063_s24 + $0x2a0] sm:$0xff] }
  0xe7   : > { %5110 = vst [vmem:[#allocation61_spill] sm:$0xff] %v3438_v63  ;;  %v316_v63 = vld [vmem:[%s3063_s24 + $0x2c0] sm:$0xff] }
  0xea   : > { %774 = vperm.xlu2 %2960, %v311_v0   ;;  %769 = vperm.xlu1 %2959, %v310_v41  }
  0xeb   : > { %764 = vperm.xlu0 %2958, %v309_v37  }
  0xec   : > { %v3443_v61 = vpop.permute.xlu2 %609  ;;  %v3445_v55 = vpop.permute.xlu1 %559 }
  0xed   : > { %5111 = vst [vmem:[#allocation62_spill] sm:$0xff] %v3443_v61  ;;  %v3447_v49 = vpop.permute.xlu0 %554  ;;  %v317_v61 = vld [vmem:[%s3063_s24 + $0x2c8] sm:$0xff] }
  0xee   : > { %5112 = vst [vmem:[#allocation63_spill] sm:$0xff] %v3445_v55  ;;  %v315_v55 = vld [vmem:[%s3063_s24 + $0x2b8] sm:$0xff] }
  0xef   : > { %5113 = vst [vmem:[#allocation64_spill] sm:$0xff] %v3447_v49  ;;  %v319_v49 = vld [vmem:[%s3063_s24 + $0x2d8] sm:$0xff] }
  0xf2   : > { %789 = vperm.xlu2 %2960, %v314_v62   ;;  %784 = vperm.xlu1 %2959, %v313_v58  }
  0xf3   : > { %779 = vperm.xlu0 %2958, %v312_v45  }
  0xf4   : > { %v3452_v0 = vpop.permute.xlu2 %624  ;;  %v3454_v41 = vpop.permute.xlu1 %574 }
  0xf5   : > { %5114 = vst [vmem:[#allocation65_spill] sm:$0xff] %v3452_v0  ;;  %v3456_v37 = vpop.permute.xlu0 %569  ;;  %v320_v0 = vld [vmem:[%s3063_s24 + $0x2e0] sm:$0xff] }
  0xf6   : > { %5115 = vst [vmem:[#allocation66_spill] sm:$0xff] %v3454_v41  ;;  %v318_v41 = vld [vmem:[%s3063_s24 + $0x2d0] sm:$0xff] }
  0xf7   : > { %5116 = vst [vmem:[#allocation67_spill] sm:$0xff] %v3456_v37  ;;  %v322_v37 = vld [vmem:[%s3063_s24 + $0x2f0] sm:$0xff] }
  0xfa   : > { %804 = vperm.xlu2 %2960, %v317_v61   ;;  %799 = vperm.xlu1 %2959, %v316_v63  }
  0xfb   : > { %794 = vperm.xlu0 %2958, %v315_v55  }
  0xfc   : > { %v3461_v62 = vpop.permute.xlu2 %639  ;;  %v3463_v58 = vpop.permute.xlu1 %589 }
  0xfd   : > { %5117 = vst [vmem:[#allocation68_spill] sm:$0xff] %v3461_v62  ;;  %v3465_v45 = vpop.permute.xlu0 %584  ;;  %v323_v62 = vld [vmem:[%s3063_s24 + $0x2f8] sm:$0xff] }
  0xfe   : > { %5118 = vst [vmem:[#allocation69_spill] sm:$0xff] %v3463_v58  ;;  %v321_v58 = vld [vmem:[%s3063_s24 + $0x2e8] sm:$0xff] }
  0xff   : > { %5119 = vst [vmem:[#allocation70_spill] sm:$0xff] %v3465_v45 }
 0x102   : > { %819 = vperm.xlu2 %2960, %v320_v0   ;;  %814 = vperm.xlu1 %2959, %v319_v49  }
 0x103   : > { %809 = vperm.xlu0 %2958, %v318_v41  }
 0x104   : > { %v3470_v61 = vpop.permute.xlu2 %654  ;;  %v3472_v63 = vpop.permute.xlu1 %604 }
 0x105   : > { %5120 = vst [vmem:[#allocation71_spill] sm:$0xff] %v3470_v61  ;;  %v3474_v55 = vpop.permute.xlu0 %599  ;;  %v3486_v61 = vld [vmem:[%s3063_s24 + $0x310] sm:$0xff] }
 0x106   : > { %5121 = vst [vmem:[#allocation72_spill] sm:$0xff] %v3472_v63  ;;  %v3489_v63 = vld [vmem:[%s3063_s24 + $0x308] sm:$0xff] }
 0x107   : > { %5122 = vst [vmem:[#allocation73_spill] sm:$0xff] %v3474_v55  ;;  %v3492_v55 = vld [vmem:[%s3063_s24 + $0x300] sm:$0xff] }
 0x108   : > { %5126 = vst [vmem:[#allocation77_spill] sm:$0xff] %v3486_v61 }
 0x109   : > { %5127 = vst [vmem:[#allocation78_spill] sm:$0xff] %v3489_v63 }
 0x10a   : > { %834 = vperm.xlu2 %2960, %v323_v62   ;;  %829 = vperm.xlu1 %2959, %v322_v37   ;;  %5128 = vst [vmem:[#allocation79_spill] sm:$0xff] %v3492_v55 }
 0x10b   : > { %824 = vperm.xlu0 %2958, %v321_v58  }
 0x10c   : > { %v3479_v0 = vpop.permute.xlu2 %669  ;;  %v3481_v49 = vpop.permute.xlu1 %619 }
 0x10d   : > { %5123 = vst [vmem:[#allocation74_spill] sm:$0xff] %v3479_v0  ;;  %v3483_v41 = vpop.permute.xlu0 %614  ;;  %v3504_v0 = vld [vmem:[%s3063_s24 + $0x328] sm:$0xff] }
 0x10e   : > { %5124 = vst [vmem:[#allocation75_spill] sm:$0xff] %v3481_v49  ;;  %v3507_v49 = vld [vmem:[%s3063_s24 + $0x320] sm:$0xff] }
 0x10f   : > { %5125 = vst [vmem:[#allocation76_spill] sm:$0xff] %v3483_v41  ;;  %v3510_v41 = vld [vmem:[%s3063_s24 + $0x318] sm:$0xff] }
 0x110   : > { %5132 = vst [vmem:[#allocation83_spill] sm:$0xff] %v3504_v0 }
 0x111   : > { %5133 = vst [vmem:[#allocation84_spill] sm:$0xff] %v3507_v49 }
 0x112   : > { %849 = vperm.xlu2 %2960, %v3486_v61   ;;  %844 = vperm.xlu1 %2959, %v3489_v63   ;;  %5134 = vst [vmem:[#allocation85_spill] sm:$0xff] %v3510_v41  ;;  %v3525_v61 = vld [vmem:[%s3063_s24 + $0x338] sm:$0xff]  ;;  %v3528_v63 = vld [vmem:[%s3063_s24 + $0x330] sm:$0xff] }
 0x113   : > { %839 = vperm.xlu0 %2958, %v3492_v55   ;;  %5139 = vst [vmem:[#allocation90_spill] sm:$0xff] %v3525_v61  ;;  %v349_v55 = vld [vmem:[%s3063_s24 + $0x3c8] sm:$0xff] }
 0x114   : > { %v3497_v37 = vpop.permute.xlu2 %684  ;;  %v3499_v62 = vpop.permute.xlu1 %634  ;;  %5140 = vst [vmem:[#allocation91_spill] sm:$0xff] %v3528_v63 }
 0x115   : > { %5129 = vst [vmem:[#allocation80_spill] sm:$0xff] %v3497_v37  ;;  %v3501_v58 = vpop.permute.xlu0 %629  ;;  %v3522_v37 = vld [vmem:[%s3063_s24 + $0x340] sm:$0xff] }
 0x116   : > { %5130 = vst [vmem:[#allocation81_spill] sm:$0xff] %v3499_v62 }
 0x117   : > { %5131 = vst [vmem:[#allocation82_spill] sm:$0xff] %v3501_v58 }
 0x118   : > { %5138 = vst [vmem:[#allocation89_spill] sm:$0xff] %v3522_v37 }
 0x11a   : > { %864 = vperm.xlu2 %2960, %v3504_v0   ;;  %859 = vperm.xlu1 %2959, %v3507_v49   ;;  %v3540_v0 = vld [vmem:[%s3063_s24 + $0x358] sm:$0xff]  ;;  %v3543_v49 = vld [vmem:[%s3063_s24 + $0x350] sm:$0xff] }
 0x11b   : > { %854 = vperm.xlu0 %2958, %v3510_v41   ;;  %5144 = vst [vmem:[#allocation95_spill] sm:$0xff] %v3540_v0  ;;  %v3546_v41 = vld [vmem:[%s3063_s24 + $0x348] sm:$0xff] }
 0x11c   : > { %v3515_v45 = vpop.permute.xlu2 %699  ;;  %v3517_v62 = vpop.permute.xlu1 %649  ;;  %5145 = vst [vmem:[#allocation96_spill] sm:$0xff] %v3543_v49 }
 0x11d   : > { %5135 = vst [vmem:[#allocation86_spill] sm:$0xff] %v3515_v45  ;;  %v3519_v58 = vpop.permute.xlu0 %644 }
 0x11e   : > { %5136 = vst [vmem:[#allocation87_spill] sm:$0xff] %v3517_v62 }
 0x11f   : > { %5137 = vst [vmem:[#allocation88_spill] sm:$0xff] %v3519_v58 }
 0x120   : > { %5146 = vst [vmem:[#allocation97_spill] sm:$0xff] %v3546_v41 }
 0x122   : > { %879 = vperm.xlu2 %2960, %v3522_v37   ;;  %874 = vperm.xlu1 %2959, %v3525_v61   ;;  %v3558_v37 = vld [vmem:[%s3063_s24 + $0x370] sm:$0xff]  ;;  %v3561_v61 = vld [vmem:[%s3063_s24 + $0x368] sm:$0xff] }
 0x123   : > { %869 = vperm.xlu0 %2958, %v3528_v63   ;;  %5150 = vst [vmem:[#allocation101_spill] sm:$0xff] %v3558_v37  ;;  %v3564_v63 = vld [vmem:[%s3063_s24 + $0x360] sm:$0xff] }
 0x124   : > { %v3533_v45 = vpop.permute.xlu2 %714  ;;  %v3535_v62 = vpop.permute.xlu1 %664  ;;  %5151 = vst [vmem:[#allocation102_spill] sm:$0xff] %v3561_v61 }
 0x125   : > { %5141 = vst [vmem:[#allocation92_spill] sm:$0xff] %v3533_v45  ;;  %v3537_v58 = vpop.permute.xlu0 %659 }
 0x126   : > { %5142 = vst [vmem:[#allocation93_spill] sm:$0xff] %v3535_v62 }
 0x127   : > { %5143 = vst [vmem:[#allocation94_spill] sm:$0xff] %v3537_v58 }
 0x128   : > { %5152 = vst [vmem:[#allocation103_spill] sm:$0xff] %v3564_v63 }
 0x12a   : > { %894 = vperm.xlu2 %2960, %v3540_v0   ;;  %889 = vperm.xlu1 %2959, %v3543_v49   ;;  %v3576_v0 = vld [vmem:[%s3063_s24 + $0x388] sm:$0xff]  ;;  %v3579_v49 = vld [vmem:[%s3063_s24 + $0x380] sm:$0xff] }
 0x12b   : > { %884 = vperm.xlu0 %2958, %v3546_v41   ;;  %5156 = vst [vmem:[#allocation107_spill] sm:$0xff] %v3576_v0  ;;  %v3582_v41 = vld [vmem:[%s3063_s24 + $0x378] sm:$0xff] }
 0x12c   : > { %v3551_v45 = vpop.permute.xlu2 %729  ;;  %v3553_v62 = vpop.permute.xlu1 %679  ;;  %5157 = vst [vmem:[#allocation108_spill] sm:$0xff] %v3579_v49 }
 0x12d   : > { %5147 = vst [vmem:[#allocation98_spill] sm:$0xff] %v3551_v45  ;;  %v3555_v58 = vpop.permute.xlu0 %674 }
 0x12e   : > { %5148 = vst [vmem:[#allocation99_spill] sm:$0xff] %v3553_v62 }
 0x12f   : > { %5149 = vst [vmem:[#allocation100_spill] sm:$0xff] %v3555_v58 }
 0x130   : > { %5158 = vst [vmem:[#allocation109_spill] sm:$0xff] %v3582_v41 }
 0x132   : > { %909 = vperm.xlu2 %2960, %v3558_v37   ;;  %904 = vperm.xlu1 %2959, %v3561_v61   ;;  %v3594_v37 = vld [vmem:[%s3063_s24 + $0x3a0] sm:$0xff]  ;;  %v3597_v61 = vld [vmem:[%s3063_s24 + $0x398] sm:$0xff] }
 0x133   : > { %899 = vperm.xlu0 %2958, %v3564_v63   ;;  %5162 = vst [vmem:[#allocation113_spill] sm:$0xff] %v3594_v37  ;;  %v3600_v63 = vld [vmem:[%s3063_s24 + $0x390] sm:$0xff] }
 0x134   : > { %v3569_v45 = vpop.permute.xlu2 %744  ;;  %v3571_v62 = vpop.permute.xlu1 %694  ;;  %5163 = vst [vmem:[#allocation114_spill] sm:$0xff] %v3597_v61 }
 0x135   : > { %5153 = vst [vmem:[#allocation104_spill] sm:$0xff] %v3569_v45  ;;  %v3573_v58 = vpop.permute.xlu0 %689 }
 0x136   : > { %5154 = vst [vmem:[#allocation105_spill] sm:$0xff] %v3571_v62 }
 0x137   : > { %5155 = vst [vmem:[#allocation106_spill] sm:$0xff] %v3573_v58 }
 0x138   : > { %5164 = vst [vmem:[#allocation115_spill] sm:$0xff] %v3600_v63 }
 0x13a   : > { %924 = vperm.xlu2 %2960, %v3576_v0   ;;  %919 = vperm.xlu1 %2959, %v3579_v49   ;;  %v347_v0 = vld [vmem:[%s3063_s24 + $0x3b8] sm:$0xff]  ;;  %v346_v49 = vld [vmem:[%s3063_s24 + $0x3b0] sm:$0xff] }
 0x13b   : > { %914 = vperm.xlu0 %2958, %v3582_v41   ;;  %v345_v41 = vld [vmem:[%s3063_s24 + $0x3a8] sm:$0xff] }
 0x13c   : > { %v3587_v45 = vpop.permute.xlu2 %759  ;;  %v3589_v62 = vpop.permute.xlu1 %709 }
 0x13d   : > { %5159 = vst [vmem:[#allocation110_spill] sm:$0xff] %v3587_v45  ;;  %v3591_v58 = vpop.permute.xlu0 %704 }
 0x13e   : > { %5160 = vst [vmem:[#allocation111_spill] sm:$0xff] %v3589_v62 }
 0x13f   : > { %5161 = vst [vmem:[#allocation112_spill] sm:$0xff] %v3591_v58 }
 0x142   : > { %939 = vperm.xlu2 %2960, %v3594_v37   ;;  %934 = vperm.xlu1 %2959, %v3597_v61  }
 0x143   : > { %929 = vperm.xlu0 %2958, %v3600_v63  }
 0x144   : > { %v3605_v45 = vpop.permute.xlu2 %774  ;;  %v3607_v62 = vpop.permute.xlu1 %724 }
 0x145   : > { %5165 = vst [vmem:[#allocation116_spill] sm:$0xff] %v3605_v45  ;;  %v3609_v58 = vpop.permute.xlu0 %719  ;;  %v350_v45 = vld [vmem:[%s3063_s24 + $0x3d0] sm:$0xff] }
 0x146   : > { %5166 = vst [vmem:[#allocation117_spill] sm:$0xff] %v3607_v62  ;;  %v348_v62 = vld [vmem:[%s3063_s24 + $0x3c0] sm:$0xff] }
 0x147   : > { %5167 = vst [vmem:[#allocation118_spill] sm:$0xff] %v3609_v58 }
 0x14a   : > { %954 = vperm.xlu2 %2960, %v347_v0   ;;  %949 = vperm.xlu1 %2959, %v346_v49  }
 0x14b   : > { %944 = vperm.xlu0 %2958, %v345_v41   ;;  %v353_v41 = vld [vmem:[%s3063_s24 + $0x3e8] sm:$0xff] }
 0x14c   : > { %v3614_v37 = vpop.permute.xlu2 %789  ;;  %v3616_v61 = vpop.permute.xlu1 %739 }
 0x14d   : > { %5168 = vst [vmem:[#allocation119_spill] sm:$0xff] %v3614_v37  ;;  %v3618_v63 = vpop.permute.xlu0 %734  ;;  %v352_v37 = vld [vmem:[%s3063_s24 + $0x3e0] sm:$0xff] }
 0x14e   : > { %5169 = vst [vmem:[#allocation120_spill] sm:$0xff] %v3616_v61 }
 0x14f   : > { %5170 = vst [vmem:[#allocation121_spill] sm:$0xff] %v3618_v63 }
 0x152   : > { %969 = vperm.xlu2 %2960, %v350_v45   ;;  %964 = vperm.xlu1 %2959, %v349_v55   ;;  %v355_v55 = vld [vmem:[%s3063_s24 + $0x3f8] sm:$0xff] }
 0x153   : > { %959 = vperm.xlu0 %2958, %v348_v62   ;;  %v354_v62 = vld [vmem:[%s3063_s24 + $0x3f0] sm:$0xff] }
 0x154   : > { %v3623_v58 = vpop.permute.xlu2 %804  ;;  %v3625_v0 = vpop.permute.xlu1 %754 }
 0x155   : > { %5171 = vst [vmem:[#allocation122_spill] sm:$0xff] %v3623_v58  ;;  %v3627_v49 = vpop.permute.xlu0 %749 }
 0x156   : > { %5172 = vst [vmem:[#allocation123_spill] sm:$0xff] %v3625_v0 }
 0x157   : > { %5173 = vst [vmem:[#allocation124_spill] sm:$0xff] %v3627_v49 }
 0x15a   : > { %984 = vperm.xlu2 %2960, %v353_v41   ;;  %979 = vperm.xlu1 %2959, %v352_v37  }
 0x15b   : > { %974 = vperm.xlu0 %2958, %v351_v59  }
 0x15c   : > { %v3632_v61 = vpop.permute.xlu2 %819  ;;  %v3634_v63 = vpop.permute.xlu1 %769 }
 0x15d   : > { %5174 = vst [vmem:[#allocation125_spill] sm:$0xff] %v3632_v61  ;;  %v3636_v45 = vpop.permute.xlu0 %764 }
 0x15e   : > { %5175 = vst [vmem:[#allocation126_spill] sm:$0xff] %v3634_v63 }
 0x15f   : > { %5176 = vst [vmem:[#allocation127_spill] sm:$0xff] %v3636_v45 }
 0x162   : > { %2961 = vset.pattern.permute.xlu2 %v3016_v56  ;;  %994 = vperm.xlu1 %2959, %v355_v55  }
 0x163   : > { %989 = vperm.xlu0 %2958, %v354_v62   ;;  %1127 = vperm.xlu2 %2961, %v3072_v3  }
 0x164   : > { %v3641_v58 = vpop.permute.xlu2 %834  ;;  %v3643_v0 = vpop.permute.xlu1 %784 }
 0x165   : > { %5177 = vst [vmem:[#allocation128_spill] sm:$0xff] %v3641_v58  ;;  %v3645_v37 = vpop.permute.xlu0 %779  ;;  %v2163_v58 = vld [vmem:[%s5006_s3 + $0x40] sm:$0xff] }
 0x166   : > { %5178 = vst [vmem:[#allocation129_spill] sm:$0xff] %v3643_v0  ;;  %v5241_v0 = vld [vmem:[#allocation58_spill] sm:$0xff] }
 0x167   : > { %5179 = vst [vmem:[#allocation130_spill] sm:$0xff] %v3645_v37  ;;  %v5244_v37 = vld [vmem:[#allocation48_spill] sm:$0xff] }
 0x16a   : > { %2963 = vset.pattern.permute.xlu1 %v3016_v56 }
 0x16b   : > { %2962 = vset.pattern.permute.xlu0 %v3016_v56  ;;  %1135 = vperm.xlu1 %2963, %v3069_v2  }
 0x16c   : > { %1139 = vperm.xlu2 %2961, %v3081_v5   ;;  %1131 = vperm.xlu0 %2962, %v3084_v6   ;;  %v3650_v59 = vpop.permute.xlu2 %849  ;;  %v3652_v41 = vpop.permute.xlu1 %799 }
 0x16d   : > { %5180 = vst [vmem:[#allocation131_spill] sm:$0xff] %v3652_v41  ;;  %v3654_v55 = vpop.permute.xlu0 %794 }
 0x16e   : > { %5181 = vst [vmem:[#allocation132_spill] sm:$0xff] %v3654_v55  ;;  %v5231_v55 = vld [vmem:[#allocation83_spill] sm:$0xff] }
 0x173   : > { %1143 = vperm.xlu1 %2963, %v3066_v1  }
 0x174   : > { %1147 = vperm.xlu2 %2961, %v3078_v4   ;;  %1151 = vperm.xlu0 %2962, %v3096_v9   ;;  %v3659_v3 = vpop.permute.xlu2 %864  ;;  %v3661_v56 = vpop.permute.xlu1 %814 }
 0x175   : > { %5182 = vst [vmem:[#allocation133_spill] sm:$0xff] %v3661_v56  ;;  %v3663_v2 = vpop.permute.xlu0 %809 }
 0x176   : > { %5183 = vst [vmem:[#allocation134_spill] sm:$0xff] %v3663_v2 }
 0x17b   : > { %1155 = vperm.xlu1 %2963, %v3093_v8  }
 0x17c   : > { %1159 = vperm.xlu2 %2961, %v3090_v7   ;;  %1163 = vperm.xlu0 %2962, %v3108_v12   ;;  %v3668_v5 = vpop.permute.xlu2 %879  ;;  %v3670_v6 = vpop.permute.xlu1 %829  ;;  %v2170_v7 = vld [vmem:[%s5006_s3 + $0x78] sm:$0xff]  ;;  %v2169_v12 = vld [vmem:[%s5006_s3 + $0x70] sm:$0xff] }
 0x17d   : > { %5184 = vst [vmem:[#allocation135_spill] sm:$0xff] %v3670_v6  ;;  %v3672_v1 = vpop.permute.xlu0 %824  ;;  %2171 = vmatpush.msra.mxu0 %v2170_v7  ;;  %2900 = vmatpush.msra.mxu1 %v2170_v7  ;;  %v2159_v6 = vld [vmem:[%s5006_s3 + $0x20] sm:$0xff] }
 0x17e   : > { %5185 = vst [vmem:[#allocation136_spill] sm:$0xff] %v3672_v1  ;;  %2901 = vmatpush.msra.mxu2 %v2170_v7  ;;  %2902 = vmatpush.msra.mxu3 %v2170_v7  ;;  %v2167_v7 = vld [vmem:[%s5006_s3 + $0x60] sm:$0xff] }
 0x17f   : > { %2172 = vmatpush.msra.mxu0 %v2169_v12  ;;  %2903 = vmatpush.msra.mxu1 %v2169_v12  ;;  %v2155_v1 = vld [vmem:[%s5006_s3] sm:$0xff] }
 0x180   : > { %2904 = vmatpush.msra.mxu2 %v2169_v12  ;;  %2905 = vmatpush.msra.mxu3 %v2169_v12 }
 0x183   : > { %1167 = vperm.xlu1 %2963, %v3105_v11  }
 0x184   : > { %1171 = vperm.xlu2 %2961, %v3102_v10   ;;  %1175 = vperm.xlu0 %2962, %v3120_v15   ;;  %v3677_v4 = vpop.permute.xlu2 %894  ;;  %v3679_v9 = vpop.permute.xlu1 %844  ;;  %v2168_v10 = vld [vmem:[%s5006_s3 + $0x68] sm:$0xff] }
 0x185   : > { %v3681_v8 = vpop.permute.xlu0 %839  ;;  %2173 = vmatpush.msra.mxu0 %v2168_v10  ;;  %2906 = vmatpush.msra.mxu1 %v2168_v10 }
 0x186   : > { %2907 = vmatpush.msra.mxu2 %v2168_v10  ;;  %2908 = vmatpush.msra.mxu3 %v2168_v10 }
 0x187   : > { %2174 = vmatpush.msra.mxu0 %v2167_v7  ;;  %2909 = vmatpush.msra.mxu1 %v2167_v7 }
 0x188   : > { %2910 = vmatpush.msra.mxu2 %v2167_v7  ;;  %2911 = vmatpush.msra.mxu3 %v2167_v7 }
 0x18b   : > { %1179 = vperm.xlu1 %2963, %v3117_v14   ;;  %v2166_v14 = vld [vmem:[%s5006_s3 + $0x58] sm:$0xff] }
 0x18c   : > { %1183 = vperm.xlu2 %2961, %v3114_v13   ;;  %1187 = vperm.xlu0 %2962, %v3132_v18   ;;  %v3695_v11 = vpop.permute.xlu2 %909  ;;  %v3697_v15 = vpop.permute.xlu1 %859  ;;  %v2165_v13 = vld [vmem:[%s5006_s3 + $0x50] sm:$0xff]  ;;  %v2164_v18 = vld [vmem:[%s5006_s3 + $0x48] sm:$0xff] }
 0x18d   : > { %5186 = vst [vmem:[#allocation137_spill] sm:$0xff] %v3695_v11  ;;  %v3699_v62 = vpop.permute.xlu0 %854  ;;  %2175 = vmatpush.msra.mxu0 %v2166_v14  ;;  %2912 = vmatpush.msra.mxu1 %v2166_v14  ;;  %v5274_v11 = vld [vmem:[#allocation99_spill] sm:$0xff] }
 0x18e   : > { %2913 = vmatpush.msra.mxu2 %v2166_v14  ;;  %2914 = vmatpush.msra.mxu3 %v2166_v14 }
 0x18f   : > { %2176 = vmatpush.msra.mxu0 %v2165_v13  ;;  %2915 = vmatpush.msra.mxu1 %v2165_v13 }
 0x190   : > { %2916 = vmatpush.msra.mxu2 %v2165_v13  ;;  %2917 = vmatpush.msra.mxu3 %v2165_v13 }
 0x191   : > { %2177 = vmatpush.msra.mxu0 %v2164_v18  ;;  %2918 = vmatpush.msra.mxu1 %v2164_v18 }
 0x192   : > { %2919 = vmatpush.msra.mxu2 %v2164_v18  ;;  %2920 = vmatpush.msra.mxu3 %v2164_v18 }
 0x193   : > { %1191 = vperm.xlu1 %2963, %v3129_v17   ;;  %v2162_v17 = vld [vmem:[%s5006_s3 + $0x38] sm:$0xff]  ;;  %2178 = vmatpush.msra.mxu0 %v2163_v58 }
 0x194   : > { %1195 = vperm.xlu2 %2961, %v3126_v16   ;;  %1199 = vperm.xlu0 %2962, %v3144_v21   ;;  %v3716_v12 = vpop.permute.xlu2 %924  ;;  %v3718_v10 = vpop.permute.xlu1 %874  ;;  %v2161_v16 = vld [vmem:[%s5006_s3 + $0x30] sm:$0xff]  ;;  %v2160_v21 = vld [vmem:[%s5006_s3 + $0x28] sm:$0xff] }
 0x195   : > { %5187 = vst [vmem:[#allocation138_spill] sm:$0xff] %v3716_v12  ;;  %v3720_v7 = vpop.permute.xlu0 %869  ;;  %2921 = vmatpush.msra.mxu1 %v2163_v58  ;;  %2179 = vmatpush.msra.mxu0 %v2162_v17 }
 0x196   : > { %2922 = vmatpush.msra.mxu2 %v2163_v58  ;;  %2923 = vmatpush.msra.mxu3 %v2163_v58 }
 0x197   : > { %2924 = vmatpush.msra.mxu1 %v2162_v17  ;;  %2180 = vmatpush.msra.mxu0 %v2161_v16 }
 0x198   : > { %2925 = vmatpush.msra.mxu2 %v2162_v17  ;;  %2926 = vmatpush.msra.mxu3 %v2162_v17 }
 0x199   : > { %2181 = vmatpush.msra.mxu0 %v2160_v21  ;;  %2927 = vmatpush.msra.mxu1 %v2161_v16 }
 0x19a   : > { %2928 = vmatpush.msra.mxu2 %v2161_v16  ;;  %2929 = vmatpush.msra.mxu3 %v2161_v16 }
 0x19b   : > { %1203 = vperm.xlu1 %2963, %v3141_v20   ;;  %2182 = vmatpush.msra.mxu0 %v2159_v6  ;;  %v2157_v20 = vld [vmem:[%s5006_s3 + $0x10] sm:$0xff] }
 0x19c   : > { %1207 = vperm.xlu2 %2961, %v3138_v19   ;;  %1211 = vperm.xlu0 %2962, %v3156_v24   ;;  %v3737_v14 = vpop.permute.xlu2 %939  ;;  %v3739_v13 = vpop.permute.xlu1 %889  ;;  %v2158_v19 = vld [vmem:[%s5006_s3 + $0x18] sm:$0xff]  ;;  %v2156_v24 = vld [vmem:[%s5006_s3 + $0x8] sm:$0xff] }
 0x19d   : > { %5188 = vst [vmem:[#allocation139_spill] sm:$0xff] %v3737_v14  ;;  %v3741_v18 = vpop.permute.xlu0 %884  ;;  %2930 = vmatpush.msra.mxu1 %v2160_v21  ;;  %2183 = vmatpush.msra.mxu0 %v2158_v19 }
 0x19e   : > { %2931 = vmatpush.msra.mxu2 %v2160_v21  ;;  %2932 = vmatpush.msra.mxu3 %v2160_v21 }
 0x19f   : > { %2933 = vmatpush.msra.mxu1 %v2159_v6  ;;  %2184 = vmatpush.msra.mxu0 %v2157_v20 }
 0x1a0   : > { %2934 = vmatpush.msra.mxu2 %v2159_v6  ;;  %2935 = vmatpush.msra.mxu3 %v2159_v6  ;;  %v356_v6 = vld [vmem:[%s5004_s1] sm:$0x3] }
 0x1a1   : > { %2185 = vmatpush.msra.mxu0 %v2156_v24  ;;  %2936 = vmatpush.msra.mxu1 %v2158_v19  ;;  %v3788_v21 = vperm.slane %v356_v6, 1 }
 0x1a2   : > { %2937 = vmatpush.msra.mxu2 %v2158_v19  ;;  %2938 = vmatpush.msra.mxu3 %v2158_v19 }
 0x1a3   : > { %1215 = vperm.xlu1 %2963, %v3153_v23   ;;  %2186 = vmatpush.msra.mxu0 %v2155_v1 }
 0x1a4   : > { %1219 = vperm.xlu2 %2961, %v3150_v22   ;;  %1223 = vperm.xlu0 %2962, %v3168_v27   ;;  %v3758_v58 = vpop.permute.xlu2 %954  ;;  %v3760_v17 = vpop.permute.xlu1 %904 }
 0x1a5   : > { %5189 = vst [vmem:[#allocation140_spill] sm:$0xff] %v3758_v58  ;;  %v3762_v16 = vpop.permute.xlu0 %899  ;;  %2939 = vmatpush.msra.mxu1 %v2157_v20  ;;  %2940 = vmatpush.msra.mxu2 %v2157_v20  ;;  %v5228_v58 = vld [vmem:[#allocation33_spill] sm:$0xff] }
 0x1a6   : > { %2941 = vmatpush.msra.mxu3 %v2157_v20 }
 0x1a7   : > { %2942 = vmatpush.msra.mxu1 %v2156_v24  ;;  %2943 = vmatpush.msra.mxu2 %v2156_v24 }
 0x1a8   : > { %2944 = vmatpush.msra.mxu3 %v2156_v24 }
 0x1a9   : > { %2945 = vmatpush.msra.mxu1 %v2155_v1  ;;  %2946 = vmatpush.msra.mxu2 %v2155_v1 }
 0x1aa   : > { %2947 = vmatpush.msra.mxu3 %v2155_v1  ;;  %v3791_v1 = vperm.slane %v356_v6, 0 }
 0x1ab   : > { %1227 = vperm.xlu1 %2963, %v3165_v26  }
 0x1ac   : > { %1231 = vperm.xlu2 %2961, %v3162_v25   ;;  %1235 = vperm.xlu0 %2962, %v3180_v30   ;;  %v3770_v22 = vpop.permute.xlu2 %969  ;;  %v3772_v23 = vpop.permute.xlu1 %919  ;;  %v998_v19 = vmul.f32 %v3791_v1, %v3255_v51 }
 0x1ad   : > { %5190 = vst [vmem:[#allocation141_spill] sm:$0xff] %v3770_v22  ;;  %v3774_v27 = vpop.permute.xlu0 %914  ;;  %v5221_v22 = vld [vmem:[#allocation38_spill] sm:$0xff] }
 0x1ae   : > { %5191 = vst [vmem:[#allocation142_spill] sm:$0xff] %v3772_v23 }
 0x1af   : > { %5192 = vst [vmem:[#allocation143_spill] sm:$0xff] %v3774_v27 }
 0x1b3   : > { %1239 = vperm.xlu1 %2963, %v3177_v29  }
 0x1b4   : > { %1243 = vperm.xlu2 %2961, %v3174_v28   ;;  %1247 = vperm.xlu0 %2962, %v3192_v33   ;;  %v3779_v26 = vpop.permute.xlu2 %984  ;;  %v3781_v25 = vpop.permute.xlu1 %934 }
 0x1b5   : > { %5193 = vst [vmem:[#allocation144_spill] sm:$0xff] %v3779_v26  ;;  %v3783_v30 = vpop.permute.xlu0 %929 }
 0x1b6   : > { %5194 = vst [vmem:[#allocation145_spill] sm:$0xff] %v3781_v25 }
 0x1b7   : > { %5195 = vst [vmem:[#allocation146_spill] sm:$0xff] %v3783_v30 }
 0x1bb   : > { %1251 = vperm.xlu1 %2963, %v3189_v32   ;;  %v3805_v32 = vld [vmem:[%s5005_s2] ss:$0 sm:$0xff] }
 0x1bc   : > { %1255 = vperm.xlu2 %2961, %v3186_v31   ;;  %1259 = vperm.xlu0 %2962, %v3204_v36   ;;  %v3795_v28 = vpop.permute.xlu1 %949 }
 0x1bd   : > { %5196 = vst [vmem:[#allocation147_spill] sm:$0xff] %v3795_v28  ;;  %v3797_v29 = vpop.permute.xlu0 %944  ;;  %v1128_v33 = vpop.permute.xlu2 %1127  ;;  %v5232_v28 = vld [vmem:[#allocation43_spill] sm:$0xff] }
 0x1be   : > { %5197 = vst [vmem:[#allocation148_spill] sm:$0xff] %v3797_v29  ;;  %v1639_v20 = vmul.f32 %v3788_v21, %v1128_v33 }
 0x1c0   : > { %v1767_v24 = vadd.f32 %v1639_v20, %v998_v19 }
 0x1c2   : > { %v1899_v31 = vadd.f32 %v3805_v32, %v1767_v24 }
 0x1c3   : > { %1263 = vperm.xlu1 %2963, %v3201_v35  }
 0x1c4   : > { %1267 = vperm.xlu2 %2961, %v3198_v34   ;;  %1271 = vperm.xlu0 %2962, %v3218_v40   ;;  %v3811_v36 = vpop.permute.xlu1 %964  ;;  %v2027_v6 = vmax.f32 %v1899_v31, 0.0 }
 0x1c5   : > { %5198 = vst [vmem:[#allocation149_spill] sm:$0xff] %v3811_v36  ;;  %v3813_v51 = vpop.permute.xlu0 %959 }
 0x1c6   : > { %5199 = vst [vmem:[#allocation150_spill] sm:$0xff] %v3813_v51  ;;  %v1140_v33 = vpop.permute.xlu2 %1139  ;;  %2187 = vmatmul.f32.vlgmr.msra.gmra.mxu0 %v2027_v6  ;;  %v1000_v6 = vmul.f32 %v3791_v1, %v3253_v50  ;;  %v5204_v50 = vld [vmem:[#allocation7_spill] sm:$0xff] }
 0x1cb   : > { %1275 = vperm.xlu1 %2963, %v3215_v39  }
 0x1cc   : > { %1279 = vperm.xlu2 %2961, %v3212_v38   ;;  %1283 = vperm.xlu0 %2962, %v3232_v44   ;;  %v3818_v19 = vpop.permute.xlu1 %979 }
 0x1cd   : > { %5200 = vst [vmem:[#allocation151_spill] sm:$0xff] %v3818_v19  ;;  %v3820_v35 = vpop.permute.xlu0 %974  ;;  %v5213_v19 = vld [vmem:[#allocation20_spill] sm:$0xff] }
 0x1ce   : > { %5201 = vst [vmem:[#allocation152_spill] sm:$0xff] %v3820_v35  ;;  %v1148_v34 = vpop.permute.xlu2 %1147  ;;  %v5217_v35 = vld [vmem:[#allocation79_spill] sm:$0xff] }
 0x1d3   : > { %1287 = vperm.xlu1 %2963, %v3229_v43  }
 0x1d4   : > { %1291 = vperm.xlu2 %2961, %v3226_v42   ;;  %1295 = vperm.xlu0 %2962, %v3246_v48   ;;  %v3825_v40 = vpop.permute.xlu1 %994  ;;  %v999_v42 = vmul.f32 %v3791_v1, %v3273_v57 }
 0x1d5   : > { %5202 = vst [vmem:[#allocation153_spill] sm:$0xff] %v3825_v40  ;;  %v3827_v20 = vpop.permute.xlu0 %989 }
 0x1d6   : > { %5203 = vst [vmem:[#allocation154_spill] sm:$0xff] %v3827_v20  ;;  %v3829_v39 = vpop.permute.xlu2 %1159 }
 0x1db   : > { %1299 = vperm.xlu1 %2963, %v3243_v47  }
 0x1dc   : > { %1303 = vperm.xlu2 %2961, %v3240_v46   ;;  %1307 = vperm.xlu0 %2962, %v3264_v54  }
 0x1dd   : > { %v1136_v38 = vpop.permute.xlu1 %1135 }
 0x1de   : > { %v3834_v44 = vpop.permute.xlu2 %1171  ;;  %v1132_v43 = vpop.permute.xlu0 %1131  ;;  %v1641_v24 = vmul.f32 %v3788_v21, %v1136_v38  ;;  %v1642_v38 = vmul.f32 %v3788_v21, %v1140_v33 }
 0x1df   : > { %v1640_v48 = vmul.f32 %v3788_v21, %v1132_v43 }
 0x1e0   : > { %v1769_v47 = vadd.f32 %v1641_v24, %v1000_v6 }
 0x1e1   : > { %v1768_v31 = vadd.f32 %v1640_v48, %v999_v42  ;;  %v5205_v48 = vld [vmem:[#allocation9_spill] sm:$0xff] }
 0x1e2   : > { %v1901_v42 = vadd.f32 %v3805_v32, %v1769_v47  ;;  %v5208_v47 = vld [vmem:[#allocation2_spill] sm:$0xff] }
 0x1e3   : > { %1311 = vperm.xlu1 %2963, %v3261_v53   ;;  %v1900_v46 = vadd.f32 %v3805_v32, %v1768_v31  ;;  %v1001_v53 = vmul.f32 %v3791_v1, %v5204_v50  ;;  %v5206_v31 = vld [vmem:[#allocation8_spill] sm:$0xff]  ;;  %v1002_v50 = vmul.f32 %v3791_v1, %v5208_v47  ;;  %v5212_v47 = vld [vmem:[#allocation3_spill] sm:$0xff] }
 0x1e4   : > { %1315 = vperm.xlu2 %2961, %v3258_v52   ;;  %1319 = vperm.xlu0 %2962, %v3282_v60   ;;  %v5207_v52 = vld [vmem:[#allocation15_spill] sm:$0xff]  ;;  %v2029_v6 = vmax.f32 %v1901_v42, 0.0 }
 0x1e5   : > { %v1144_v54 = vpop.permute.xlu1 %1143  ;;  %v2028_v40 = vmax.f32 %v1900_v46, 0.0  ;;  %v1770_v60 = vadd.f32 %v1642_v38, %v1001_v53 }
 0x1e6   : > { %v3846_v57 = vpop.permute.xlu2 %1183  ;;  %v1152_v43 = vpop.permute.xlu0 %1151  ;;  %v1643_v33 = vmul.f32 %v3788_v21, %v1144_v54  ;;  %v1644_v54 = vmul.f32 %v3788_v21, %v1148_v34 }
 0x1e7   : > { %2190 = vmatmul.f32.gmra.mxu0 %v2028_v40  ;;  %v1902_v40 = vadd.f32 %v3805_v32, %v1770_v60  ;;  %v1645_v34 = vmul.f32 %v3788_v21, %v1152_v43 }
 0x1e8   : > { %v1771_v38 = vadd.f32 %v1643_v33, %v1002_v50  ;;  %v5215_v33 = vld [vmem:[#allocation32_spill] sm:$0xff] }
 0x1e9   : > { %v2030_v53 = vmax.f32 %v1902_v40, 0.0 }
 0x1ea   : > { %v1903_v60 = vadd.f32 %v3805_v32, %v1771_v38 }
 0x1eb   : > { %1323 = vperm.xlu1 %2963, %v5205_v48   ;;  %v5209_v48 = vld [vmem:[#allocation14_spill] sm:$0xff] }
 0x1ec   : > { %1327 = vperm.xlu2 %2961, %v5206_v31   ;;  %1331 = vperm.xlu0 %2962, %v5207_v52   ;;  %v5210_v31 = vld [vmem:[#allocation13_spill] sm:$0xff] }
 0x1ed   : > { %v1156_v24 = vpop.permute.xlu1 %1155  ;;  %v5211_v52 = vld [vmem:[#allocation21_spill] sm:$0xff] }
 0x1ee   : > { %v3855_v46 = vpop.permute.xlu2 %1195  ;;  %v3857_v20 = vpop.permute.xlu0 %1163  ;;  %v1646_v43 = vmul.f32 %v3788_v21, %v1156_v24  ;;  %v1647_v24 = vmul.f32 %v3788_v21, %v3829_v39  ;;  %v1030_v39 = vmul.f32 %v3791_v1, %v5228_v58 }
 0x1ef   : > { %2193 = vmatmul.f32.gmra.mxu0 %v2029_v6 }
 0x1f3   : > { %1335 = vperm.xlu1 %2963, %v5209_v48   ;;  %v1003_v48 = vmul.f32 %v3791_v1, %v5212_v47  ;;  %v5216_v47 = vld [vmem:[#allocation12_spill] sm:$0xff] }
 0x1f4   : > { %1339 = vperm.xlu2 %2961, %v5210_v31   ;;  %1343 = vperm.xlu0 %2962, %v5211_v52   ;;  %v5214_v31 = vld [vmem:[#allocation19_spill] sm:$0xff]  ;;  %v2031_v52 = vmax.f32 %v1903_v60, 0.0 }
 0x1f5   : > { %v3866_v42 = vpop.permute.xlu1 %1167  ;;  %v1772_v50 = vadd.f32 %v1644_v54, %v1003_v48  ;;  %v5219_v54 = vld [vmem:[#allocation78_spill] sm:$0xff] }
 0x1f6   : > { %v3868_v26 = vpop.permute.xlu2 %1207  ;;  %v3870_v6 = vpop.permute.xlu0 %1175 }
 0x1f7   : > { %2196 = vmatmul.f32.gmra.mxu0 %v2030_v53  ;;  %v1904_v38 = vadd.f32 %v3805_v32, %v1772_v50 }
 0x1fb   : > { %1347 = vperm.xlu1 %2963, %v5213_v19   ;;  %v1004_v19 = vmul.f32 %v3791_v1, %v5216_v47  ;;  %v5220_v47 = vld [vmem:[#allocation11_spill] sm:$0xff] }
 0x1fc   : > { %1351 = vperm.xlu2 %2961, %v5214_v31   ;;  %1383 = vperm.xlu0 %2962, %v5215_v33   ;;  %v5218_v31 = vld [vmem:[#allocation31_spill] sm:$0xff]  ;;  %v2032_v33 = vmax.f32 %v1904_v38, 0.0 }
 0x1fd   : > { %v3879_v40 = vpop.permute.xlu1 %1179  ;;  %v1773_v48 = vadd.f32 %v1645_v34, %v1004_v19  ;;  %v5223_v34 = vld [vmem:[#allocation37_spill] sm:$0xff] }
 0x1fe   : > { %v3881_v61 = vpop.permute.xlu2 %1219  ;;  %v3883_v53 = vpop.permute.xlu0 %1187 }
 0x1ff   : > { %2199 = vmatmul.f32.gmra.mxu0 %v2031_v52  ;;  %v1905_v50 = vadd.f32 %v3805_v32, %v1773_v48 }
 0x203   : > { %1511 = vperm.xlu1 %2963, %v5217_v35   ;;  %v1005_v35 = vmul.f32 %v3791_v1, %v5220_v47  ;;  %v5224_v47 = vld [vmem:[#allocation4_spill] sm:$0xff] }
 0x204   : > { %1387 = vperm.xlu2 %2961, %v5218_v31   ;;  %1515 = vperm.xlu0 %2962, %v5219_v54   ;;  %v5222_v31 = vld [vmem:[#allocation77_spill] sm:$0xff]  ;;  %v2033_v54 = vmax.f32 %v1905_v50, 0.0 }
 0x205   : > { %v3892_v60 = vpop.permute.xlu1 %1191  ;;  %v1774_v19 = vadd.f32 %v1646_v43, %v1005_v35  ;;  %v5227_v43 = vld [vmem:[#allocation84_spill] sm:$0xff] }
 0x206   : > { %v3894_v56 = vpop.permute.xlu2 %1231  ;;  %v3896_v52 = vpop.permute.xlu0 %1199 }
 0x207   : > { %2202 = vmatmul.f32.gmra.mxu0 %v2032_v33  ;;  %v1906_v48 = vadd.f32 %v3805_v32, %v1774_v19 }
 0x209   : > { %v2034_v36 = vmax.f32 %v1906_v48, 0.0 }
 0x20b   : > { %1391 = vperm.xlu1 %2963, %v5221_v22   ;;  %v1006_v22 = vmul.f32 %v3791_v1, %v5224_v47  ;;  %v1648_v47 = vmul.f32 %v3788_v21, %v3857_v20 }
 0x20c   : > { %1519 = vperm.xlu2 %2961, %v5222_v31   ;;  %1395 = vperm.xlu0 %2962, %v5223_v34   ;;  %v5225_v31 = vld [vmem:[#allocation85_spill] sm:$0xff]  ;;  %v5226_v34 = vld [vmem:[#allocation36_spill] sm:$0xff] }
 0x20d   : > { %v3905_v38 = vpop.permute.xlu1 %1203  ;;  %v1775_v50 = vadd.f32 %v1647_v24, %v1006_v22  ;;  %v5230_v22 = vld [vmem:[#allocation44_spill] sm:$0xff] }
 0x20e   : > { %v3907_v2 = vpop.permute.xlu2 %1243  ;;  %v3909_v33 = vpop.permute.xlu0 %1211 }
 0x20f   : > { %2205 = vmatmul.f32.gmra.mxu0 %v2033_v54 }
 0x213   : > { %1523 = vperm.xlu1 %2963, %v5225_v31  }
 0x214   : > { %1399 = vperm.xlu2 %2961, %v5226_v34   ;;  %1527 = vperm.xlu0 %2962, %v5227_v43   ;;  %v1907_v34 = vadd.f32 %v3805_v32, %v1775_v50  ;;  %v5229_v43 = vld [vmem:[#allocation18_spill] sm:$0xff]  ;;  %v1649_v50 = vmul.f32 %v3788_v21, %v3866_v42 }
 0x215   : > { %v3919_v35 = vpop.permute.xlu1 %1215  ;;  %v1007_v24 = vmul.f32 %v3791_v1, %v5229_v43  ;;  %v5234_v43 = vld [vmem:[#allocation91_spill] sm:$0xff] }
 0x216   : > { %v1256_v41 = vpop.permute.xlu2 %1255  ;;  %v3921_v54 = vpop.permute.xlu0 %1223 }
 0x217   : > { %v1671_v19 = vmul.f32 %v3788_v21, %v1256_v41  ;;  %2208 = vmatmul.f32.gmra.mxu0 %v2034_v36  ;;  %v1776_v58 = vadd.f32 %v1648_v47, %v1007_v24  ;;  %v2035_v36 = vmax.f32 %v1907_v34, 0.0  ;;  %v5236_v47 = vld [vmem:[#allocation90_spill] sm:$0xff] }
 0x219   : > { %v1799_v31 = vadd.f32 %v1671_v19, %v1030_v39  ;;  %v1908_v19 = vadd.f32 %v3805_v32, %v1776_v58 }
 0x21b   : > { %1403 = vperm.xlu1 %2963, %v5230_v22   ;;  %v1931_v48 = vadd.f32 %v3805_v32, %v1799_v31  ;;  %v5233_v31 = vld [vmem:[#allocation17_spill] sm:$0xff]  ;;  %v2036_v22 = vmax.f32 %v1908_v19, 0.0 }
 0x21c   : > { %1531 = vperm.xlu2 %2961, %v5231_v55   ;;  %1407 = vperm.xlu0 %2962, %v5232_v28   ;;  %v1008_v55 = vmul.f32 %v3791_v1, %v5233_v31  ;;  %v5235_v28 = vld [vmem:[#allocation42_spill] sm:$0xff] }
 0x21d   : > { %v3935_v41 = vpop.permute.xlu1 %1227  ;;  %v2059_v29 = vmax.f32 %v1931_v48, 0.0 }
 0x21e   : > { %v3937_v20 = vpop.permute.xlu0 %1235  ;;  %v1268_v39 = vpop.permute.xlu2 %1267  ;;  %v1777_v34 = vadd.f32 %v1649_v50, %v1008_v55  ;;  %v5240_v50 = vld [vmem:[#allocation49_spill] sm:$0xff] }
 0x21f   : > { %2211 = vmatmul.f32.gmra.mxu0 %v2035_v36  ;;  %2283 = vmatmul.f32.vlgmr.msra.gmra.mxu1 %v2059_v29  ;;  %v1650_v29 = vmul.f32 %v3788_v21, %v3834_v44  ;;  %v5237_v36 = vld [vmem:[#allocation5_spill] sm:$0xff]  ;;  %v1031_v44 = vmul.f32 %v3791_v1, %v5241_v0  ;;  %v5245_v0 = vld [vmem:[#allocation96_spill] sm:$0xff] }
 0x220   : > { %v1909_v58 = vadd.f32 %v3805_v32, %v1777_v34  ;;  %v1009_v31 = vmul.f32 %v3791_v1, %v5237_v36  ;;  %v1651_v34 = vmul.f32 %v3788_v21, %v3870_v6 }
 0x222   : > { %v1778_v19 = vadd.f32 %v1650_v29, %v1009_v31  ;;  %v5243_v31 = vld [vmem:[#allocation97_spill] sm:$0xff] }
 0x223   : > { %1535 = vperm.xlu1 %2963, %v5234_v43   ;;  %v5238_v43 = vld [vmem:[#allocation50_spill] sm:$0xff] }
 0x224   : > { %1411 = vperm.xlu2 %2961, %v5235_v28   ;;  %1539 = vperm.xlu0 %2962, %v5236_v47   ;;  %v5239_v28 = vld [vmem:[#allocation89_spill] sm:$0xff]  ;;  %v2037_v47 = vmax.f32 %v1909_v58, 0.0 }
 0x225   : > { %v3947_v24 = vpop.permute.xlu1 %1239 }
 0x226   : > { %v3949_v48 = vpop.permute.xlu0 %1247  ;;  %v3953_v42 = vpop.permute.xlu2 %1279 }
 0x227   : > { %2214 = vmatmul.f32.gmra.mxu0 %v2036_v22 }
 0x22b   : > { %1415 = vperm.xlu1 %2963, %v5238_v43   ;;  %v1910_v43 = vadd.f32 %v3805_v32, %v1778_v19 }
 0x22c   : > { %1543 = vperm.xlu2 %2961, %v5239_v28   ;;  %1419 = vperm.xlu0 %2962, %v5240_v50   ;;  %v5242_v28 = vld [vmem:[#allocation24_spill] sm:$0xff] }
 0x22d   : > { %v3961_v55 = vpop.permute.xlu1 %1251  ;;  %v1010_v50 = vmul.f32 %v3791_v1, %v5242_v28  ;;  %v2038_v25 = vmax.f32 %v1910_v43, 0.0  ;;  %v5247_v43 = vld [vmem:[#allocation23_spill] sm:$0xff] }
 0x22e   : > { %v1260_v22 = vpop.permute.xlu0 %1259  ;;  %v3971_v29 = vpop.permute.xlu2 %1291 }
 0x22f   : > { %v1672_v14 = vmul.f32 %v3788_v21, %v1260_v22  ;;  %2217 = vmatmul.f32.gmra.mxu0 %v2037_v47  ;;  %v1779_v47 = vadd.f32 %v1651_v34, %v1010_v50  ;;  %v1011_v50 = vmul.f32 %v3791_v1, %v5247_v43  ;;  %v3999_v43 = vld [vmem:[%s5007_s4] ss:$0 sm:$0xff] }
 0x231   : > { %v1800_v36 = vadd.f32 %v1672_v14, %v1031_v44  ;;  %v5246_v14 = vld [vmem:[#allocation57_spill] sm:$0xff] }
 0x232   : > { %v1032_v19 = vmul.f32 %v3791_v1, %v5246_v14 }
 0x233   : > { %1547 = vperm.xlu1 %2963, %v5243_v31   ;;  %v1932_v58 = vadd.f32 %v3805_v32, %v1800_v36  ;;  %v1652_v36 = vmul.f32 %v3788_v21, %v3879_v40  ;;  %v1911_v31 = vadd.f32 %v3805_v32, %v1779_v47 }
 0x234   : > { %1423 = vperm.xlu2 %2961, %v5244_v37   ;;  %1551 = vperm.xlu0 %2962, %v5245_v0   ;;  %v1674_v37 = vmul.f32 %v3788_v21, %v1268_v39 }
 0x235   : > { %v1264_v22 = vpop.permute.xlu1 %1263  ;;  %v2060_v6 = vmax.f32 %v1932_v58, 0.0  ;;  %v5248_v58 = vld [vmem:[#allocation39_spill] sm:$0xff]  ;;  %v1780_v14 = vadd.f32 %v1652_v36, %v1011_v50 }
 0x236   : > { %v1673_v44 = vmul.f32 %v3788_v21, %v1264_v22  ;;  %v1272_v28 = vpop.permute.xlu0 %1271  ;;  %v1033_v0 = vmul.f32 %v3791_v1, %v5248_v58  ;;  %v5249_v22 = vld [vmem:[#allocation55_spill] sm:$0xff]  ;;  %v1653_v58 = vmul.f32 %v3788_v21, %v3846_v57 }
 0x237   : > { %2220 = vmatmul.f32.gmra.mxu0 %v2038_v25  ;;  %2286 = vmatmul.f32.gmra.mxu1 %v2060_v6  ;;  %v5250_v25 = vld [vmem:[#allocation95_spill] sm:$0xff]  ;;  %v5251_v6 = vld [vmem:[#allocation54_spill] sm:$0xff]  ;;  %v1675_v36 = vmul.f32 %v3788_v21, %v1272_v28 }
 0x238   : > { %v1801_v30 = vadd.f32 %v1673_v44, %v1032_v19  ;;  %v1802_v39 = vadd.f32 %v1674_v37, %v1033_v0  ;;  %v3992_v19 = vpop.permute.xlu2 %1303  ;;  %v1912_v37 = vadd.f32 %v3805_v32, %v1780_v14  ;;  %v5253_v0 = vld [vmem:[#allocation61_spill] sm:$0xff]  ;;  %v5254_v57 = vld [vmem:[#allocation103_spill] sm:$0xff] }
 0x23a   : > { %v1933_v34 = vadd.f32 %v3805_v32, %v1801_v30  ;;  %v2039_v30 = vmax.f32 %v1911_v31, 0.0  ;;  %v5252_v31 = vld [vmem:[#allocation6_spill] sm:$0xff]  ;;  %v2040_v63 = vmax.f32 %v1912_v37, 0.0  ;;  %v5256_v37 = vld [vmem:[#allocation27_spill] sm:$0xff] }
 0x23b   : > { %1427 = vperm.xlu1 %2963, %v5249_v22   ;;  %v1012_v50 = vmul.f32 %v3791_v1, %v5252_v31  ;;  %v1034_v22 = vmul.f32 %v3791_v1, %v5253_v0 }
 0x23c   : > { %1555 = vperm.xlu2 %2961, %v5250_v25   ;;  %1431 = vperm.xlu0 %2962, %v5251_v6   ;;  %v2061_v40 = vmax.f32 %v1933_v34, 0.0  ;;  %v1934_v34 = vadd.f32 %v3805_v32, %v1802_v39  ;;  %v2966_v25 = vld [vmem:[%s3063_s24 + $0x268] sm:$0xff] }
 0x23d   : > { %v1276_v47 = vpop.permute.xlu1 %1275  ;;  %v1781_v14 = vadd.f32 %v1653_v58, %v1012_v50  ;;  %v1803_v39 = vadd.f32 %v1675_v36, %v1034_v22  ;;  %v5257_v22 = vld [vmem:[#allocation60_spill] sm:$0xff] }
 0x23e   : > { %v3994_v44 = vpop.permute.xlu0 %1283  ;;  %v2062_v31 = vmax.f32 %v1934_v34, 0.0  ;;  %v1676_v58 = vmul.f32 %v3788_v21, %v1276_v47  ;;  %v1013_v34 = vmul.f32 %v3791_v1, %v5256_v37  ;;  %v1655_v37 = vmul.f32 %v3788_v21, %v3892_v60  ;;  %v5262_v60 = vld [vmem:[#allocation108_spill] sm:$0xff] }
 0x23f   : > { %2223 = vmatmul.f32.gmra.mxu0 %v2039_v30  ;;  %2289 = vmatmul.f32.gmra.mxu1 %v2061_v40  ;;  %v5255_v40 = vld [vmem:[#allocation102_spill] sm:$0xff]  ;;  %v1913_v36 = vadd.f32 %v3805_v32, %v1781_v14  ;;  %v1935_v50 = vadd.f32 %v3805_v32, %v1803_v39 }
 0x241   : > { %v2041_v14 = vmax.f32 %v1913_v36, 0.0  ;;  %v2063_v12 = vmax.f32 %v1935_v50, 0.0  ;;  %v5260_v50 = vld [vmem:[#allocation45_spill] sm:$0xff] }
 0x243   : > { %1559 = vperm.xlu1 %2963, %v5254_v57   ;;  %v2188_v28 = vpop.f32.mrf.mxu0  ;;  %v4027_v57 = vpop.permute.xlu2 %1315 }
 0x244   : > { %1435 = vperm.xlu2 %2961, %v2966_v25   ;;  %v2576_v6 = vadd.f32 %v3999_v43, %v2188_v28  ;;  %1563 = vperm.xlu0 %2962, %v5255_v40   ;;  %v1654_v28 = vmul.f32 %v3788_v21, %v3883_v53  ;;  %v1035_v25 = vmul.f32 %v3791_v1, %v5257_v22  ;;  %v5258_v40 = vld [vmem:[#allocation101_spill] sm:$0xff] }
 0x245   : > { %v4021_v30 = vpop.permute.xlu1 %1287  ;;  %v1677_v22 = vmul.f32 %v3788_v21, %v3953_v42 }
 0x246   : > { %2705 = vst.msk [vmem:[%s4011_s22] sm:$0xff] %vm2704_vm0, %v2576_v6  ;;  %v4025_v0 = vpop.permute.xlu0 %1295  ;;  %v2967_v6 = vld [vmem:[%s3063_s24 + $0x270] sm:$0xff]  ;;  %v1804_v53 = vadd.f32 %v1676_v58, %v1035_v25  ;;  %v1036_v25 = vmul.f32 %v3791_v1, %v5260_v50  ;;  %v1678_v50 = vmul.f32 %v3788_v21, %v3994_v44 }
 0x247   : > { %2226 = vmatmul.f32.gmra.mxu0 %v2040_v63  ;;  %2292 = vmatmul.f32.gmra.mxu1 %v2062_v31  ;;  %v2968_v63 = vld [vmem:[%s3063_s24 + $0x278] sm:$0xff]  ;;  %v1782_v31 = vadd.f32 %v1654_v28, %v1013_v34  ;;  %v5259_v34 = vld [vmem:[#allocation26_spill] sm:$0xff] }
 0x248   : > { %v1936_v58 = vadd.f32 %v3805_v32, %v1804_v53  ;;  %v1014_v36 = vmul.f32 %v3791_v1, %v5259_v34  ;;  %v1656_v34 = vmul.f32 %v3788_v21, %v3855_v46  ;;  %v2971_v46 = vld [vmem:[%s3063_s24 + $0x290] sm:$0xff] }
 0x249   : > { %v1914_v28 = vadd.f32 %v3805_v32, %v1782_v31 }
 0x24a   : > { %v1783_v42 = vadd.f32 %v1655_v37, %v1014_v36  ;;  %v2064_v53 = vmax.f32 %v1936_v58, 0.0 }
 0x24b   : > { %1439 = vperm.xlu1 %2963, %v2967_v6   ;;  %v4049_v6 = vpop.permute.xlu2 %1327  ;;  %v2042_v31 = vmax.f32 %v1914_v28, 0.0  ;;  %v5264_v28 = vld [vmem:[#allocation64_spill] sm:$0xff] }
 0x24c   : > { %1567 = vperm.xlu2 %2961, %v5258_v40   ;;  %1443 = vperm.xlu0 %2962, %v2968_v63   ;;  %v5261_v40 = vld [vmem:[#allocation109_spill] sm:$0xff]  ;;  %v1805_v63 = vadd.f32 %v1677_v22, %v1036_v25  ;;  %v5263_v22 = vld [vmem:[#allocation10_spill] sm:$0xff]  ;;  %v1037_v58 = vmul.f32 %v3791_v1, %v5264_v28  ;;  %v1657_v28 = vmul.f32 %v3788_v21, %v3896_v52 }
 0x24d   : > { %v4041_v47 = vpop.permute.xlu1 %1299  ;;  %v1015_v36 = vmul.f32 %v3791_v1, %v5263_v22 }
 0x24e   : > { %v4043_v39 = vpop.permute.xlu0 %1307  ;;  %v1937_v37 = vadd.f32 %v3805_v32, %v1805_v63  ;;  %v1806_v44 = vadd.f32 %v1678_v50, %v1037_v58  ;;  %v5268_v58 = vld [vmem:[#allocation115_spill] sm:$0xff] }
 0x24f   : > { %2229 = vmatmul.f32.gmra.mxu0 %v2041_v14  ;;  %2295 = vmatmul.f32.gmra.mxu1 %v2063_v12  ;;  %v2969_v12 = vld [vmem:[%s3063_s24 + $0x280] sm:$0xff] }
 0x253   : > { %1571 = vperm.xlu1 %2963, %v5261_v40   ;;  %v1915_v40 = vadd.f32 %v3805_v32, %v1783_v42  ;;  %v4074_v25 = vpop.permute.xlu2 %1339 }
 0x254   : > { %1447 = vperm.xlu2 %2961, %v2969_v12   ;;  %1575 = vperm.xlu0 %2962, %v5262_v60   ;;  %v2970_v12 = vld [vmem:[%s3063_s24 + $0x288] sm:$0xff]  ;;  %v1784_v60 = vadd.f32 %v1656_v34, %v1015_v36  ;;  %v1679_v34 = vmul.f32 %v3788_v21, %v4021_v30  ;;  %v1938_v36 = vadd.f32 %v3805_v32, %v1806_v44 }
 0x255   : > { %v4060_v14 = vpop.permute.xlu1 %1311  ;;  %v2043_v63 = vmax.f32 %v1915_v40, 0.0  ;;  %v5267_v40 = vld [vmem:[#allocation63_spill] sm:$0xff] }
 0x256   : > { %v4062_v51 = vpop.permute.xlu0 %1319  ;;  %v1916_v22 = vadd.f32 %v3805_v32, %v1784_v60  ;;  %v5269_v60 = vld [vmem:[#allocation114_spill] sm:$0xff] }
 0x257   : > { %2232 = vmatmul.f32.gmra.mxu0 %v2042_v31  ;;  %2298 = vmatmul.f32.gmra.mxu1 %v2064_v53  ;;  %v5265_v31 = vld [vmem:[#allocation107_spill] sm:$0xff]  ;;  %v2065_v53 = vmax.f32 %v1937_v37, 0.0  ;;  %v1038_v37 = vmul.f32 %v3791_v1, %v5267_v40 }
 0x258   : > { %v2044_v52 = vmax.f32 %v1916_v22, 0.0  ;;  %v1658_v22 = vmul.f32 %v3788_v21, %v3905_v38  ;;  %v2974_v38 = vld [vmem:[%s3063_s24 + $0x2a8] sm:$0xff] }
 0x259   : > { %v1807_v30 = vadd.f32 %v1679_v34, %v1038_v37  ;;  %v5271_v37 = vld [vmem:[#allocation29_spill] sm:$0xff] }
 0x25b   : > { %1451 = vperm.xlu1 %2963, %v2970_v12   ;;  %v5266_v12 = vld [vmem:[#allocation30_spill] sm:$0xff] }
 0x25c   : > { %1579 = vperm.xlu2 %2961, %v5265_v31   ;;  %1455 = vperm.xlu0 %2962, %v2971_v46   ;;  %v1016_v50 = vmul.f32 %v3791_v1, %v5266_v12  ;;  %v2972_v31 = vld [vmem:[%s3063_s24 + $0x298] sm:$0xff]  ;;  %v2066_v12 = vmax.f32 %v1938_v36, 0.0  ;;  %v5272_v36 = vld [vmem:[#allocation51_spill] sm:$0xff] }
 0x25d   : > { %v4079_v42 = vpop.permute.xlu1 %1323 }
 0x25e   : > { %v4081_v45 = vpop.permute.xlu0 %1331 }
 0x25f   : > { %2235 = vmatmul.f32.gmra.mxu0 %v2043_v63  ;;  %2301 = vmatmul.f32.gmra.mxu1 %v2065_v53  ;;  %v1785_v63 = vadd.f32 %v1657_v28, %v1016_v50  ;;  %v4096_v53 = vpop.permute.xlu2 %1351  ;;  %v1680_v28 = vmul.f32 %v3788_v21, %v3971_v29  ;;  %v1939_v50 = vadd.f32 %v3805_v32, %v1807_v30 }
 0x260   : > { %5270 = vst [vmem:[#allocation7_spill] sm:$0xff] %v4096_v53 }
 0x261   : > { %v1917_v34 = vadd.f32 %v3805_v32, %v1785_v63  ;;  %v2067_v27 = vmax.f32 %v1939_v50, 0.0  ;;  %v1681_v50 = vmul.f32 %v3788_v21, %v4025_v0  ;;  %v2976_v0 = vld [vmem:[%s3063_s24 + $0x2b0] sm:$0xff] }
 0x263   : > { %1583 = vperm.xlu1 %2963, %v5268_v58   ;;  %v1017_v58 = vmul.f32 %v3791_v1, %v5271_v37  ;;  %v2045_v30 = vmax.f32 %v1917_v34, 0.0 }
 0x264   : > { %1459 = vperm.xlu2 %2961, %v2972_v31   ;;  %1587 = vperm.xlu0 %2962, %v5269_v60   ;;  %v2191_v46 = vpop.f32.mrf.mxu0  ;;  %v1039_v31 = vmul.f32 %v3791_v1, %v5272_v36  ;;  %v2973_v60 = vld [vmem:[%s3063_s24 + $0x2a0] sm:$0xff]  ;;  %v1062_v36 = vmul.f32 %v3791_v1, %v5274_v11 }
 0x265   : > { %v2577_v44 = vadd.f32 %v3999_v43, %v2191_v46  ;;  %v4099_v23 = vpop.permute.xlu1 %1335  ;;  %v1786_v46 = vadd.f32 %v1658_v22, %v1017_v58 }
 0x266   : > { %v4101_v40 = vpop.permute.xlu0 %1343  ;;  %v1808_v29 = vadd.f32 %v1680_v28, %v1039_v31  ;;  %v1659_v28 = vmul.f32 %v3788_v21, %v3868_v26  ;;  %v5275_v31 = vld [vmem:[#allocation16_spill] sm:$0xff] }
 0x267   : > { %2706 = vst.msk [vmem:[%s4011_s22 + $0x8] sm:$0xff] %vm2704_vm0, %v2577_v44  ;;  %2238 = vmatmul.f32.gmra.mxu0 %v2044_v52  ;;  %2304 = vmatmul.f32.gmra.mxu1 %v2066_v12  ;;  %v5273_v52 = vld [vmem:[#allocation113_spill] sm:$0xff]  ;;  %v1388_v53 = vpop.permute.xlu2 %1387  ;;  %v1918_v34 = vadd.f32 %v3805_v32, %v1786_v46 }
 0x268   : > { %v1940_v11 = vadd.f32 %v3805_v32, %v1808_v29  ;;  %v2977_v29 = vld [vmem:[%s3063_s24 + $0x3b0] sm:$0xff] }
 0x26b   : > { %1463 = vperm.xlu1 %2963, %v2973_v60   ;;  %v1018_v60 = vmul.f32 %v3791_v1, %v5275_v31 }
 0x26c   : > { %1591 = vperm.xlu2 %2961, %v5273_v52   ;;  %1467 = vperm.xlu0 %2962, %v2974_v38   ;;  %v2194_v44 = vpop.f32.mrf.mxu0  ;;  %v1704_v52 = vmul.f32 %v3788_v21, %v1388_v53  ;;  %v5276_v38 = vld [vmem:[#allocation67_spill] sm:$0xff] }
 0x26d   : > { %v2578_v63 = vadd.f32 %v3999_v43, %v2194_v44  ;;  %v4119_v12 = vpop.permute.xlu1 %1347  ;;  %v2975_v44 = vld [vmem:[%s3063_s24 + $0x3a8] sm:$0xff] }
 0x26e   : > { %v1384_v37 = vpop.permute.xlu0 %1383 }
 0x26f   : > { %2707 = vst.msk [vmem:[%s4011_s22 + $0x10] sm:$0xff] %vm2704_vm0, %v2578_v63  ;;  %v1703_v22 = vmul.f32 %v3788_v21, %v1384_v37  ;;  %2241 = vmatmul.f32.gmra.mxu0 %v2045_v30  ;;  %2307 = vmatmul.f32.gmra.mxu1 %v2067_v27  ;;  %v1040_v27 = vmul.f32 %v3791_v1, %v5276_v38  ;;  %v5277_v63 = vld [vmem:[#allocation80_spill] sm:$0xff]  ;;  %v2068_v38 = vmax.f32 %v1940_v11, 0.0 }
 0x270   : > { %v1063_v46 = vmul.f32 %v3791_v1, %v5277_v63  ;;  %v1787_v30 = vadd.f32 %v1659_v28, %v1018_v60 }
 0x271   : > { %v1831_v58 = vadd.f32 %v1703_v22, %v1062_v36  ;;  %v2046_v36 = vmax.f32 %v1918_v34, 0.0  ;;  %v1809_v22 = vadd.f32 %v1681_v50, %v1040_v27  ;;  %v1660_v34 = vmul.f32 %v3788_v21, %v3909_v33  ;;  %v5278_v27 = vld [vmem:[#allocation35_spill] sm:$0xff] }
 0x272   : > { %v1919_v60 = vadd.f32 %v3805_v32, %v1787_v30  ;;  %v2979_v30 = vld [vmem:[%s3063_s24 + $0x3b8] sm:$0xff] }
 0x273   : > { %1595 = vperm.xlu1 %2963, %v2975_v44   ;;  %v1963_v26 = vadd.f32 %v3805_v32, %v1831_v58  ;;  %v1094_v58 = vmul.f32 %v3791_v1, %v3681_v8  ;;  %v1832_v44 = vadd.f32 %v1704_v52, %v1063_v46  ;;  %v1682_v8 = vmul.f32 %v3788_v21, %v4041_v47 }
 0x274   : > { %1471 = vperm.xlu2 %2961, %v2976_v0   ;;  %1599 = vperm.xlu0 %2962, %v2977_v29   ;;  %v2197_v37 = vpop.f32.mrf.mxu0  ;;  %v1941_v52 = vadd.f32 %v3805_v32, %v1809_v22  ;;  %v1095_v46 = vmul.f32 %v3791_v1, %v3679_v9  ;;  %v5279_v29 = vld [vmem:[#allocation66_spill] sm:$0xff]  ;;  %v1520_v9 = vpop.permute.xlu2 %1519 }
 0x275   : > { %v2579_v53 = vadd.f32 %v3999_v43, %v2197_v37  ;;  %v1512_v31 = vpop.permute.xlu1 %1511  ;;  %v2091_v49 = vmax.f32 %v1963_v26, 0.0  ;;  %v1019_v26 = vmul.f32 %v3791_v1, %v5278_v27  ;;  %v1964_v33 = vadd.f32 %v3805_v32, %v1832_v44  ;;  %v2978_v37 = vld [vmem:[%s3063_s24 + $0x2b8] sm:$0xff]  ;;  %v2980_v22 = vld [vmem:[%s3063_s24 + $0x2c0] sm:$0xff] }
 0x276   : > { %v1735_v63 = vmul.f32 %v3788_v21, %v1512_v31  ;;  %v1516_v28 = vpop.permute.xlu0 %1515 }
 0x277   : > { %2708 = vst.msk [vmem:[%s4011_s22 + $0x18] sm:$0xff] %vm2704_vm0, %v2579_v53  ;;  %2244 = vmatmul.f32.gmra.mxu0 %v2046_v36  ;;  %2310 = vmatmul.f32.gmra.mxu1 %v2068_v38  ;;  %v1736_v11 = vmul.f32 %v3788_v21, %v1516_v28  ;;  %v1788_v47 = vadd.f32 %v1660_v34, %v1019_v26  ;;  %v2069_v28 = vmax.f32 %v1941_v52, 0.0 }
 0x278   : > { %v1863_v50 = vadd.f32 %v1735_v63, %v1094_v58  ;;  %2379 = vmatmul.f32.vlgmr.msra.gmra.mxu2 %v2091_v49  ;;  %v1041_v49 = vmul.f32 %v3791_v1, %v5279_v29  ;;  %v2047_v63 = vmax.f32 %v1919_v60, 0.0 }
 0x279   : > { %v1864_v36 = vadd.f32 %v1736_v11, %v1095_v46  ;;  %v2092_v11 = vmax.f32 %v1964_v33, 0.0  ;;  %v1920_v60 = vadd.f32 %v3805_v32, %v1788_v47  ;;  %v1661_v33 = vmul.f32 %v3788_v21, %v3919_v35 }
 0x27a   : > { %v1995_v0 = vadd.f32 %v3805_v32, %v1863_v50  ;;  %v1810_v38 = vadd.f32 %v1682_v8, %v1041_v49  ;;  %v5280_v50 = vld [vmem:[#allocation106_spill] sm:$0xff]  ;;  %v1737_v8 = vmul.f32 %v3788_v21, %v1520_v9  ;;  %v1096_v49 = vmul.f32 %v3791_v1, %v3650_v59  ;;  %v2983_v59 = vld [vmem:[%s3063_s24 + $0x3c8] sm:$0xff] }
 0x27b   : > { %1475 = vperm.xlu1 %2963, %v2978_v37   ;;  %v1064_v27 = vmul.f32 %v3791_v1, %v5280_v50  ;;  %v1996_v52 = vadd.f32 %v3805_v32, %v1864_v36  ;;  %v2981_v9 = vld [vmem:[%s3063_s24 + $0x3c0] sm:$0xff] }
 0x27c   : > { %1603 = vperm.xlu2 %2961, %v2979_v30   ;;  %1479 = vperm.xlu0 %2962, %v2980_v22   ;;  %v2200_v53 = vpop.f32.mrf.mxu0  ;;  %v2123_v31 = vmax.f32 %v1995_v0, 0.0  ;;  %v1683_v0 = vmul.f32 %v3788_v21, %v3992_v19  ;;  %v1942_v29 = vadd.f32 %v3805_v32, %v1810_v38  ;;  %v5281_v22 = vld [vmem:[#allocation34_spill] sm:$0xff]  ;;  %v1865_v19 = vadd.f32 %v1737_v8, %v1096_v49  ;;  %v2982_v38 = vld [vmem:[%s3063_s24 + $0x2c8] sm:$0xff] }
 0x27d   : > { %v2580_v58 = vadd.f32 %v3999_v43, %v2200_v53  ;;  %v1392_v44 = vpop.permute.xlu1 %1391  ;;  %v1020_v47 = vmul.f32 %v3791_v1, %v5281_v22  ;;  %v5282_v53 = vld [vmem:[#allocation56_spill] sm:$0xff]  ;;  %v1400_v22 = vpop.permute.xlu2 %1399  ;;  %v1662_v8 = vmul.f32 %v3788_v21, %v3881_v61  ;;  %v5284_v49 = vld [vmem:[#allocation22_spill] sm:$0xff]  ;;  %v1097_v61 = vmul.f32 %v3791_v1, %v3699_v62 }
 0x27e   : > { %v1705_v34 = vmul.f32 %v3788_v21, %v1392_v44  ;;  %2475 = vmatmul.f32.vlgmr.msra.gmra.mxu3 %v2123_v31  ;;  %v1396_v26 = vpop.permute.xlu0 %1395  ;;  %v1042_v36 = vmul.f32 %v3791_v1, %v5282_v53  ;;  %v5283_v31 = vld [vmem:[#allocation105_spill] sm:$0xff]  ;;  %v2048_v44 = vmax.f32 %v1920_v60, 0.0  ;;  %v5285_v53 = vld [vmem:[#allocation70_spill] sm:$0xff] }
 0x27f   : > { %2709 = vst.msk [vmem:[%s4011_s22 + $0x20] sm:$0xff] %vm2704_vm0, %v2580_v58  ;;  %2247 = vmatmul.f32.gmra.mxu0 %v2047_v63  ;;  %2313 = vmatmul.f32.gmra.mxu1 %v2069_v28  ;;  %v1706_v37 = vmul.f32 %v3788_v21, %v1396_v26  ;;  %v1065_v35 = vmul.f32 %v3791_v1, %v5283_v31  ;;  %v2124_v28 = vmax.f32 %v1996_v52, 0.0  ;;  %v2070_v26 = vmax.f32 %v1942_v29, 0.0  ;;  %v2984_v31 = vld [vmem:[%s3063_s24 + $0x1c8] sm:$0xff] }
 0x280   : > { %v1833_v46 = vadd.f32 %v1705_v34, %v1064_v27  ;;  %2382 = vmatmul.f32.gmra.mxu2 %v2092_v11  ;;  %v1789_v50 = vadd.f32 %v1661_v33, %v1020_v47  ;;  %v1811_v27 = vadd.f32 %v1683_v0, %v1042_v36  ;;  %v1997_v52 = vadd.f32 %v3805_v32, %v1865_v19 }
 0x281   : > { %v1684_v33 = vmul.f32 %v3788_v21, %v4043_v39  ;;  %v1043_v36 = vmul.f32 %v3791_v1, %v5285_v53  ;;  %v5286_v39 = vld [vmem:[#allocation86_spill] sm:$0xff] }
 0x282   : > { %v1965_v30 = vadd.f32 %v3805_v32, %v1833_v46  ;;  %v1834_v46 = vadd.f32 %v1706_v37, %v1065_v35  ;;  %v1921_v0 = vadd.f32 %v3805_v32, %v1789_v50  ;;  %v1943_v29 = vadd.f32 %v3805_v32, %v1811_v27 }
 0x283   : > { %1607 = vperm.xlu1 %2963, %v2981_v9   ;;  %v1021_v37 = vmul.f32 %v3791_v1, %v5284_v49  ;;  %v1066_v35 = vmul.f32 %v3791_v1, %v5286_v39  ;;  %v2988_v39 = vld [vmem:[%s3063_s24 + $0x2d8] sm:$0xff] }
 0x284   : > { %1483 = vperm.xlu2 %2961, %v2982_v38   ;;  %1611 = vperm.xlu0 %2962, %v2983_v59   ;;  %v2203_v58 = vpop.f32.mrf.mxu0  ;;  %v2093_v63 = vmax.f32 %v1965_v30, 0.0  ;;  %v1707_v30 = vmul.f32 %v3788_v21, %v1400_v22  ;;  %v1966_v47 = vadd.f32 %v3805_v32, %v1834_v46  ;;  %v2985_v38 = vld [vmem:[%s3063_s24 + $0x2d0] sm:$0xff]  ;;  %v2049_v27 = vmax.f32 %v1921_v0, 0.0  ;;  %v5287_v0 = vld [vmem:[#allocation41_spill] sm:$0xff] }
 0x285   : > { %v2581_v34 = vadd.f32 %v3999_v43, %v2203_v58  ;;  %v1524_v11 = vpop.permute.xlu1 %1523  ;;  %v1790_v9 = vadd.f32 %v1662_v8, %v1021_v37  ;;  %v2986_v59 = vld [vmem:[%s3063_s24 + $0x3d0] sm:$0xff]  ;;  %v2125_v58 = vmax.f32 %v1997_v52, 0.0  ;;  %v1663_v46 = vmul.f32 %v3788_v21, %v3921_v54 }
 0x286   : > { %2478 = vmatmul.f32.gmra.mxu3 %v2124_v28  ;;  %v1738_v60 = vmul.f32 %v3788_v21, %v1524_v11  ;;  %v1835_v11 = vadd.f32 %v1707_v30, %v1066_v35  ;;  %v1098_v54 = vmul.f32 %v3791_v1, %v3697_v15  ;;  %v2989_v35 = vld [vmem:[%s3063_s24 + $0x3d8] sm:$0xff] }
 0x287   : > { %2710 = vst.msk [vmem:[%s4011_s22 + $0x28] sm:$0xff] %vm2704_vm0, %v2581_v34  ;;  %2250 = vmatmul.f32.gmra.mxu0 %v2048_v44  ;;  %2316 = vmatmul.f32.gmra.mxu1 %v2070_v26  ;;  %v1812_v44 = vadd.f32 %v1684_v33, %v1043_v36  ;;  %v2071_v34 = vmax.f32 %v1943_v29, 0.0  ;;  %v2094_v26 = vmax.f32 %v1966_v47, 0.0  ;;  %v1922_v52 = vadd.f32 %v3805_v32, %v1790_v9  ;;  %v2987_v47 = vld [vmem:[%s3063_s24 + $0x1d0] sm:$0xff] }
 0x288   : > { %2385 = vmatmul.f32.gmra.mxu2 %v2093_v63  ;;  %v1866_v19 = vadd.f32 %v1738_v60, %v1097_v61  ;;  %v1528_v63 = vpop.permute.xlu0 %1527  ;;  %v1685_v60 = vmul.f32 %v3788_v21, %v4060_v14  ;;  %v1022_v29 = vmul.f32 %v3791_v1, %v5287_v0  ;;  %v1967_v37 = vadd.f32 %v3805_v32, %v1835_v11  ;;  %v5288_v61 = vld [vmem:[#allocation69_spill] sm:$0xff]  ;;  %v5289_v14 = vld [vmem:[#allocation112_spill] sm:$0xff]  ;;  %v5291_v0 = vld [vmem:[#allocation59_spill] sm:$0xff] }
 0x289   : > { %v1739_v22 = vmul.f32 %v3788_v21, %v1528_v63  ;;  %v1944_v33 = vadd.f32 %v3805_v32, %v1812_v44  ;;  %v1044_v30 = vmul.f32 %v3791_v1, %v5288_v61  ;;  %v1067_v53 = vmul.f32 %v3791_v1, %v5289_v14  ;;  %v2992_v14 = vld [vmem:[%s3063_s24 + $0x3e0] sm:$0xff] }
 0x28a   : > { %v1998_v8 = vadd.f32 %v3805_v32, %v1866_v19  ;;  %v1791_v36 = vadd.f32 %v1663_v46, %v1022_v29  ;;  %v1686_v46 = vmul.f32 %v3788_v21, %v4027_v57  ;;  %v1045_v29 = vmul.f32 %v3791_v1, %v5291_v0  ;;  %v2996_v0 = vld [vmem:[%s3063_s24 + $0x3e8] sm:$0xff] }
 0x28b   : > { %1355 = vperm.xlu1 %2963, %v2984_v31   ;;  %v1867_v31 = vadd.f32 %v1739_v22, %v1098_v54  ;;  %v1813_v19 = vadd.f32 %v1685_v60, %v1044_v30  ;;  %v2072_v44 = vmax.f32 %v1944_v33, 0.0  ;;  %v5292_v54 = vld [vmem:[#allocation111_spill] sm:$0xff]  ;;  %v2991_v30 = vld [vmem:[%s3063_s24 + $0x2e0] sm:$0xff] }
 0x28c   : > { %1487 = vperm.xlu2 %2961, %v2985_v38   ;;  %1615 = vperm.xlu0 %2962, %v2986_v59   ;;  %v2206_v62 = vpop.f32.mrf.mxu0  ;;  %v2126_v9 = vmax.f32 %v1998_v8, 0.0  ;;  %v1532_v38 = vpop.permute.xlu2 %1531  ;;  %v1923_v11 = vadd.f32 %v3805_v32, %v1791_v36  ;;  %v5290_v8 = vld [vmem:[#allocation40_spill] sm:$0xff]  ;;  %v1814_v36 = vadd.f32 %v1686_v46, %v1045_v29  ;;  %v5294_v46 = vld [vmem:[#allocation73_spill] sm:$0xff] }
 0x28d   : > { %v2582_v28 = vadd.f32 %v3999_v43, %v2206_v62  ;;  %v1404_v50 = vpop.permute.xlu1 %1403  ;;  %v1945_v22 = vadd.f32 %v3805_v32, %v1813_v19  ;;  %v1023_v60 = vmul.f32 %v3791_v1, %v5290_v8  ;;  %v2994_v8 = vld [vmem:[%s3063_s24 + $0x1e0] sm:$0xff] }
 0x28e   : > { %2481 = vmatmul.f32.gmra.mxu3 %v2125_v58  ;;  %v1708_v49 = vmul.f32 %v3788_v21, %v1404_v50  ;;  %v2050_v58 = vmax.f32 %v1922_v52, 0.0 }
 0x28f   : > { %2711 = vst.msk [vmem:[%s4011_s22 + $0x30] sm:$0xff] %vm2704_vm0, %v2582_v28  ;;  %2253 = vmatmul.f32.gmra.mxu0 %v2049_v27  ;;  %2319 = vmatmul.f32.gmra.mxu1 %v2071_v34  ;;  %v2095_v28 = vmax.f32 %v1967_v37, 0.0  ;;  %v1664_v27 = vmul.f32 %v3788_v21, %v3935_v41  ;;  %v1740_v34 = vmul.f32 %v3788_v21, %v1532_v38  ;;  %v2990_v37 = vld [vmem:[%s3063_s24 + $0x1d8] sm:$0xff] }
 0x290   : > { %2388 = vmatmul.f32.gmra.mxu2 %v2094_v26  ;;  %v1836_v63 = vadd.f32 %v1708_v49, %v1067_v53  ;;  %v1408_v50 = vpop.permute.xlu0 %1407  ;;  %v1999_v26 = vadd.f32 %v3805_v32, %v1867_v31  ;;  %v1099_v41 = vmul.f32 %v3791_v1, %v3659_v3  ;;  %v1068_v49 = vmul.f32 %v3791_v1, %v5292_v54 }
 0x291   : > { %v1709_v52 = vmul.f32 %v3788_v21, %v1408_v50  ;;  %v1792_v57 = vadd.f32 %v1664_v27, %v1023_v60  ;;  %v2051_v53 = vmax.f32 %v1923_v11, 0.0 }
 0x292   : > { %v1968_v33 = vadd.f32 %v3805_v32, %v1836_v63  ;;  %v1868_v61 = vadd.f32 %v1740_v34, %v1099_v41  ;;  %v2127_v32 = vmax.f32 %v1999_v26, 0.0  ;;  %v1100_v34 = vmul.f32 %v3791_v1, %v3720_v7 }
 0x293   : > { %1359 = vperm.xlu1 %2963, %v2987_v47  }
 0x294   : > { %1491 = vperm.xlu2 %2961, %v2988_v39   ;;  %1619 = vperm.xlu0 %2962, %v2989_v35   ;;  %v2209_v15 = vpop.f32.mrf.mxu0  ;;  %v2096_v19 = vmax.f32 %v1968_v33, 0.0  ;;  %v1412_v38 = vpop.permute.xlu2 %1411  ;;  %v2995_v33 = vld [vmem:[%s3063_s24 + $0x2e8] sm:$0xff] }
 0x295   : > { %v2583_v59 = vadd.f32 %v3999_v43, %v2209_v15  ;;  %v1536_v62 = vpop.permute.xlu1 %1535  ;;  %v2073_v15 = vmax.f32 %v1945_v22, 0.0  ;;  %v1710_v11 = vmul.f32 %v3788_v21, %v1412_v38  ;;  %v1046_v22 = vmul.f32 %v3791_v1, %v5294_v46 }
 0x296   : > { %2484 = vmatmul.f32.gmra.mxu3 %v2126_v9  ;;  %v1837_v9 = vadd.f32 %v1709_v52, %v1068_v49 }
 0x297   : > { %2712 = vst.msk [vmem:[%s4011_s22 + $0x38] sm:$0xff] %vm2704_vm0, %v2583_v59  ;;  %2256 = vmatmul.f32.gmra.mxu0 %v2050_v58  ;;  %2322 = vmatmul.f32.gmra.mxu1 %v2072_v44  ;;  %v1665_v59 = vmul.f32 %v3788_v21, %v3894_v56  ;;  %v1741_v58 = vmul.f32 %v3788_v21, %v1536_v62  ;;  %v4278_v44 = vld [vmem:[%s5005_s2] ss:$0 sm:$0xff]  ;;  %v5293_v62 = vld [vmem:[#allocation25_spill] sm:$0xff] }
 0x298   : > { %2391 = vmatmul.f32.gmra.mxu2 %v2095_v28  ;;  %v2000_v63 = vadd.f32 %v4278_v44, %v1868_v61  ;;  %v1687_v28 = vmul.f32 %v3788_v21, %v4062_v51  ;;  %v1924_v50 = vadd.f32 %v4278_v44, %v1792_v57  ;;  %v1946_v56 = vadd.f32 %v4278_v44, %v1814_v36  ;;  %v5295_v51 = vld [vmem:[#allocation92_spill] sm:$0xff]  ;;  %v1540_v49 = vpop.permute.xlu0 %1539 }
 0x299   : > { %v1024_v27 = vmul.f32 %v3791_v1, %v5293_v62  ;;  %v1969_v26 = vadd.f32 %v4278_v44, %v1837_v9  ;;  %v1069_v60 = vmul.f32 %v3791_v1, %v5295_v51  ;;  %v1869_v52 = vadd.f32 %v1741_v58, %v1100_v34  ;;  %v2998_v62 = vld [vmem:[%s3063_s24 + $0x2f0] sm:$0xff] }
 0x29a   : > { %v2128_v29 = vmax.f32 %v2000_v63, 0.0  ;;  %v1815_v54 = vadd.f32 %v1687_v28, %v1046_v22  ;;  %v2052_v61 = vmax.f32 %v1924_v50, 0.0  ;;  %v1688_v36 = vmul.f32 %v3788_v21, %v4079_v42  ;;  %v2997_v63 = vld [vmem:[%s3063_s24 + $0x1e8] sm:$0xff]  ;;  %v5298_v42 = vld [vmem:[#allocation118_spill] sm:$0xff] }
 0x29b   : > { %1363 = vperm.xlu1 %2963, %v2990_v37   ;;  %v1793_v41 = vadd.f32 %v1665_v59, %v1024_v27  ;;  %v5297_v59 = vld [vmem:[#allocation72_spill] sm:$0xff]  ;;  %v1070_v28 = vmul.f32 %v3791_v1, %v5298_v42 }
 0x29c   : > { %1495 = vperm.xlu2 %2961, %v2991_v30   ;;  %v2284_v47 = vpop.f32.mrf.mxu1  ;;  %1623 = vperm.xlu0 %2962, %v2992_v14   ;;  %v2212_v3 = vpop.f32.mrf.mxu0  ;;  %v2074_v30 = vmax.f32 %v1946_v56, 0.0  ;;  %v2097_v14 = vmax.f32 %v1969_v26, 0.0  ;;  %v1047_v58 = vmul.f32 %v3791_v1, %v5297_v59  ;;  %v2999_v27 = vld [vmem:[%s3063_s24 + $0x3f0] sm:$0xff] }
 0x29d   : > { %v2608_v31 = vadd.f32 %v3999_v43, %v2284_v47  ;;  %v2584_v39 = vadd.f32 %v3999_v43, %v2212_v3  ;;  %v1416_v35 = vpop.permute.xlu1 %1415  ;;  %v1838_v47 = vadd.f32 %v1710_v11, %v1069_v60  ;;  %v1666_v3 = vmul.f32 %v3788_v21, %v3937_v20  ;;  %v1544_v11 = vpop.permute.xlu2 %1543 }
 0x29e   : > { %2487 = vmatmul.f32.gmra.mxu3 %v2127_v32  ;;  %v2001_v32 = vadd.f32 %v4278_v44, %v1869_v52  ;;  %v1101_v20 = vmul.f32 %v3791_v1, %v3718_v10  ;;  %v1667_v52 = vmul.f32 %v3788_v21, %v3947_v24  ;;  %v1102_v24 = vmul.f32 %v3791_v1, %v3668_v5 }
 0x29f   : > { %2737 = vst.msk [vmem:[%s4011_s22 + $0x100] sm:$0xff] %vm2704_vm0, %v2608_v31  ;;  %2259 = vmatmul.f32.gmra.mxu0 %v2051_v53  ;;  %2325 = vmatmul.f32.gmra.mxu1 %v2073_v15  ;;  %v1742_v53 = vmul.f32 %v3788_v21, %v1540_v49  ;;  %v1925_v31 = vadd.f32 %v4278_v44, %v1793_v41  ;;  %v5296_v15 = vld [vmem:[#allocation47_spill] sm:$0xff]  ;;  %v5299_v49 = vld [vmem:[#allocation46_spill] sm:$0xff] }
 0x2a0   : > { %2713 = vst.msk [vmem:[%s4011_s22 + $0x40] sm:$0xff] %vm2704_vm0, %v2584_v39  ;;  %2394 = vmatmul.f32.gmra.mxu2 %v2096_v19  ;;  %v1947_v39 = vadd.f32 %v4278_v44, %v1815_v54  ;;  %v1025_v9 = vmul.f32 %v3791_v1, %v5296_v15  ;;  %v1711_v19 = vmul.f32 %v3788_v21, %v1416_v35  ;;  %v2129_v34 = vmax.f32 %v2001_v32, 0.0  ;;  %v1420_v41 = vpop.permute.xlu0 %1419  ;;  %v3000_v32 = vld [vmem:[%s3063_s24 + $0x1f0] sm:$0xff] }
 0x2a1   : > { %v1970_v38 = vadd.f32 %v4278_v44, %v1838_v47  ;;  %v1870_v56 = vadd.f32 %v1742_v53, %v1101_v20  ;;  %v1816_v35 = vadd.f32 %v1688_v36, %v1047_v58  ;;  %v2053_v22 = vmax.f32 %v1925_v31, 0.0  ;;  %v5300_v47 = vld [vmem:[#allocation62_spill] sm:$0xff]  ;;  %v3001_v31 = vld [vmem:[%s3063_s24 + $0x2f8] sm:$0xff] }
 0x2a2   : > { %v1794_v50 = vadd.f32 %v1666_v3, %v1025_v9  ;;  %v1839_v51 = vadd.f32 %v1711_v19, %v1070_v28  ;;  %v5301_v3 = vld [vmem:[#allocation117_spill] sm:$0xff] }
 0x2a3   : > { %1367 = vperm.xlu1 %2963, %v2994_v8   ;;  %v2075_v8 = vmax.f32 %v1947_v39, 0.0  ;;  %v2098_v60 = vmax.f32 %v1970_v38, 0.0  ;;  %v1948_v54 = vadd.f32 %v4278_v44, %v1816_v35  ;;  %v1071_v53 = vmul.f32 %v3791_v1, %v5301_v3  ;;  %v3002_v39 = vld [vmem:[%s3063_s24 + $0x3f8] sm:$0xff]  ;;  %v5302_v35 = vld [vmem:[#allocation28_spill] sm:$0xff] }
 0x2a4   : > { %1499 = vperm.xlu2 %2961, %v2995_v33   ;;  %1627 = vperm.xlu0 %2962, %v2996_v0   ;;  %v2215_v7 = vpop.f32.mrf.mxu0  ;;  %v1743_v33 = vmul.f32 %v3788_v21, %v1544_v11  ;;  %v1926_v0 = vadd.f32 %v4278_v44, %v1794_v50  ;;  %v1668_v50 = vmul.f32 %v3788_v21, %v3907_v2 }
 0x2a5   : > { %v2585_v37 = vadd.f32 %v3999_v43, %v2215_v7  ;;  %v4299_v57 = vpop.permute.xlu1 %1547  ;;  %v2002_v7 = vadd.f32 %v4278_v44, %v1870_v56  ;;  %v1424_v56 = vpop.permute.xlu2 %1423  ;;  %v1027_v11 = vmul.f32 %v3791_v1, %v5302_v35  ;;  %v1669_v3 = vmul.f32 %v3788_v21, %v3949_v48 }
 0x2a6   : > { %2490 = vmatmul.f32.gmra.mxu3 %v2128_v29  ;;  %v1689_v29 = vmul.f32 %v3788_v21, %v4049_v6  ;;  %v1871_v36 = vadd.f32 %v1743_v33, %v1102_v24  ;;  %v2054_v9 = vmax.f32 %v1926_v0, 0.0 }
 0x2a7   : > { %2714 = vst.msk [vmem:[%s4011_s22 + $0x48] sm:$0xff] %vm2704_vm0, %v2585_v37  ;;  %2262 = vmatmul.f32.gmra.mxu0 %v2052_v61  ;;  %2328 = vmatmul.f32.gmra.mxu1 %v2074_v30  ;;  %v1026_v37 = vmul.f32 %v3791_v1, %v5299_v49  ;;  %v1712_v61 = vmul.f32 %v3788_v21, %v1420_v41  ;;  %v2130_v20 = vmax.f32 %v2002_v7, 0.0 }
 0x2a8   : > { %2397 = vmatmul.f32.gmra.mxu2 %v2097_v14  ;;  %v1971_v30 = vadd.f32 %v4278_v44, %v1839_v51  ;;  %v1048_v14 = vmul.f32 %v3791_v1, %v5300_v47  ;;  %v1552_v49 = vpop.permute.xlu0 %1551 }
 0x2a9   : > { %v1795_v6 = vadd.f32 %v1667_v52, %v1026_v37  ;;  %v1840_v42 = vadd.f32 %v1712_v61, %v1071_v53  ;;  %v3003_v52 = vld [vmem:[%s3063_s24 + $0x1f8] sm:$0xff]  ;;  %v1745_v53 = vmul.f32 %v3788_v21, %v1552_v49 }
 0x2aa   : > { %v1817_v19 = vadd.f32 %v1689_v29, %v1048_v14  ;;  %v2099_v28 = vmax.f32 %v1971_v30, 0.0 }
 0x2ab   : > { %1371 = vperm.xlu1 %2963, %v2997_v63   ;;  %v2076_v63 = vmax.f32 %v1948_v54, 0.0 }
 0x2ac   : > { %1503 = vperm.xlu2 %2961, %v2998_v62   ;;  %1631 = vperm.xlu0 %2962, %v2999_v27   ;;  %v2218_v10 = vpop.f32.mrf.mxu0  ;;  %v1744_v62 = vmul.f32 %v3788_v21, %v4299_v57  ;;  %v1927_v27 = vadd.f32 %v4278_v44, %v1795_v6  ;;  %v1949_v2 = vadd.f32 %v4278_v44, %v1817_v19 }
 0x2ad   : > { %v2586_v26 = vadd.f32 %v3999_v43, %v2218_v10  ;;  %v4325_v46 = vpop.permute.xlu1 %1427  ;;  %v2003_v10 = vadd.f32 %v4278_v44, %v1871_v36  ;;  %v1713_v57 = vmul.f32 %v3788_v21, %v1424_v56  ;;  %v5305_v36 = vld [vmem:[#allocation53_spill] sm:$0xff] }
 0x2ae   : > { %2493 = vmatmul.f32.gmra.mxu3 %v2129_v34  ;;  %v1690_v34 = vmul.f32 %v3788_v21, %v4081_v45  ;;  %v1796_v45 = vadd.f32 %v1668_v50, %v1027_v11  ;;  %v2055_v29 = vmax.f32 %v1927_v27, 0.0  ;;  %v2077_v30 = vmax.f32 %v1949_v2, 0.0 }
 0x2af   : > { %2715 = vst.msk [vmem:[%s4011_s22 + $0x50] sm:$0xff] %vm2704_vm0, %v2586_v26  ;;  %2265 = vmatmul.f32.gmra.mxu0 %v2053_v22  ;;  %2331 = vmatmul.f32.gmra.mxu1 %v2075_v8  ;;  %v1103_v26 = vmul.f32 %v3791_v1, %v3741_v18  ;;  %v1972_v22 = vadd.f32 %v4278_v44, %v1840_v42  ;;  %v5303_v8 = vld [vmem:[#allocation76_spill] sm:$0xff]  ;;  %v2131_v18 = vmax.f32 %v2003_v10, 0.0 }
 0x2b0   : > { %2400 = vmatmul.f32.gmra.mxu2 %v2098_v60  ;;  %v1049_v51 = vmul.f32 %v3791_v1, %v5303_v8  ;;  %v5304_v60 = vld [vmem:[#allocation98_spill] sm:$0xff]  ;;  %v1432_v11 = vpop.permute.xlu0 %1431 }
 0x2b1   : > { %v1072_v41 = vmul.f32 %v3791_v1, %v5304_v60  ;;  %v1872_v33 = vadd.f32 %v1744_v62, %v1103_v26  ;;  %v2100_v14 = vmax.f32 %v1972_v22, 0.0 }
 0x2b2   : > { %v1818_v54 = vadd.f32 %v1690_v34, %v1049_v51  ;;  %v1692_v51 = vmul.f32 %v3788_v21, %v4074_v25 }
 0x2b3   : > { %1375 = vperm.xlu1 %2963, %v3000_v32   ;;  %v1841_v47 = vadd.f32 %v1713_v57, %v1072_v41  ;;  %v1928_v32 = vadd.f32 %v4278_v44, %v1796_v45  ;;  %v2004_v6 = vadd.f32 %v4278_v44, %v1872_v33  ;;  %v1670_v57 = vmul.f32 %v3788_v21, %v3961_v55  ;;  %v5308_v41 = vld [vmem:[#allocation52_spill] sm:$0xff] }
 0x2b4   : > { %1507 = vperm.xlu2 %2961, %v3001_v31   ;;  %1635 = vperm.xlu0 %2962, %v3002_v39   ;;  %v2221_v5 = vpop.f32.mrf.mxu0  ;;  %v2287_v15 = vpop.f32.mrf.mxu1  ;;  %v1028_v31 = vmul.f32 %v3791_v1, %v5305_v36  ;;  %v1691_v39 = vmul.f32 %v3788_v21, %v4099_v23  ;;  %v1950_v48 = vadd.f32 %v4278_v44, %v1818_v54 }
 0x2b5   : > { %v2587_v38 = vadd.f32 %v3999_v43, %v2221_v5  ;;  %v2609_v59 = vadd.f32 %v3999_v43, %v2287_v15  ;;  %v4352_v58 = vpop.permute.xlu1 %1559  ;;  %v1104_v5 = vmul.f32 %v3791_v1, %v3739_v13  ;;  %v1714_v15 = vmul.f32 %v3788_v21, %v4325_v46  ;;  %v1556_v13 = vpop.permute.xlu2 %1555 }
 0x2b6   : > { %2496 = vmatmul.f32.gmra.mxu3 %v2130_v20  ;;  %v5306_v20 = vld [vmem:[#allocation75_spill] sm:$0xff]  ;;  %v2056_v50 = vmax.f32 %v1928_v32, 0.0  ;;  %v2132_v56 = vmax.f32 %v2004_v6, 0.0  ;;  %v2078_v34 = vmax.f32 %v1950_v48, 0.0  ;;  %v1746_v22 = vmul.f32 %v3788_v21, %v1556_v13 }
 0x2b7   : > { %2716 = vst.msk [vmem:[%s4011_s22 + $0x58] sm:$0xff] %vm2704_vm0, %v2587_v38  ;;  %2268 = vmatmul.f32.gmra.mxu0 %v2054_v9  ;;  %2334 = vmatmul.f32.gmra.mxu1 %v2076_v63  ;;  %v1973_v9 = vadd.f32 %v4278_v44, %v1841_v47  ;;  %v1050_v19 = vmul.f32 %v3791_v1, %v5306_v20 }
 0x2b8   : > { %2738 = vst.msk [vmem:[%s4011_s22 + $0x108] sm:$0xff] %vm2704_vm0, %v2609_v59  ;;  %2403 = vmatmul.f32.gmra.mxu2 %v2099_v28  ;;  %v1797_v38 = vadd.f32 %v1669_v3, %v1028_v31  ;;  %v5307_v59 = vld [vmem:[#allocation121_spill] sm:$0xff]  ;;  %v1873_v42 = vadd.f32 %v1745_v53, %v1104_v5  ;;  %v1105_v45 = vmul.f32 %v3791_v1, %v3677_v4 }
 0x2b9   : > { %v1073_v63 = vmul.f32 %v3791_v1, %v5307_v59  ;;  %v1819_v62 = vadd.f32 %v1691_v39, %v1050_v19  ;;  %v2101_v35 = vmax.f32 %v1973_v9, 0.0  ;;  %v1715_v55 = vmul.f32 %v3788_v21, %v1432_v11 }
 0x2ba   : > { %v1929_v26 = vadd.f32 %v4278_v44, %v1797_v38  ;;  %v2005_v8 = vadd.f32 %v4278_v44, %v1873_v42  ;;  %v1874_v54 = vadd.f32 %v1746_v22, %v1105_v45  ;;  %v1747_v31 = vmul.f32 %v3788_v21, %v4352_v58  ;;  %v5311_v58 = vld [vmem:[#allocation82_spill] sm:$0xff]  ;;  %v5312_v38 = vld [vmem:[#allocation104_spill] sm:$0xff] }
 0x2bb   : > { %1379 = vperm.xlu1 %2963, %v3003_v52   ;;  %v1842_v2 = vadd.f32 %v1714_v15, %v1073_v63  ;;  %v1951_v60 = vadd.f32 %v4278_v44, %v1819_v62  ;;  %v1029_v52 = vmul.f32 %v3791_v1, %v5308_v41  ;;  %v1693_v48 = vmul.f32 %v3788_v21, %v4101_v40 }
 0x2bc   : > { %v2224_v0 = vpop.f32.mrf.mxu0  ;;  %v2290_v7 = vpop.f32.mrf.mxu1  ;;  %v1106_v15 = vmul.f32 %v3791_v1, %v3762_v16  ;;  %v1052_v19 = vmul.f32 %v3791_v1, %v5311_v58  ;;  %v1075_v59 = vmul.f32 %v3791_v1, %v5312_v38  ;;  %v4457_v16 = vld [vmem:[%s5007_s4] ss:$0 sm:$0xff]  ;;  %v1107_v22 = vmul.f32 %v3791_v1, %v3760_v17 }
 0x2bd   : > { %v2588_v37 = vadd.f32 %v3999_v43, %v2224_v0  ;;  %v2610_v24 = vadd.f32 %v3999_v43, %v2290_v7  ;;  %v4380_v61 = vpop.permute.xlu1 %1439  ;;  %v1974_v33 = vadd.f32 %v4278_v44, %v1842_v2  ;;  %v5309_v0 = vld [vmem:[#allocation65_spill] sm:$0xff]  ;;  %v1798_v25 = vadd.f32 %v1670_v57, %v1029_v52  ;;  %v1436_v36 = vpop.permute.xlu2 %1435  ;;  %v5314_v52 = vld [vmem:[#allocation124_spill] sm:$0xff] }
 0x2be   : > { %2499 = vmatmul.f32.gmra.mxu3 %v2131_v18  ;;  %v1051_v7 = vmul.f32 %v3791_v1, %v5309_v0  ;;  %v2079_v53 = vmax.f32 %v1951_v60, 0.0  ;;  %v1716_v9 = vmul.f32 %v3788_v21, %v1436_v36  ;;  %v1875_v63 = vadd.f32 %v1747_v31, %v1106_v15  ;;  %v5313_v60 = vld [vmem:[#allocation81_spill] sm:$0xff]  ;;  %v5317_v31 = vld [vmem:[#allocation68_spill] sm:$0xff] }
 0x2bf   : > { %2717 = vst.msk [vmem:[%s4011_s22 + $0x60] sm:$0xff] %vm2704_vm0, %v2588_v37  ;;  %2271 = vmatmul.f32.gmra.mxu0 %v2055_v29  ;;  %2337 = vmatmul.f32.gmra.mxu1 %v2077_v30  ;;  %v5310_v29 = vld [vmem:[#allocation120_spill] sm:$0xff]  ;;  %v2133_v30 = vmax.f32 %v2005_v8, 0.0  ;;  %v2102_v6 = vmax.f32 %v1974_v33, 0.0  ;;  %v1930_v39 = vadd.f32 %v4278_v44, %v1798_v25  ;;  %v1717_v8 = vmul.f32 %v3788_v21, %v4380_v61 }
 0x2c0   : > { %2739 = vst.msk [vmem:[%s4011_s22 + $0x110] sm:$0xff] %vm2704_vm0, %v2610_v24  ;;  %2406 = vmatmul.f32.gmra.mxu2 %v2100_v14  ;;  %v1074_v18 = vmul.f32 %v3791_v1, %v5310_v29  ;;  %v2057_v24 = vmax.f32 %v1929_v26, 0.0  ;;  %v1820_v47 = vadd.f32 %v1692_v51, %v1051_v7  ;;  %v2007_v11 = vadd.f32 %v4278_v44, %v1875_v63 }
 0x2c1   : > { %v2058_v40 = vmax.f32 %v1930_v39, 0.0  ;;  %v1694_v26 = vmul.f32 %v3788_v21, %v4119_v12  ;;  %v1053_v41 = vmul.f32 %v3791_v1, %v5313_v60  ;;  %v1076_v45 = vmul.f32 %v3791_v1, %v5314_v52 }
 0x2c2   : > { %v1843_v32 = vadd.f32 %v1715_v55, %v1074_v18  ;;  %v1952_v5 = vadd.f32 %v4278_v44, %v1820_v47  ;;  %v2135_v0 = vmax.f32 %v2007_v11, 0.0  ;;  %v5315_v47 = vld [vmem:[#allocation7_spill] sm:$0xff]  ;;  %v1054_v39 = vmul.f32 %v3791_v1, %v5317_v31 }
 0x2c3   : > { %v1822_v7 = vadd.f32 %v1694_v26, %v1053_v41 }
 0x2c4   : > { %v2227_v23 = vpop.f32.mrf.mxu0  ;;  %v2293_v28 = vpop.f32.mrf.mxu1  ;;  %v1975_v20 = vadd.f32 %v4278_v44, %v1843_v32 }
 0x2c5   : > { %v2589_v46 = vadd.f32 %v3999_v43, %v2227_v23  ;;  %v2611_v27 = vadd.f32 %v3999_v43, %v2293_v28  ;;  %v4407_v10 = vpop.permute.xlu1 %1571  ;;  %v1568_v29 = vpop.permute.xlu2 %1567 }
 0x2c6   : > { %2502 = vmatmul.f32.gmra.mxu3 %v2132_v56  ;;  %v1564_v56 = vpop.permute.xlu0 %1563  ;;  %v2103_v2 = vmax.f32 %v1975_v20, 0.0 }
 0x2c7   : > { %2718 = vst.msk [vmem:[%s4011_s22 + $0x68] sm:$0xff] %vm2704_vm0, %v2589_v46  ;;  %2274 = vmatmul.f32.gmra.mxu0 %v2056_v50  ;;  %2340 = vmatmul.f32.gmra.mxu1 %v2078_v34  ;;  %v1821_v50 = vadd.f32 %v1693_v48, %v1052_v19  ;;  %v1844_v34 = vadd.f32 %v1716_v9, %v1075_v59 }
 0x2c8   : > { %2740 = vst.msk [vmem:[%s4011_s22 + $0x118] sm:$0xff] %vm2704_vm0, %v2611_v27  ;;  %2409 = vmatmul.f32.gmra.mxu2 %v2101_v35  ;;  %v2080_v27 = vmax.f32 %v1952_v5, 0.0  ;;  %v1748_v35 = vmul.f32 %v3788_v21, %v1564_v56 }
 0x2c9   : > { %v1953_v57 = vadd.f32 %v4278_v44, %v1821_v50  ;;  %v1976_v51 = vadd.f32 %v4278_v44, %v1844_v34 }
 0x2ca   : > { %v1876_v55 = vadd.f32 %v1748_v35, %v1107_v22 }
 0x2cb   : > { %v2081_v25 = vmax.f32 %v1953_v57, 0.0 }
 0x2cc   : > { %v2230_v49 = vpop.f32.mrf.mxu0  ;;  %v2296_v37 = vpop.f32.mrf.mxu1 }
 0x2cd   : > { %v2590_v4 = vadd.f32 %v3999_v43, %v2230_v49  ;;  %v2612_v14 = vadd.f32 %v3999_v43, %v2296_v37  ;;  %v4433_v3 = vpop.permute.xlu1 %1451  ;;  %v2006_v43 = vadd.f32 %v4278_v44, %v1874_v54  ;;  %v1845_v54 = vadd.f32 %v1717_v8, %v1076_v45 }
 0x2ce   : > { %2505 = vmatmul.f32.gmra.mxu3 %v2133_v30  ;;  %v2104_v49 = vmax.f32 %v1976_v51, 0.0  ;;  %v1444_v37 = vpop.permute.xlu0 %1443  ;;  %v2008_v30 = vadd.f32 %v4278_v44, %v1876_v55 }
 0x2cf   : > { %2719 = vst.msk [vmem:[%s4011_s22 + $0x70] sm:$0xff] %vm2704_vm0, %v2590_v4  ;;  %2277 = vmatmul.f32.gmra.mxu0 %v2057_v24  ;;  %2343 = vmatmul.f32.gmra.mxu1 %v2079_v53  ;;  %v2134_v28 = vmax.f32 %v2006_v43, 0.0  ;;  %v1749_v24 = vmul.f32 %v3788_v21, %v1568_v29  ;;  %v1695_v4 = vmul.f32 %v3788_v21, %v5315_v47  ;;  %v5316_v53 = vld [vmem:[#allocation137_spill] sm:$0xff]  ;;  %v5318_v43 = vld [vmem:[#allocation123_spill] sm:$0xff] }
 0x2d0   : > { %2741 = vst.msk [vmem:[%s4011_s22 + $0x120] sm:$0xff] %vm2704_vm0, %v2612_v14  ;;  %2412 = vmatmul.f32.gmra.mxu2 %v2102_v6  ;;  %v1954_v14 = vadd.f32 %v4278_v44, %v1822_v7  ;;  %v1108_v32 = vmul.f32 %v3791_v1, %v5316_v53  ;;  %v1718_v6 = vmul.f32 %v3788_v21, %v1444_v37  ;;  %v2136_v20 = vmax.f32 %v2008_v30, 0.0 }
 0x2d1   : > { %v1977_v36 = vadd.f32 %v4278_v44, %v1845_v54  ;;  %v1077_v48 = vmul.f32 %v3791_v1, %v5318_v43  ;;  %v1823_v58 = vadd.f32 %v1695_v4, %v1054_v39  ;;  %v1720_v29 = vmul.f32 %v3788_v21, %v4433_v3 }
 0x2d2   : > { %v1877_v5 = vadd.f32 %v1749_v24, %v1108_v32  ;;  %v2082_v63 = vmax.f32 %v1954_v14, 0.0  ;;  %v5323_v14 = vld [vmem:[#allocation150_spill] sm:$0xff] }
 0x2d3   : > { %v1955_v56 = vadd.f32 %v4278_v44, %v1823_v58  ;;  %v1118_v53 = vmul.f32 %v3791_v1, %v5323_v14 }
 0x2d4   : > { %v2233_v42 = vpop.f32.mrf.mxu0  ;;  %v2299_v23 = vpop.f32.mrf.mxu1  ;;  %v2009_v50 = vadd.f32 %v4278_v44, %v1877_v5 }
 0x2d5   : > { %v2591_v62 = vadd.f32 %v4457_v16, %v2233_v42  ;;  %v2613_v13 = vadd.f32 %v4457_v16, %v2299_v23  ;;  %v4461_v46 = vpop.permute.xlu1 %1583  ;;  %v1846_v42 = vadd.f32 %v1718_v6, %v1077_v48  ;;  %v2105_v23 = vmax.f32 %v1977_v36, 0.0  ;;  %v5324_v48 = vld [vmem:[#allocation138_spill] sm:$0xff] }
 0x2d6   : > { %2508 = vmatmul.f32.gmra.mxu3 %v2134_v28  ;;  %v1750_v28 = vmul.f32 %v3788_v21, %v4407_v10  ;;  %v2137_v57 = vmax.f32 %v2009_v50, 0.0  ;;  %v1576_v22 = vpop.permute.xlu0 %1575  ;;  %v2083_v41 = vmax.f32 %v1955_v56, 0.0  ;;  %v1111_v5 = vmul.f32 %v3791_v1, %v5324_v48 }
 0x2d7   : > { %2720 = vst.msk [vmem:[%s4011_s22 + $0x78] sm:$0xff] %vm2704_vm0, %v2591_v62  ;;  %2280 = vmatmul.f32.gmra.mxu0 %v2058_v40  ;;  %2346 = vmatmul.f32.gmra.mxu1 %v2080_v27  ;;  %v1448_v40 = vpop.permute.xlu2 %1447  ;;  %v5319_v62 = vld [vmem:[#allocation143_spill] sm:$0xff]  ;;  %v1978_v34 = vadd.f32 %v4278_v44, %v1846_v42  ;;  %v1751_v55 = vmul.f32 %v3788_v21, %v1576_v22 }
 0x2d8   : > { %2742 = vst.msk [vmem:[%s4011_s22 + $0x128] sm:$0xff] %vm2704_vm0, %v2613_v13  ;;  %2415 = vmatmul.f32.gmra.mxu2 %v2103_v2  ;;  %v1109_v13 = vmul.f32 %v3791_v1, %v5319_v62  ;;  %v1719_v27 = vmul.f32 %v3788_v21, %v1448_v40  ;;  %v5320_v2 = vld [vmem:[#allocation110_spill] sm:$0xff] }
 0x2d9   : > { %v1078_v35 = vmul.f32 %v3791_v1, %v5320_v2  ;;  %v2106_v45 = vmax.f32 %v1978_v34, 0.0 }
 0x2da   : > { %v1878_v10 = vadd.f32 %v1750_v28, %v1109_v13  ;;  %v5326_v13 = vld [vmem:[#allocation88_spill] sm:$0xff] }
 0x2db   : > { %v1847_v52 = vadd.f32 %v1719_v27, %v1078_v35  ;;  %v1055_v27 = vmul.f32 %v3791_v1, %v5326_v13 }
 0x2dc   : > { %v2236_v33 = vpop.f32.mrf.mxu0  ;;  %v2302_v12 = vpop.f32.mrf.mxu1 }
 0x2dd   : > { %v2592_v17 = vadd.f32 %v4457_v16, %v2236_v33  ;;  %v2614_v61 = vadd.f32 %v4457_v16, %v2302_v12  ;;  %v4483_v18 = vpop.permute.xlu1 %1463  ;;  %v2010_v33 = vadd.f32 %v4278_v44, %v1878_v10  ;;  %v1753_v10 = vmul.f32 %v3788_v21, %v4461_v46 }
 0x2de   : > { %2511 = vmatmul.f32.gmra.mxu3 %v2135_v0  ;;  %v5321_v0 = vld [vmem:[#allocation142_spill] sm:$0xff]  ;;  %v1456_v36 = vpop.permute.xlu0 %1455  ;;  %v1723_v48 = vmul.f32 %v3788_v21, %v4483_v18 }
 0x2df   : > { %2721 = vst.msk [vmem:[%s4011_s22 + $0x80] sm:$0xff] %vm2704_vm0, %v2592_v17  ;;  %2349 = vmatmul.f32.gmra.mxu1 %v2081_v25  ;;  %v1580_v12 = vpop.permute.xlu2 %1579  ;;  %v1110_v7 = vmul.f32 %v3791_v1, %v5321_v0  ;;  %v1979_v17 = vadd.f32 %v4278_v44, %v1847_v52  ;;  %v2138_v24 = vmax.f32 %v2010_v33, 0.0 }
 0x2e0   : > { %2743 = vst.msk [vmem:[%s4011_s22 + $0x130] sm:$0xff] %vm2704_vm0, %v2614_v61  ;;  %2418 = vmatmul.f32.gmra.mxu2 %v2104_v49  ;;  %v5322_v61 = vld [vmem:[#allocation127_spill] sm:$0xff]  ;;  %v1752_v31 = vmul.f32 %v3788_v21, %v1580_v12 }
 0x2e1   : > { %v1079_v25 = vmul.f32 %v3791_v1, %v5322_v61  ;;  %v1879_v54 = vadd.f32 %v1751_v55, %v1110_v7  ;;  %v2107_v6 = vmax.f32 %v1979_v17, 0.0  ;;  %v5328_v55 = vld [vmem:[#allocation116_spill] sm:$0xff] }
 0x2e2   : > { %v1081_v33 = vmul.f32 %v3791_v1, %v5328_v55  ;;  %v5334_v55 = vld [vmem:[#allocation129_spill] sm:$0xff] }
 0x2e3   : > { %v1848_v3 = vadd.f32 %v1720_v29, %v1079_v25  ;;  %v2011_v43 = vadd.f32 %v4278_v44, %v1879_v54  ;;  %v5329_v54 = vld [vmem:[#allocation87_spill] sm:$0xff] }
 0x2e4   : > { %v2239_v15 = vpop.f32.mrf.mxu0  ;;  %v2305_v9 = vpop.f32.mrf.mxu1 }
 0x2e5   : > { %v2593_v19 = vadd.f32 %v4457_v16, %v2239_v15  ;;  %v2615_v38 = vadd.f32 %v4457_v16, %v2305_v9  ;;  %v4504_v59 = vpop.permute.xlu1 %1595  ;;  %v1721_v15 = vmul.f32 %v3788_v21, %v1456_v36  ;;  %v1980_v9 = vadd.f32 %v4278_v44, %v1848_v3  ;;  %v5330_v36 = vld [vmem:[#allocation145_spill] sm:$0xff] }
 0x2e6   : > { %2514 = vmatmul.f32.gmra.mxu3 %v2136_v20  ;;  %v2139_v28 = vmax.f32 %v2011_v43, 0.0 }
 0x2e7   : > { %2722 = vst.msk [vmem:[%s4011_s22 + $0x88] sm:$0xff] %vm2704_vm0, %v2593_v19  ;;  %2352 = vmatmul.f32.gmra.mxu1 %v2082_v63  ;;  %v1460_v20 = vpop.permute.xlu2 %1459  ;;  %v5325_v19 = vld [vmem:[#allocation126_spill] sm:$0xff]  ;;  %v1880_v63 = vadd.f32 %v1752_v31, %v1111_v5  ;;  %v2108_v35 = vmax.f32 %v1980_v9, 0.0  ;;  %v1113_v31 = vmul.f32 %v3791_v1, %v5330_v36  ;;  %v5336_v36 = vld [vmem:[#allocation148_spill] sm:$0xff] }
 0x2e8   : > { %2744 = vst.msk [vmem:[%s4011_s22 + $0x138] sm:$0xff] %vm2704_vm0, %v2615_v38  ;;  %2421 = vmatmul.f32.gmra.mxu2 %v2105_v23  ;;  %v1080_v38 = vmul.f32 %v3791_v1, %v5325_v19 }
 0x2ea   : > { %v1849_v34 = vadd.f32 %v1721_v15, %v1080_v38 }
 0x2ec   : > { %v2242_v11 = vpop.f32.mrf.mxu0  ;;  %v2308_v26 = vpop.f32.mrf.mxu1  ;;  %v1981_v46 = vadd.f32 %v4278_v44, %v1849_v34 }
 0x2ed   : > { %v2594_v8 = vadd.f32 %v4457_v16, %v2242_v11  ;;  %v2616_v51 = vadd.f32 %v4457_v16, %v2308_v26  ;;  %v4522_v60 = vpop.permute.xlu1 %1475  ;;  %v2012_v26 = vadd.f32 %v4278_v44, %v1880_v63 }
 0x2ee   : > { %2517 = vmatmul.f32.gmra.mxu3 %v2137_v57  ;;  %v5327_v57 = vld [vmem:[#allocation146_spill] sm:$0xff] }
 0x2ef   : > { %2723 = vst.msk [vmem:[%s4011_s22 + $0x90] sm:$0xff] %vm2704_vm0, %v2594_v8  ;;  %2355 = vmatmul.f32.gmra.mxu1 %v2083_v41  ;;  %v1112_v22 = vmul.f32 %v3791_v1, %v5327_v57  ;;  %v1588_v8 = vpop.permute.xlu0 %1587  ;;  %v1722_v41 = vmul.f32 %v3788_v21, %v1460_v20  ;;  %v2140_v25 = vmax.f32 %v2012_v26, 0.0  ;;  %v5331_v20 = vld [vmem:[#allocation130_spill] sm:$0xff] }
 0x2f0   : > { %2745 = vst.msk [vmem:[%s4011_s22 + $0x140] sm:$0xff] %vm2704_vm0, %v2616_v51  ;;  %2424 = vmatmul.f32.gmra.mxu2 %v2106_v45  ;;  %v1754_v3 = vmul.f32 %v3788_v21, %v1588_v8 }
 0x2f1   : > { %v1881_v0 = vadd.f32 %v1753_v10, %v1112_v22  ;;  %v5333_v22 = vld [vmem:[#allocation139_spill] sm:$0xff] }
 0x2f2   : > { %v1882_v63 = vadd.f32 %v1754_v3, %v1113_v31  ;;  %v1114_v8 = vmul.f32 %v3791_v1, %v5333_v22  ;;  %v1756_v3 = vmul.f32 %v3788_v21, %v4504_v59  ;;  %v1115_v31 = vmul.f32 %v3791_v1, %v5336_v36 }
 0x2f4   : > { %v2245_v49 = vpop.f32.mrf.mxu0  ;;  %v2311_v37 = vpop.f32.mrf.mxu1  ;;  %v2014_v57 = vadd.f32 %v4278_v44, %v1882_v63 }
 0x2f5   : > { %v2595_v30 = vadd.f32 %v4457_v16, %v2245_v49  ;;  %v2617_v47 = vadd.f32 %v4457_v16, %v2311_v37  ;;  %v1608_v4 = vpop.permute.xlu1 %1607  ;;  %v1056_v49 = vmul.f32 %v3791_v1, %v5329_v54  ;;  %v1592_v37 = vpop.permute.xlu2 %1591  ;;  %v5335_v54 = vld [vmem:[#allocation94_spill] sm:$0xff] }
 0x2f6   : > { %v1759_v32 = vmul.f32 %v3788_v21, %v1608_v4  ;;  %2520 = vmatmul.f32.gmra.mxu3 %v2138_v24  ;;  %v1850_v4 = vadd.f32 %v1722_v41, %v1081_v33  ;;  %v1083_v33 = vmul.f32 %v3791_v1, %v5334_v55 }
 0x2f7   : > { %2724 = vst.msk [vmem:[%s4011_s22 + $0x98] sm:$0xff] %vm2704_vm0, %v2595_v30  ;;  %v1468_v19 = vpop.permute.xlu0 %1467 }
 0x2f8   : > { %2746 = vst.msk [vmem:[%s4011_s22 + $0x148] sm:$0xff] %vm2704_vm0, %v2617_v47  ;;  %v4547_v39 = vadd.f32 %v1759_v32, %v1118_v53  ;;  %2427 = vmatmul.f32.gmra.mxu2 %v2107_v6  ;;  %v2109_v53 = vmax.f32 %v1981_v46, 0.0  ;;  %v2013_v6 = vadd.f32 %v4278_v44, %v1881_v0  ;;  %v1982_v9 = vadd.f32 %v4278_v44, %v1850_v4 }
 0x2f9   : > { %v1724_v41 = vmul.f32 %v3788_v21, %v1468_v19 }
 0x2fb   : > { %v2380_v58 = vpop.f32.mrf.mxu2  ;;  %v1852_v4 = vadd.f32 %v1724_v41, %v1083_v33 }
 0x2fc   : > { %v2640_v42 = vadd.f32 %v4457_v16, %v2380_v58  ;;  %v2248_v23 = vpop.f32.mrf.mxu0  ;;  %v2314_v40 = vpop.f32.mrf.mxu1  ;;  %v1082_v58 = vmul.f32 %v3791_v1, %v5331_v20  ;;  %v5337_v20 = vld [vmem:[#allocation119_spill] sm:$0xff] }
 0x2fd   : > { %v2596_v50 = vadd.f32 %v4457_v16, %v2248_v23  ;;  %v2618_v56 = vadd.f32 %v4457_v16, %v2314_v40  ;;  %v1356_v62 = vpop.permute.xlu1 %1355  ;;  %v1472_v10 = vpop.permute.xlu2 %1471  ;;  %v1984_v59 = vadd.f32 %v4278_v44, %v1852_v4 }
 0x2fe   : > { %2769 = vst.msk [vmem:[%s4011_s22 + $0x200] sm:$0xff] %vm2704_vm0, %v2640_v42  ;;  %v1696_v2 = vmul.f32 %v3788_v21, %v1356_v62  ;;  %2523 = vmatmul.f32.gmra.mxu3 %v2139_v28  ;;  %v2141_v28 = vmax.f32 %v2013_v6, 0.0  ;;  %v1851_v34 = vadd.f32 %v1723_v48, %v1082_v58  ;;  %v1084_v58 = vmul.f32 %v3791_v1, %v5337_v20 }
 0x2ff   : > { %2725 = vst.msk [vmem:[%s4011_s22 + $0xa0] sm:$0xff] %vm2704_vm0, %v2596_v50  ;;  %v5332_v50 = vld [vmem:[#allocation71_spill] sm:$0xff] }
 0x300   : > { %2747 = vst.msk [vmem:[%s4011_s22 + $0x150] sm:$0xff] %vm2704_vm0, %v2618_v56  ;;  %v1824_v11 = vadd.f32 %v1696_v2, %v1055_v27  ;;  %2430 = vmatmul.f32.gmra.mxu2 %v2108_v35  ;;  %v1057_v56 = vmul.f32 %v3791_v1, %v5332_v50  ;;  %v2110_v35 = vmax.f32 %v1982_v9, 0.0  ;;  %v1983_v46 = vadd.f32 %v4278_v44, %v1851_v34 }
 0x301   : > { %v2476_v51 = vpop.f32.mrf.mxu3 }
 0x302   : > { %v2672_v52 = vadd.f32 %v4457_v16, %v2476_v51  ;;  %v1956_v45 = vadd.f32 %v4278_v44, %v1824_v11  ;;  %v1755_v11 = vmul.f32 %v3788_v21, %v1592_v37  ;;  %v1600_v37 = vpop.permute.xlu0 %1599 }
 0x303   : > { %v2383_v12 = vpop.f32.mrf.mxu2 }
 0x304   : > { %v2641_v7 = vadd.f32 %v4457_v16, %v2383_v12  ;;  %2801 = vst.msk [vmem:[%s4011_s22 + $0x300] sm:$0xff] %vm2704_vm0, %v2672_v52  ;;  %v2251_v29 = vpop.f32.mrf.mxu0  ;;  %v2317_v17 = vpop.f32.mrf.mxu1  ;;  %v2084_v61 = vmax.f32 %v1956_v45, 0.0  ;;  %v1883_v0 = vadd.f32 %v1755_v11, %v1114_v8 }
 0x305   : > { %v2597_v24 = vadd.f32 %v4457_v16, %v2251_v29  ;;  %v2619_v30 = vadd.f32 %v4457_v16, %v2317_v17  ;;  %v1360_v47 = vpop.permute.xlu1 %1359 }
 0x306   : > { %2770 = vst.msk [vmem:[%s4011_s22 + $0x208] sm:$0xff] %vm2704_vm0, %v2641_v7  ;;  %v1697_v14 = vmul.f32 %v3788_v21, %v1360_v47  ;;  %2358 = vmatmul.f32.gmra.mxu1 %v2084_v61  ;;  %2526 = vmatmul.f32.gmra.mxu3 %v2140_v25  ;;  %v2142_v25 = vmax.f32 %v2014_v57, 0.0  ;;  %v2015_v6 = vadd.f32 %v4278_v44, %v1883_v0  ;;  %v5339_v57 = vld [vmem:[#allocation147_spill] sm:$0xff] }
 0x307   : > { %2726 = vst.msk [vmem:[%s4011_s22 + $0xa8] sm:$0xff] %vm2704_vm0, %v2597_v24  ;;  %v1116_v22 = vmul.f32 %v3791_v1, %v5339_v57 }
 0x308   : > { %2748 = vst.msk [vmem:[%s4011_s22 + $0x158] sm:$0xff] %vm2704_vm0, %v2619_v30  ;;  %v1825_v32 = vadd.f32 %v1697_v14, %v1056_v49  ;;  %2433 = vmatmul.f32.gmra.mxu2 %v2109_v53  ;;  %v1058_v49 = vmul.f32 %v3791_v1, %v5335_v54  ;;  %v2111_v53 = vmax.f32 %v1983_v46, 0.0  ;;  %v5340_v46 = vld [vmem:[#allocation132_spill] sm:$0xff] }
 0x309   : > { %v2479_v43 = vpop.f32.mrf.mxu3  ;;  %v1085_v55 = vmul.f32 %v3791_v1, %v5340_v46 }
 0x30a   : > { %v2673_v5 = vadd.f32 %v4457_v16, %v2479_v43  ;;  %v1957_v15 = vadd.f32 %v4278_v44, %v1825_v32  ;;  %v1604_v43 = vpop.permute.xlu2 %1603 }
 0x30b   : > { %v2386_v38 = vpop.f32.mrf.mxu2  ;;  %v1758_v4 = vmul.f32 %v3788_v21, %v1604_v43 }
 0x30c   : > { %v2642_v42 = vadd.f32 %v4457_v16, %v2386_v38  ;;  %2802 = vst.msk [vmem:[%s4011_s22 + $0x308] sm:$0xff] %vm2704_vm0, %v2673_v5  ;;  %v2254_v23 = vpop.f32.mrf.mxu0  ;;  %v2320_v18 = vpop.f32.mrf.mxu1  ;;  %v2085_v40 = vmax.f32 %v1957_v15, 0.0  ;;  %v1725_v5 = vmul.f32 %v3788_v21, %v1472_v10  ;;  %v1884_v38 = vadd.f32 %v1756_v3, %v1115_v31 }
 0x30d   : > { %v2598_v62 = vadd.f32 %v4457_v16, %v2254_v23  ;;  %v2620_v13 = vadd.f32 %v4457_v16, %v2320_v18  ;;  %v1364_v27 = vpop.permute.xlu1 %1363  ;;  %v1757_v10 = vmul.f32 %v3788_v21, %v1600_v37 }
 0x30e   : > { %2771 = vst.msk [vmem:[%s4011_s22 + $0x210] sm:$0xff] %vm2704_vm0, %v2642_v42  ;;  %v1698_v2 = vmul.f32 %v3788_v21, %v1364_v27  ;;  %2361 = vmatmul.f32.gmra.mxu1 %v2085_v40  ;;  %2529 = vmatmul.f32.gmra.mxu3 %v2141_v28  ;;  %v2143_v40 = vmax.f32 %v2015_v6, 0.0  ;;  %v5338_v28 = vld [vmem:[#allocation93_spill] sm:$0xff]  ;;  %v1853_v27 = vadd.f32 %v1725_v5, %v1084_v58 }
 0x30f   : > { %2727 = vst.msk [vmem:[%s4011_s22 + $0xb0] sm:$0xff] %vm2704_vm0, %v2598_v62  ;;  %v1059_v50 = vmul.f32 %v3791_v1, %v5338_v28  ;;  %v1885_v0 = vadd.f32 %v1757_v10, %v1116_v22 }
 0x310   : > { %2749 = vst.msk [vmem:[%s4011_s22 + $0x160] sm:$0xff] %vm2704_vm0, %v2620_v13  ;;  %v1826_v26 = vadd.f32 %v1698_v2, %v1057_v56  ;;  %2436 = vmatmul.f32.gmra.mxu2 %v2110_v35  ;;  %v2112_v2 = vmax.f32 %v1984_v59, 0.0  ;;  %v1480_v35 = vpop.permute.xlu0 %1479 }
 0x311   : > { %v2482_v51 = vpop.f32.mrf.mxu3 }
 0x312   : > { %v2674_v52 = vadd.f32 %v4457_v16, %v2482_v51  ;;  %v1958_v45 = vadd.f32 %v4278_v44, %v1826_v26  ;;  %v2016_v26 = vadd.f32 %v4278_v44, %v1884_v38  ;;  %v1726_v51 = vmul.f32 %v3788_v21, %v4522_v60  ;;  %v1484_v33 = vpop.permute.xlu2 %1483 }
 0x313   : > { %v2389_v12 = vpop.f32.mrf.mxu2 }
 0x314   : > { %v2643_v7 = vadd.f32 %v4457_v16, %v2389_v12  ;;  %2803 = vst.msk [vmem:[%s4011_s22 + $0x310] sm:$0xff] %vm2704_vm0, %v2674_v52  ;;  %v2257_v29 = vpop.f32.mrf.mxu0  ;;  %v2323_v17 = vpop.f32.mrf.mxu1  ;;  %v2086_v61 = vmax.f32 %v1958_v45, 0.0  ;;  %v1985_v45 = vadd.f32 %v4278_v44, %v1853_v27 }
 0x315   : > { %v2599_v24 = vadd.f32 %v4457_v16, %v2257_v29  ;;  %v2621_v30 = vadd.f32 %v4457_v16, %v2323_v17  ;;  %v1368_v47 = vpop.permute.xlu1 %1367 }
 0x316   : > { %2772 = vst.msk [vmem:[%s4011_s22 + $0x218] sm:$0xff] %vm2704_vm0, %v2643_v7  ;;  %v1699_v14 = vmul.f32 %v3788_v21, %v1368_v47  ;;  %2364 = vmatmul.f32.gmra.mxu1 %v2086_v61  ;;  %2532 = vmatmul.f32.gmra.mxu3 %v2142_v25  ;;  %v2144_v61 = vmax.f32 %v2016_v26, 0.0  ;;  %v5341_v25 = vld [vmem:[#allocation74_spill] sm:$0xff]  ;;  %v2113_v47 = vmax.f32 %v1985_v45, 0.0 }
 0x317   : > { %2728 = vst.msk [vmem:[%s4011_s22 + $0xb8] sm:$0xff] %vm2704_vm0, %v2599_v24  ;;  %v1854_v24 = vadd.f32 %v1726_v51, %v1085_v55 }
 0x318   : > { %2750 = vst.msk [vmem:[%s4011_s22 + $0x168] sm:$0xff] %vm2704_vm0, %v2621_v30  ;;  %v1827_v32 = vadd.f32 %v1699_v14, %v1058_v49  ;;  %2439 = vmatmul.f32.gmra.mxu2 %v2111_v53  ;;  %v4696_v53 = vld [vmem:[%s5005_s2] ss:$0 sm:$0xff]  ;;  %v1612_v36 = vpop.permute.xlu0 %1611 }
 0x319   : > { %v2485_v48 = vpop.f32.mrf.mxu3  ;;  %v2017_v3 = vadd.f32 %v4696_v53, %v1885_v0 }
 0x31a   : > { %v2675_v15 = vadd.f32 %v4457_v16, %v2485_v48  ;;  %v1959_v9 = vadd.f32 %v4278_v44, %v1827_v32  ;;  %v5342_v32 = vld [vmem:[#allocation140_spill] sm:$0xff]  ;;  %v1727_v48 = vmul.f32 %v3788_v21, %v1480_v35  ;;  %v1488_v28 = vpop.permute.xlu2 %1487 }
 0x31b   : > { %v2392_v19 = vpop.f32.mrf.mxu2  ;;  %v1117_v6 = vmul.f32 %v3791_v1, %v5342_v32 }
 0x31c   : > { %v2644_v63 = vadd.f32 %v4457_v16, %v2392_v19  ;;  %2804 = vst.msk [vmem:[%s4011_s22 + $0x318] sm:$0xff] %vm2704_vm0, %v2675_v15  ;;  %v2260_v42 = vpop.f32.mrf.mxu0  ;;  %v2326_v23 = vpop.f32.mrf.mxu1  ;;  %v2087_v18 = vmax.f32 %v1959_v9, 0.0  ;;  %v1986_v15 = vadd.f32 %v4696_v53, %v1854_v24  ;;  %v5343_v9 = vld [vmem:[#allocation131_spill] sm:$0xff] }
 0x31d   : > { %v2600_v56 = vadd.f32 %v4457_v16, %v2260_v42  ;;  %v2622_v62 = vadd.f32 %v4457_v16, %v2326_v23  ;;  %v1372_v13 = vpop.permute.xlu1 %1371  ;;  %v1086_v59 = vmul.f32 %v3791_v1, %v5343_v9  ;;  %v1886_v58 = vadd.f32 %v1758_v4, %v1117_v6  ;;  %v5347_v4 = vld [vmem:[#allocation134_spill] sm:$0xff] }
 0x31e   : > { %2773 = vst.msk [vmem:[%s4011_s22 + $0x220] sm:$0xff] %vm2704_vm0, %v2644_v63  ;;  %v1700_v34 = vmul.f32 %v3788_v21, %v1372_v13  ;;  %2367 = vmatmul.f32.gmra.mxu1 %v2087_v18  ;;  %2535 = vmatmul.f32.gmra.mxu3 %v2143_v40  ;;  %v2145_v23 = vmax.f32 %v2017_v3, 0.0  ;;  %v5344_v18 = vld [vmem:[#allocation100_spill] sm:$0xff] }
 0x31f   : > { %2729 = vst.msk [vmem:[%s4011_s22 + $0xc0] sm:$0xff] %vm2704_vm0, %v2600_v56  ;;  %v1061_v40 = vmul.f32 %v3791_v1, %v5344_v18  ;;  %v1855_v13 = vadd.f32 %v1727_v48, %v1086_v59  ;;  %v2018_v35 = vadd.f32 %v4696_v53, %v1886_v58 }
 0x320   : > { %2751 = vst.msk [vmem:[%s4011_s22 + $0x170] sm:$0xff] %vm2704_vm0, %v2622_v62  ;;  %v1828_v11 = vadd.f32 %v1700_v34, %v1059_v50  ;;  %2442 = vmatmul.f32.gmra.mxu2 %v2112_v2  ;;  %v2114_v34 = vmax.f32 %v1986_v15, 0.0 }
 0x321   : > { %v2488_v8 = vpop.f32.mrf.mxu3  ;;  %v1987_v22 = vadd.f32 %v4696_v53, %v1855_v13 }
 0x322   : > { %v2676_v41 = vadd.f32 %v4457_v16, %v2488_v8  ;;  %v1960_v52 = vadd.f32 %v4278_v44, %v1828_v11  ;;  %v1060_v44 = vmul.f32 %v3791_v1, %v5341_v25  ;;  %v1728_v11 = vmul.f32 %v3788_v21, %v1484_v33  ;;  %v1616_v8 = vpop.permute.xlu0 %1615 }
 0x323   : > { %v2395_v12 = vpop.f32.mrf.mxu2  ;;  %v2019_v25 = vadd.f32 %v4696_v53, %v4547_v39  ;;  %v1761_v9 = vmul.f32 %v3788_v21, %v1616_v8  ;;  %v5350_v8 = vld [vmem:[#allocation152_spill] sm:$0xff] }
 0x324   : > { %v2645_v7 = vadd.f32 %v4457_v16, %v2395_v12  ;;  %2805 = vst.msk [vmem:[%s4011_s22 + $0x320] sm:$0xff] %vm2704_vm0, %v2676_v41  ;;  %v2263_v29 = vpop.f32.mrf.mxu0  ;;  %v2329_v60 = vpop.f32.mrf.mxu1  ;;  %v2088_v17 = vmax.f32 %v1960_v52, 0.0  ;;  %v5345_v41 = vld [vmem:[#allocation122_spill] sm:$0xff]  ;;  %v2146_v12 = vmax.f32 %v2018_v35, 0.0 }
 0x325   : > { %v2601_v54 = vadd.f32 %v4457_v16, %v2263_v29  ;;  %v2623_v49 = vadd.f32 %v4457_v16, %v2329_v60  ;;  %v1376_v37 = vpop.permute.xlu1 %1375  ;;  %v1087_v52 = vmul.f32 %v3791_v1, %v5345_v41  ;;  %v2115_v60 = vmax.f32 %v1987_v22, 0.0 }
 0x326   : > { %2774 = vst.msk [vmem:[%s4011_s22 + $0x228] sm:$0xff] %vm2704_vm0, %v2645_v7  ;;  %v1701_v30 = vmul.f32 %v3788_v21, %v1376_v37  ;;  %2370 = vmatmul.f32.gmra.mxu1 %v2088_v17  ;;  %2538 = vmatmul.f32.gmra.mxu3 %v2144_v61  ;;  %v1492_v17 = vpop.permute.xlu2 %1491  ;;  %v1760_v61 = vmul.f32 %v3788_v21, %v1612_v36  ;;  %v2147_v36 = vmax.f32 %v2019_v25, 0.0 }
 0x327   : > { %2730 = vst.msk [vmem:[%s4011_s22 + $0xc8] sm:$0xff] %vm2704_vm0, %v2601_v54  ;;  %v1856_v29 = vadd.f32 %v1728_v11, %v1087_v52  ;;  %v5346_v54 = vld [vmem:[#allocation149_spill] sm:$0xff]  ;;  %v1729_v37 = vmul.f32 %v3788_v21, %v1488_v28 }
 0x328   : > { %2752 = vst.msk [vmem:[%s4011_s22 + $0x178] sm:$0xff] %vm2704_vm0, %v2623_v49  ;;  %v1829_v14 = vadd.f32 %v1701_v30, %v1060_v44  ;;  %2445 = vmatmul.f32.gmra.mxu2 %v2113_v47  ;;  %v1119_v49 = vmul.f32 %v3791_v1, %v5346_v54 }
 0x329   : > { %v2491_v31 = vpop.f32.mrf.mxu3  ;;  %v1988_v30 = vadd.f32 %v4696_v53, %v1856_v29 }
 0x32a   : > { %v2677_v43 = vadd.f32 %v4457_v16, %v2491_v31  ;;  %v1961_v5 = vadd.f32 %v4696_v53, %v1829_v14  ;;  %v1088_v14 = vmul.f32 %v3791_v1, %v5347_v4  ;;  %v1888_v3 = vadd.f32 %v1760_v61, %v1119_v49  ;;  %v1620_v31 = vpop.permute.xlu0 %1619 }
 0x32b   : > { %v2398_v20 = vpop.f32.mrf.mxu2  ;;  %v2116_v15 = vmax.f32 %v1988_v30, 0.0 }
 0x32c   : > { %v2646_v19 = vadd.f32 %v4457_v16, %v2398_v20  ;;  %2806 = vst.msk [vmem:[%s4011_s22 + $0x328] sm:$0xff] %vm2704_vm0, %v2677_v43  ;;  %v2266_v38 = vpop.f32.mrf.mxu0  ;;  %v2332_v63 = vpop.f32.mrf.mxu1  ;;  %v2089_v42 = vmax.f32 %v1961_v5, 0.0  ;;  %v1857_v5 = vadd.f32 %v1729_v37, %v1088_v14  ;;  %v2020_v59 = vadd.f32 %v4696_v53, %v1888_v3 }
 0x32d   : > { %v2602_v50 = vadd.f32 %v4457_v16, %v2266_v38  ;;  %v2624_v56 = vadd.f32 %v4457_v16, %v2332_v63  ;;  %v1380_v62 = vpop.permute.xlu1 %1379  ;;  %v1730_v63 = vmul.f32 %v3788_v21, %v1492_v17 }
 0x32e   : > { %2775 = vst.msk [vmem:[%s4011_s22 + $0x230] sm:$0xff] %vm2704_vm0, %v2646_v19  ;;  %v1702_v27 = vmul.f32 %v3788_v21, %v1380_v62  ;;  %2373 = vmatmul.f32.gmra.mxu1 %v2089_v42  ;;  %2541 = vmatmul.f32.gmra.mxu3 %v2145_v23  ;;  %v1496_v20 = vpop.permute.xlu2 %1495  ;;  %v5348_v19 = vld [vmem:[#allocation141_spill] sm:$0xff]  ;;  %v1989_v23 = vadd.f32 %v4696_v53, %v1857_v5 }
 0x32f   : > { %2731 = vst.msk [vmem:[%s4011_s22 + $0xd0] sm:$0xff] %vm2704_vm0, %v2602_v50  ;;  %v1120_v38 = vmul.f32 %v3791_v1, %v5348_v19  ;;  %v1731_v41 = vmul.f32 %v3788_v21, %v1496_v20 }
 0x330   : > { %2753 = vst.msk [vmem:[%s4011_s22 + $0x180] sm:$0xff] %vm2704_vm0, %v2624_v56  ;;  %v1830_v2 = vadd.f32 %v1702_v27, %v1061_v40  ;;  %2448 = vmatmul.f32.gmra.mxu2 %v2114_v34  ;;  %v5349_v40 = vld [vmem:[#allocation133_spill] sm:$0xff]  ;;  %v2148_v27 = vmax.f32 %v2020_v59, 0.0 }
 0x331   : > { %v2494_v10 = vpop.f32.mrf.mxu3  ;;  %v1089_v28 = vmul.f32 %v3791_v1, %v5349_v40  ;;  %v1889_v50 = vadd.f32 %v1761_v9, %v1120_v38 }
 0x332   : > { %v2678_v26 = vadd.f32 %v4457_v16, %v2494_v10  ;;  %v1962_v57 = vadd.f32 %v4696_v53, %v1830_v2  ;;  %v2117_v10 = vmax.f32 %v1989_v23, 0.0  ;;  %v1624_v11 = vpop.permute.xlu0 %1623  ;;  %v5354_v23 = vld [vmem:[#allocation144_spill] sm:$0xff] }
 0x333   : > { %v2401_v51 = vpop.f32.mrf.mxu2  ;;  %v1858_v35 = vadd.f32 %v1730_v63, %v1089_v28  ;;  %v1763_v49 = vmul.f32 %v3788_v21, %v1624_v11 }
 0x334   : > { %v2647_v45 = vadd.f32 %v4457_v16, %v2401_v51  ;;  %2807 = vst.msk [vmem:[%s4011_s22 + $0x330] sm:$0xff] %vm2704_vm0, %v2678_v26  ;;  %v2269_v46 = vpop.f32.mrf.mxu0  ;;  %v2335_v55 = vpop.f32.mrf.mxu1  ;;  %v2090_v33 = vmax.f32 %v1962_v57, 0.0  ;;  %v1762_v26 = vmul.f32 %v3788_v21, %v1620_v31  ;;  %v2021_v57 = vadd.f32 %v4696_v53, %v1889_v50 }
 0x335   : > { %v2603_v0 = vadd.f32 %v4457_v16, %v2269_v46  ;;  %v2625_v7 = vadd.f32 %v4457_v16, %v2335_v55  ;;  %v1121_v51 = vmul.f32 %v3791_v1, %v5350_v8 }
 0x336   : > { %2776 = vst.msk [vmem:[%s4011_s22 + $0x238] sm:$0xff] %vm2704_vm0, %v2647_v45  ;;  %2376 = vmatmul.f32.gmra.mxu1 %v2090_v33  ;;  %2544 = vmatmul.f32.gmra.mxu3 %v2146_v12  ;;  %v1990_v45 = vadd.f32 %v4696_v53, %v1858_v35  ;;  %v1500_v46 = vpop.permute.xlu2 %1499  ;;  %v5351_v33 = vld [vmem:[#allocation125_spill] sm:$0xff]  ;;  %v2149_v17 = vmax.f32 %v2021_v57, 0.0 }
 0x337   : > { %2732 = vst.msk [vmem:[%s4011_s22 + $0xd8] sm:$0xff] %vm2704_vm0, %v2603_v0  ;;  %v1090_v12 = vmul.f32 %v3791_v1, %v5351_v33  ;;  %v1890_v0 = vadd.f32 %v1762_v26, %v1121_v51  ;;  %v1732_v14 = vmul.f32 %v3788_v21, %v1500_v46 }
 0x338   : > { %2754 = vst.msk [vmem:[%s4011_s22 + $0x188] sm:$0xff] %vm2704_vm0, %v2625_v7  ;;  %2451 = vmatmul.f32.gmra.mxu2 %v2115_v60  ;;  %v2118_v54 = vmax.f32 %v1990_v45, 0.0 }
 0x339   : > { %v2497_v44 = vpop.f32.mrf.mxu3  ;;  %v2022_v37 = vadd.f32 %v4696_v53, %v1890_v0  ;;  %v5357_v0 = vld [vmem:[#allocation128_spill] sm:$0xff] }
 0x33a   : > { %v2679_v24 = vadd.f32 %v4457_v16, %v2497_v44  ;;  %v1859_v44 = vadd.f32 %v1731_v41, %v1090_v12 }
 0x33b   : > { %v2404_v47 = vpop.f32.mrf.mxu2 }
 0x33c   : > { %v2648_v39 = vadd.f32 %v4457_v16, %v2404_v47  ;;  %2808 = vst.msk [vmem:[%s4011_s22 + $0x338] sm:$0xff] %vm2704_vm0, %v2679_v24  ;;  %v2272_v32 = vpop.f32.mrf.mxu0  ;;  %v2338_v6 = vpop.f32.mrf.mxu1  ;;  %v5352_v47 = vld [vmem:[#allocation151_spill] sm:$0xff] }
 0x33d   : > { %v2604_v48 = vadd.f32 %v4457_v16, %v2272_v32  ;;  %v2626_v43 = vadd.f32 %v4457_v16, %v2338_v6  ;;  %v1628_v24 = vpop.permute.xlu0 %1627  ;;  %v1122_v4 = vmul.f32 %v3791_v1, %v5352_v47  ;;  %v5353_v6 = vld [vmem:[#allocation136_spill] sm:$0xff]  ;;  %v5358_v47 = vld [vmem:[#allocation153_spill] sm:$0xff] }
 0x33e   : > { %2777 = vst.msk [vmem:[%s4011_s22 + $0x240] sm:$0xff] %vm2704_vm0, %v2648_v39  ;;  %2547 = vmatmul.f32.gmra.mxu3 %v2147_v36  ;;  %v1991_v39 = vadd.f32 %v4696_v53, %v1859_v44  ;;  %v1091_v36 = vmul.f32 %v3791_v1, %v5353_v6  ;;  %v1504_v9 = vpop.permute.xlu2 %1503  ;;  %v1764_v38 = vmul.f32 %v3788_v21, %v1628_v24  ;;  %v4863_v6 = vld [vmem:[%s5007_s4] ss:$0 sm:$0xff] }
 0x33f   : > { %2733 = vst.msk [vmem:[%s4011_s22 + $0xe0] sm:$0xff] %vm2704_vm0, %v2604_v48  ;;  %v1891_v31 = vadd.f32 %v1763_v49, %v1122_v4  ;;  %v1733_v40 = vmul.f32 %v3788_v21, %v1504_v9  ;;  %v1125_v4 = vmul.f32 %v3791_v1, %v5358_v47 }
 0x340   : > { %2755 = vst.msk [vmem:[%s4011_s22 + $0x190] sm:$0xff] %vm2704_vm0, %v2626_v43  ;;  %2454 = vmatmul.f32.gmra.mxu2 %v2116_v15  ;;  %v2150_v15 = vmax.f32 %v2022_v37, 0.0  ;;  %v2119_v19 = vmax.f32 %v1991_v39, 0.0 }
 0x341   : > { %v2500_v58 = vpop.f32.mrf.mxu3  ;;  %v2023_v63 = vadd.f32 %v4696_v53, %v1891_v31 }
 0x342   : > { %v2680_v42 = vadd.f32 %v4457_v16, %v2500_v58  ;;  %v1860_v58 = vadd.f32 %v1732_v14, %v1091_v36 }
 0x343   : > { %v2407_v18 = vpop.f32.mrf.mxu2 }
 0x344   : > { %v2649_v56 = vadd.f32 %v4457_v16, %v2407_v18  ;;  %2809 = vst.msk [vmem:[%s4011_s22 + $0x340] sm:$0xff] %vm2704_vm0, %v2680_v42  ;;  %v2275_v62 = vpop.f32.mrf.mxu0  ;;  %v2341_v13 = vpop.f32.mrf.mxu1  ;;  %v1123_v18 = vmul.f32 %v3791_v1, %v5354_v23  ;;  %v1992_v50 = vadd.f32 %v4696_v53, %v1860_v58 }
 0x345   : > { %v2605_v34 = vadd.f32 %v4457_v16, %v2275_v62  ;;  %v2627_v2 = vadd.f32 %v4457_v16, %v2341_v13  ;;  %v5355_v13 = vld [vmem:[#allocation135_spill] sm:$0xff] }
 0x346   : > { %2778 = vst.msk [vmem:[%s4011_s22 + $0x248] sm:$0xff] %vm2704_vm0, %v2649_v56  ;;  %2550 = vmatmul.f32.gmra.mxu3 %v2148_v27  ;;  %v1632_v56 = vpop.permute.xlu0 %1631  ;;  %v1092_v27 = vmul.f32 %v3791_v1, %v5355_v13  ;;  %v2120_v57 = vmax.f32 %v1992_v50, 0.0 }
 0x347   : > { %2734 = vst.msk [vmem:[%s4011_s22 + $0xe8] sm:$0xff] %vm2704_vm0, %v2605_v34  ;;  %v1892_v34 = vadd.f32 %v1764_v38, %v1123_v18  ;;  %v1765_v8 = vmul.f32 %v3788_v21, %v1632_v56 }
 0x348   : > { %2756 = vst.msk [vmem:[%s4011_s22 + $0x198] sm:$0xff] %vm2704_vm0, %v2627_v2  ;;  %2457 = vmatmul.f32.gmra.mxu2 %v2117_v10  ;;  %v2151_v10 = vmax.f32 %v2023_v63, 0.0  ;;  %v1861_v26 = vadd.f32 %v1733_v40, %v1092_v27 }
 0x349   : > { %v2503_v22 = vpop.f32.mrf.mxu3  ;;  %v2024_v51 = vadd.f32 %v4696_v53, %v1892_v34 }
 0x34a   : > { %v2681_v52 = vadd.f32 %v4457_v16, %v2503_v22  ;;  %v1508_v22 = vpop.permute.xlu2 %1507  ;;  %v1993_v33 = vadd.f32 %v4696_v53, %v1861_v26 }
 0x34b   : > { %v2410_v55 = vpop.f32.mrf.mxu2  ;;  %v1734_v46 = vmul.f32 %v3788_v21, %v1508_v22 }
 0x34c   : > { %v2650_v7 = vadd.f32 %v4457_v16, %v2410_v55  ;;  %2810 = vst.msk [vmem:[%s4011_s22 + $0x348] sm:$0xff] %vm2704_vm0, %v2681_v52  ;;  %v2278_v29 = vpop.f32.mrf.mxu0  ;;  %v2344_v60 = vpop.f32.mrf.mxu1  ;;  %v5356_v52 = vld [vmem:[#allocation154_spill] sm:$0xff]  ;;  %v2121_v49 = vmax.f32 %v1993_v33, 0.0 }
 0x34d   : > { %v2606_v61 = vadd.f32 %v4457_v16, %v2278_v29  ;;  %v2628_v25 = vadd.f32 %v4457_v16, %v2344_v60  ;;  %v1124_v45 = vmul.f32 %v3791_v1, %v5356_v52 }
 0x34e   : > { %2779 = vst.msk [vmem:[%s4011_s22 + $0x250] sm:$0xff] %vm2704_vm0, %v2650_v7  ;;  %2553 = vmatmul.f32.gmra.mxu3 %v2149_v17  ;;  %v1093_v7 = vmul.f32 %v3791_v1, %v5357_v0 }
 0x34f   : > { %2735 = vst.msk [vmem:[%s4011_s22 + $0xf0] sm:$0xff] %vm2704_vm0, %v2606_v61  ;;  %v1893_v29 = vadd.f32 %v1765_v8, %v1124_v45  ;;  %v2152_v61 = vmax.f32 %v2024_v51, 0.0 }
 0x350   : > { %2757 = vst.msk [vmem:[%s4011_s22 + $0x1a0] sm:$0xff] %vm2704_vm0, %v2628_v25  ;;  %2460 = vmatmul.f32.gmra.mxu2 %v2118_v54  ;;  %v1636_v25 = vpop.permute.xlu0 %1635  ;;  %v1862_v54 = vadd.f32 %v1734_v46, %v1093_v7 }
 0x351   : > { %v2506_v30 = vpop.f32.mrf.mxu3  ;;  %v1766_v37 = vmul.f32 %v3788_v21, %v1636_v25  ;;  %v2025_v24 = vadd.f32 %v4696_v53, %v1893_v29 }
 0x352   : > { %v2682_v3 = vadd.f32 %v4457_v16, %v2506_v30 }
 0x353   : > { %v2413_v32 = vpop.f32.mrf.mxu2  ;;  %v2153_v31 = vmax.f32 %v2025_v24, 0.0 }
 0x354   : > { %v2651_v48 = vadd.f32 %v4457_v16, %v2413_v32  ;;  %2811 = vst.msk [vmem:[%s4011_s22 + $0x350] sm:$0xff] %vm2704_vm0, %v2682_v3  ;;  %v2281_v43 = vpop.f32.mrf.mxu0  ;;  %v2347_v5 = vpop.f32.mrf.mxu1  ;;  %v1994_v3 = vadd.f32 %v4696_v53, %v1862_v54  ;;  %v1894_v32 = vadd.f32 %v1766_v37, %v1125_v4 }
 0x355   : > { %v2607_v59 = vadd.f32 %v4457_v16, %v2281_v43  ;;  %v2629_v20 = vadd.f32 %v4457_v16, %v2347_v5 }
 0x356   : > { %2780 = vst.msk [vmem:[%s4011_s22 + $0x258] sm:$0xff] %vm2704_vm0, %v2651_v48  ;;  %2556 = vmatmul.f32.gmra.mxu3 %v2150_v15  ;;  %v2026_v48 = vadd.f32 %v4696_v53, %v1894_v32 }
 0x357   : > { %2736 = vst.msk [vmem:[%s4011_s22 + $0xf8] sm:$0xff] %vm2704_vm0, %v2607_v59 }
 0x358   : > { %2758 = vst.msk [vmem:[%s4011_s22 + $0x1a8] sm:$0xff] %vm2704_vm0, %v2629_v20  ;;  %2463 = vmatmul.f32.gmra.mxu2 %v2119_v19  ;;  %v2154_v59 = vmax.f32 %v2026_v48, 0.0 }
 0x359   : > { %v2509_v42 = vpop.f32.mrf.mxu3 }
 0x35a   : > { %v2683_v28 = vadd.f32 %v4457_v16, %v2509_v42 }
 0x35b   : > { %v2416_v62 = vpop.f32.mrf.mxu2 }
 0x35c   : > { %v2652_v2 = vadd.f32 %v4457_v16, %v2416_v62  ;;  %2812 = vst.msk [vmem:[%s4011_s22 + $0x358] sm:$0xff] %vm2704_vm0, %v2683_v28  ;;  %v2350_v35 = vpop.f32.mrf.mxu1 }
 0x35d   : > { %v2630_v11 = vadd.f32 %v4457_v16, %v2350_v35 }
 0x35e   : > { %2781 = vst.msk [vmem:[%s4011_s22 + $0x260] sm:$0xff] %vm2704_vm0, %v2652_v2  ;;  %2559 = vmatmul.f32.gmra.mxu3 %v2151_v10 }
 0x35f   : > { %2759 = vst.msk [vmem:[%s4011_s22 + $0x1b0] sm:$0xff] %vm2704_vm0, %v2630_v11 }
 0x360   : > { %2466 = vmatmul.f32.gmra.mxu2 %v2120_v57 }
 0x361   : > { %v2512_v41 = vpop.f32.mrf.mxu3 }
 0x362   : > { %v2684_v55 = vadd.f32 %v4457_v16, %v2512_v41 }
 0x363   : > { %v2419_v12 = vpop.f32.mrf.mxu2 }
 0x364   : > { %v2653_v60 = vadd.f32 %v4457_v16, %v2419_v12  ;;  %2813 = vst.msk [vmem:[%s4011_s22 + $0x360] sm:$0xff] %vm2704_vm0, %v2684_v55  ;;  %v2353_v17 = vpop.f32.mrf.mxu1 }
 0x365   : > { %v2631_v44 = vadd.f32 %v4457_v16, %v2353_v17 }
 0x366   : > { %2782 = vst.msk [vmem:[%s4011_s22 + $0x268] sm:$0xff] %vm2704_vm0, %v2653_v60  ;;  %2562 = vmatmul.f32.gmra.mxu3 %v2152_v61 }
 0x367   : > { %2760 = vst.msk [vmem:[%s4011_s22 + $0x1b8] sm:$0xff] %vm2704_vm0, %v2631_v44 }
 0x368   : > { %2469 = vmatmul.f32.gmra.mxu2 %v2121_v49 }
 0x369   : > { %v2515_v30 = vpop.f32.mrf.mxu3 }
 0x36a   : > { %v2685_v14 = vadd.f32 %v4457_v16, %v2515_v30  ;;  %v2122_v16 = vmax.f32 %v1994_v3, 0.0 }
 0x36b   : > { %v2422_v39 = vpop.f32.mrf.mxu2 }
 0x36c   : > { %v2654_v21 = vadd.f32 %v4863_v6, %v2422_v39  ;;  %2814 = vst.msk [vmem:[%s4011_s22 + $0x368] sm:$0xff] %vm2704_vm0, %v2685_v14  ;;  %v2356_v36 = vpop.f32.mrf.mxu1 }
 0x36d   : > { %v2632_v1 = vadd.f32 %v4863_v6, %v2356_v36 }
 0x36e   : > { %2783 = vst.msk [vmem:[%s4011_s22 + $0x270] sm:$0xff] %vm2704_vm0, %v2654_v21  ;;  %2565 = vmatmul.f32.gmra.mxu3 %v2153_v31 }
 0x36f   : > { %2761 = vst.msk [vmem:[%s4011_s22 + $0x1c0] sm:$0xff] %vm2704_vm0, %v2632_v1 }
 0x370   : > { %2472 = vmatmul.f32.gmra.mxu2 %v2122_v16 }
 0x371   : > { %v2518_v43 = vpop.f32.mrf.mxu3 }
 0x372   : > { %v2686_v5 = vadd.f32 %v4863_v6, %v2518_v43 }
 0x373   : > { %v2425_v15 = vpop.f32.mrf.mxu2 }
 0x374   : > { %v2655_v9 = vadd.f32 %v4863_v6, %v2425_v15  ;;  %2815 = vst.msk [vmem:[%s4011_s22 + $0x370] sm:$0xff] %vm2704_vm0, %v2686_v5 }
 0x376   : > { %2784 = vst.msk [vmem:[%s4011_s22 + $0x278] sm:$0xff] %vm2704_vm0, %v2655_v9  ;;  %2568 = vmatmul.f32.gmra.mxu3 %v2154_v59 }
 0x379   : > { %v2521_v20 = vpop.f32.mrf.mxu3 }
 0x37a   : > { %v2687_v58 = vadd.f32 %v4863_v6, %v2521_v20 }
 0x37b   : > { %v2428_v19 = vpop.f32.mrf.mxu2 }
 0x37c   : > { %v2656_v53 = vadd.f32 %v4863_v6, %v2428_v19  ;;  %2816 = vst.msk [vmem:[%s4011_s22 + $0x378] sm:$0xff] %vm2704_vm0, %v2687_v58 }
 0x37e   : > { %2785 = vst.msk [vmem:[%s4011_s22 + $0x280] sm:$0xff] %vm2704_vm0, %v2656_v53 }
 0x381   : > { %v2524_v38 = vpop.f32.mrf.mxu3 }
 0x382   : > { %v2688_v63 = vadd.f32 %v4863_v6, %v2524_v38 }
 0x383   : > { %v2431_v42 = vpop.f32.mrf.mxu2  ;;  %v2359_v23 = vpop.f32.mrf.mxu1 }
 0x384   : > { %v2657_v18 = vadd.f32 %v4863_v6, %v2431_v42  ;;  %2817 = vst.msk [vmem:[%s4011_s22 + $0x380] sm:$0xff] %vm2704_vm0, %v2688_v63  ;;  %v2633_v40 = vadd.f32 %v4863_v6, %v2359_v23 }
 0x386   : > { %2786 = vst.msk [vmem:[%s4011_s22 + $0x288] sm:$0xff] %vm2704_vm0, %v2657_v18 }
 0x387   : > { %2762 = vst.msk [vmem:[%s4011_s22 + $0x1c8] sm:$0xff] %vm2704_vm0, %v2633_v40 }
 0x389   : > { %v2527_v28 = vpop.f32.mrf.mxu3 }
 0x38a   : > { %v2689_v50 = vadd.f32 %v4863_v6, %v2527_v28 }
 0x38b   : > { %v2434_v56 = vpop.f32.mrf.mxu2  ;;  %v2362_v62 = vpop.f32.mrf.mxu1 }
 0x38c   : > { %v2658_v13 = vadd.f32 %v4863_v6, %v2434_v56  ;;  %2818 = vst.msk [vmem:[%s4011_s22 + $0x388] sm:$0xff] %vm2704_vm0, %v2689_v50  ;;  %v2634_v27 = vadd.f32 %v4863_v6, %v2362_v62 }
 0x38e   : > { %2787 = vst.msk [vmem:[%s4011_s22 + $0x290] sm:$0xff] %vm2704_vm0, %v2658_v13 }
 0x38f   : > { %2763 = vst.msk [vmem:[%s4011_s22 + $0x1d0] sm:$0xff] %vm2704_vm0, %v2634_v27 }
 0x391   : > { %v2530_v34 = vpop.f32.mrf.mxu3 }
 0x392   : > { %v2690_v2 = vadd.f32 %v4863_v6, %v2530_v34 }
 0x393   : > { %v2437_v35 = vpop.f32.mrf.mxu2  ;;  %v2365_v10 = vpop.f32.mrf.mxu1 }
 0x394   : > { %v2659_v11 = vadd.f32 %v4863_v6, %v2437_v35  ;;  %2819 = vst.msk [vmem:[%s4011_s22 + $0x390] sm:$0xff] %vm2704_vm0, %v2690_v2  ;;  %v2635_v26 = vadd.f32 %v4863_v6, %v2365_v10 }
 0x396   : > { %2788 = vst.msk [vmem:[%s4011_s22 + $0x298] sm:$0xff] %vm2704_vm0, %v2659_v11 }
 0x397   : > { %2764 = vst.msk [vmem:[%s4011_s22 + $0x1d8] sm:$0xff] %vm2704_vm0, %v2635_v26 }
 0x399   : > { %v2533_v57 = vpop.f32.mrf.mxu3 }
 0x39a   : > { %v2691_v22 = vadd.f32 %v4863_v6, %v2533_v57 }
 0x39b   : > { %v2440_v8 = vpop.f32.mrf.mxu2  ;;  %v2368_v51 = vpop.f32.mrf.mxu1 }
 0x39c   : > { %v2660_v41 = vadd.f32 %v4863_v6, %v2440_v8  ;;  %2820 = vst.msk [vmem:[%s4011_s22 + $0x398] sm:$0xff] %vm2704_vm0, %v2691_v22  ;;  %v2636_v52 = vadd.f32 %v4863_v6, %v2368_v51 }
 0x39e   : > { %2789 = vst.msk [vmem:[%s4011_s22 + $0x2a0] sm:$0xff] %vm2704_vm0, %v2660_v41 }
 0x39f   : > { %2765 = vst.msk [vmem:[%s4011_s22 + $0x1e0] sm:$0xff] %vm2704_vm0, %v2636_v52 }
 0x3a1   : > { %v2536_v45 = vpop.f32.mrf.mxu3 }
 0x3a2   : > { %v2692_v46 = vadd.f32 %v4863_v6, %v2536_v45 }
 0x3a3   : > { %v2443_v55 = vpop.f32.mrf.mxu2  ;;  %v2371_v33 = vpop.f32.mrf.mxu1 }
 0x3a4   : > { %v2661_v12 = vadd.f32 %v4863_v6, %v2443_v55  ;;  %2821 = vst.msk [vmem:[%s4011_s22 + $0x3a0] sm:$0xff] %vm2704_vm0, %v2692_v46  ;;  %v2637_v0 = vadd.f32 %v4863_v6, %v2371_v33 }
 0x3a6   : > { %2790 = vst.msk [vmem:[%s4011_s22 + $0x2a8] sm:$0xff] %vm2704_vm0, %v2661_v12 }
 0x3a7   : > { %2766 = vst.msk [vmem:[%s4011_s22 + $0x1e8] sm:$0xff] %vm2704_vm0, %v2637_v0 }
 0x3a9   : > { %v2539_v7 = vpop.f32.mrf.mxu3 }
 0x3aa   : > { %v2693_v29 = vadd.f32 %v4863_v6, %v2539_v7 }
 0x3ab   : > { %v2446_v60 = vpop.f32.mrf.mxu2  ;;  %v2374_v17 = vpop.f32.mrf.mxu1 }
 0x3ac   : > { %v2662_v61 = vadd.f32 %v4863_v6, %v2446_v60  ;;  %2822 = vst.msk [vmem:[%s4011_s22 + $0x3a8] sm:$0xff] %vm2704_vm0, %v2693_v29  ;;  %v2638_v25 = vadd.f32 %v4863_v6, %v2374_v17 }
 0x3ae   : > { %2791 = vst.msk [vmem:[%s4011_s22 + $0x2b0] sm:$0xff] %vm2704_vm0, %v2662_v61 }
 0x3af   : > { %2767 = vst.msk [vmem:[%s4011_s22 + $0x1f0] sm:$0xff] %vm2704_vm0, %v2638_v25 }
 0x3b1   : > { %v2542_v44 = vpop.f32.mrf.mxu3 }
 0x3b2   : > { %v2694_v54 = vadd.f32 %v4863_v6, %v2542_v44 }
 0x3b3   : > { %v2449_v49 = vpop.f32.mrf.mxu2  ;;  %v2377_v37 = vpop.f32.mrf.mxu1 }
 0x3b4   : > { %v2663_v24 = vadd.f32 %v4863_v6, %v2449_v49  ;;  %2823 = vst.msk [vmem:[%s4011_s22 + $0x3b0] sm:$0xff] %vm2704_vm0, %v2694_v54  ;;  %v2639_v30 = vadd.f32 %v4863_v6, %v2377_v37 }
 0x3b6   : > { %2792 = vst.msk [vmem:[%s4011_s22 + $0x2b8] sm:$0xff] %vm2704_vm0, %v2663_v24 }
 0x3b7   : > { %2768 = vst.msk [vmem:[%s4011_s22 + $0x1f8] sm:$0xff] %vm2704_vm0, %v2639_v30 }
 0x3b9   : > { %v2545_v47 = vpop.f32.mrf.mxu3 }
 0x3ba   : > { %v2695_v4 = vadd.f32 %v4863_v6, %v2545_v47 }
 0x3bb   : > { %v2452_v14 = vpop.f32.mrf.mxu2 }
 0x3bc   : > { %v2664_v3 = vadd.f32 %v4863_v6, %v2452_v14  ;;  %2824 = vst.msk [vmem:[%s4011_s22 + $0x3b8] sm:$0xff] %vm2704_vm0, %v2695_v4 }
 0x3be   : > { %2793 = vst.msk [vmem:[%s4011_s22 + $0x2c0] sm:$0xff] %vm2704_vm0, %v2664_v3 }
 0x3c1   : > { %v2548_v39 = vpop.f32.mrf.mxu3 }
 0x3c2   : > { %v2696_v32 = vadd.f32 %v4863_v6, %v2548_v39 }
 0x3c3   : > { %v2455_v21 = vpop.f32.mrf.mxu2 }
 0x3c4   : > { %v2665_v36 = vadd.f32 %v4863_v6, %v2455_v21  ;;  %2825 = vst.msk [vmem:[%s4011_s22 + $0x3c0] sm:$0xff] %vm2704_vm0, %v2696_v32 }
 0x3c6   : > { %2794 = vst.msk [vmem:[%s4011_s22 + $0x2c8] sm:$0xff] %vm2704_vm0, %v2665_v36 }
 0x3c9   : > { %v2551_v31 = vpop.f32.mrf.mxu3 }
 0x3ca   : > { %v2697_v1 = vadd.f32 %v4863_v6, %v2551_v31 }
 0x3cb   : > { %v2458_v16 = vpop.f32.mrf.mxu2 }
 0x3cc   : > { %v2666_v48 = vadd.f32 %v4863_v6, %v2458_v16  ;;  %2826 = vst.msk [vmem:[%s4011_s22 + $0x3c8] sm:$0xff] %vm2704_vm0, %v2697_v1 }
 0x3ce   : > { %2795 = vst.msk [vmem:[%s4011_s22 + $0x2d0] sm:$0xff] %vm2704_vm0, %v2666_v48 }
 0x3d1   : > { %v2554_v43 = vpop.f32.mrf.mxu3 }
 0x3d2   : > { %v2698_v5 = vadd.f32 %v4863_v6, %v2554_v43 }
 0x3d3   : > { %v2461_v15 = vpop.f32.mrf.mxu2 }
 0x3d4   : > { %v2667_v9 = vadd.f32 %v4863_v6, %v2461_v15  ;;  %2827 = vst.msk [vmem:[%s4011_s22 + $0x3d0] sm:$0xff] %vm2704_vm0, %v2698_v5 }
 0x3d6   : > { %2796 = vst.msk [vmem:[%s4011_s22 + $0x2d8] sm:$0xff] %vm2704_vm0, %v2667_v9 }
 0x3d9   : > { %v2557_v59 = vpop.f32.mrf.mxu3 }
 0x3da   : > { %v2699_v20 = vadd.f32 %v4863_v6, %v2557_v59 }
 0x3db   : > { %v2464_v58 = vpop.f32.mrf.mxu2 }
 0x3dc   : > { %v2668_v19 = vadd.f32 %v4863_v6, %v2464_v58  ;;  %2828 = vst.msk [vmem:[%s4011_s22 + $0x3d8] sm:$0xff] %vm2704_vm0, %v2699_v20 }
 0x3de   : > { %2797 = vst.msk [vmem:[%s4011_s22 + $0x2e0] sm:$0xff] %vm2704_vm0, %v2668_v19 }
 0x3e1   : > { %v2560_v53 = vpop.f32.mrf.mxu3 }
 0x3e2   : > { %v2700_v38 = vadd.f32 %v4863_v6, %v2560_v53 }
 0x3e3   : > { %v2467_v63 = vpop.f32.mrf.mxu2 }
 0x3e4   : > { %v2669_v42 = vadd.f32 %v4863_v6, %v2467_v63  ;;  %2829 = vst.msk [vmem:[%s4011_s22 + $0x3e0] sm:$0xff] %vm2704_vm0, %v2700_v38 }
 0x3e6   : > { %2798 = vst.msk [vmem:[%s4011_s22 + $0x2e8] sm:$0xff] %vm2704_vm0, %v2669_v42 }
 0x3e9   : > { %v2563_v23 = vpop.f32.mrf.mxu3 }
 0x3ea   : > { %v2701_v18 = vadd.f32 %v4863_v6, %v2563_v23 }
 0x3eb   : > { %v2470_v40 = vpop.f32.mrf.mxu2 }
 0x3ec   : > { %v2670_v28 = vadd.f32 %v4863_v6, %v2470_v40  ;;  %2830 = vst.msk [vmem:[%s4011_s22 + $0x3e8] sm:$0xff] %vm2704_vm0, %v2701_v18 }
 0x3ee   : > { %2799 = vst.msk [vmem:[%s4011_s22 + $0x2f0] sm:$0xff] %vm2704_vm0, %v2670_v28 }
 0x3f1   : > { %v2566_v50 = vpop.f32.mrf.mxu3 }
 0x3f2   : > { %v2702_v56 = vadd.f32 %v4863_v6, %v2566_v50 }
 0x3f3   : > { %v2473_v62 = vpop.f32.mrf.mxu2 }
 0x3f4   : > { %v2671_v13 = vadd.f32 %v4863_v6, %v2473_v62  ;;  %2831 = vst.msk [vmem:[%s4011_s22 + $0x3f0] sm:$0xff] %vm2704_vm0, %v2702_v56 }
 0x3f6   : > { %2800 = vst.msk [vmem:[%s4011_s22 + $0x2f8] sm:$0xff] %vm2704_vm0, %v2671_v13 }
 0x3f9   : > { %v2569_v27 = vpop.f32.mrf.mxu3 }
 0x3fa   : > { %v2703_v34 = vadd.f32 %v4863_v6, %v2569_v27 }
 0x3fc   : > { %2832 = vst.msk [vmem:[%s4011_s22 + $0x3f8] sm:$0xff] %vm2704_vm0, %v2703_v34 }
 0x3fd PF: > { %s15_s18 = sadd.s32 1, %s3013_s18  }
 0x3fe   : > { %p12_p4 = scmp.ge.s32.totalorder %s15_s18, 4  }
 0x400   :  { %14 = sbr.rel (!%p12_p4) target bundleno = 1 (0x1), region = 70 }

</bundles_post_ra>
